<compile_context>
chip_gen: v7x
topology: tpu7x:2x2x1
jax: 0.10.0
libtpu: 0.0.40
codegen_flags: <defaults>
</compile_context>

<pallas_src>
import functools

import jax
import jax.numpy as jnp
from jax.experimental import pallas as pl
from jax.experimental.pallas import tpu as pltpu


def _tpu_generation():
    """Best-effort TPU generation sniff (5/6/7); 0 if unknown (be conservative)."""
    try:
        kind = jax.devices()[0].device_kind.lower()
    except Exception:
        return 0
    for gen, tags in ((7, ("v7", "tpu7", "7x")),
                      (6, ("v6", "trillium")),
                      (5, ("v5",)),
                      (4, ("v4",))):
        if any(tag in kind for tag in tags):
            return gen
    return 0


_TPU_GEN = _tpu_generation()
# bf16 EUP exists on v6e/v7x only; keep f32 exp on v5e / unknown chips.
_USE_BF16_EXP = _TPU_GEN >= 6
# v7x has 64 MiB physical VMEM per TC -> keep headroom; v5e/v6e have 128 MiB.
_VMEM_LIMIT_BYTES = (40 if (_TPU_GEN >= 7 or _TPU_GEN == 0) else 64) * 1024 * 1024
_TILE_L_PROJ_TARGET = 2048                       # kernel A: big tile, tiny VMEM/step
_TILE_L_ATTN_TARGET = 256 if (_TPU_GEN >= 7 or _TPU_GEN == 0) else 512
_TILE_LP_TARGET = 512                            # pooled-axis chunk for online softmax


def _pick_tile(L, target):
    """Largest lane-aligned tile along L: a multiple of 128 that divides L and is
    <= target; falls back to the full extent L when no such divisor exists."""
    if L <= target:
        return L
    for m in range(min(target, L) // 128, 0, -1):
        cand = m * 128
        if L % cand == 0:
            return cand
    return L


# ---------------------------------------------------------------------------
# Pallas kernels
# ---------------------------------------------------------------------------
def _fused_proj_kernel(x_ref, w_ref, b_ref, o_ref):
    # x_ref: (1, Cin, TL) f32/bf16 ; w_ref: (Ctot, Cin) bf16 ; b_ref: (Ctot, 1) f32
    # o_ref: (1, Ctot, TL) bf16   (rows = [theta | phi | g])
    x = x_ref[0].astype(jnp.bfloat16)                                 # (Cin, TL)
    y = jnp.dot(w_ref[...], x, preferred_element_type=jnp.float32)   # (Ctot, TL) f32
    y = jnp.maximum(y + b_ref[...], 0.0)                              # ConvST3d act='relu'
    o_ref[0] = y.astype(o_ref.dtype)


def _attn_out_kernel(theta_ref, phi_ref, g_ref, x_ref, wo_ref, bo_ref,
                     gamma_ref, o_ref, m_sc, l_sc, acc_sc, *, use_bf16_exp):
    # Grid: (n, l, m) with m = pooled-axis (Lp) chunk, innermost + "arbitrary".
    # theta_ref: (1, c1, TL) bf16 (resident across m) ; phi_ref: (1, c1, TLp) bf16
    # g_ref: (1, c2, TLp) bf16 ; x_ref: (1, ch, TL) f32 (resident across m)
    # wo_ref: (ch, c2) bf16 ; bo_ref: (ch, 1) f32 ; gamma_ref: SMEM f32[1]
    # scratch: m_sc (1, TL) f32, l_sc (1, TL) f32, acc_sc (c2, TL) f32
    mi = pl.program_id(2)

    @pl.when(mi == 0)
    def _():
        m_sc[...] = jnp.full_like(m_sc, -jnp.inf)
        l_sc[...] = jnp.zeros_like(l_sc)
        acc_sc[...] = jnp.zeros_like(acc_sc)

    theta = theta_ref[0]                                              # (c1, TL)
    phi = phi_ref[0]                                                  # (c1, TLp)
    gv = g_ref[0]                                                     # (c2, TLp)

    # s_t[m, l] = sum_c phi[c, m] * theta[c, l]  — scores built transposed so
    # the softmax axis is the sublane axis and neither matmul needs a transpose.
    s = jax.lax.dot_general(phi, theta, (((0,), (0,)), ((), ())),
                            preferred_element_type=jnp.float32)       # (TLp, TL) f32

    # Online softmax over the pooled axis (axis 0), stats in f32.
    m_prev = m_sc[...]                                                # (1, TL)
    m_new = jnp.maximum(m_prev, jnp.max(s, axis=0, keepdims=True))    # (1, TL)
    alpha = jnp.exp(m_prev - m_new)                                   # (1, TL)

    if use_bf16_exp:
        # v6e/v7x: bf16 EUP ~2x exp throughput; denominator summed in f32.
        p = jnp.exp((s - m_new).astype(jnp.bfloat16))                 # (TLp, TL) bf16
        psum = jnp.sum(p.astype(jnp.float32), axis=0, keepdims=True)  # (1, TL) f32
        pv = p
    else:
        p = jnp.exp(s - m_new)                                        # f32 (v5e path)
        psum = jnp.sum(p, axis=0, keepdims=True)
        pv = p.astype(jnp.bfloat16)

    l_sc[...] = alpha * l_sc[...] + psum
    acc_sc[...] = alpha * acc_sc[...] + jnp.dot(
        gv, pv, preferred_element_type=jnp.float32)                   # (c2, TL) f32
    m_sc[...] = m_new

    @pl.when(mi == pl.num_programs(2) - 1)
    def _():
        # 1/denom on the EUP, folded once into the (c2, TL) accumulator.
        inv = pl.reciprocal(l_sc[...], approx=True)                   # (1, TL)
        ag = (acc_sc[...] * inv).astype(jnp.bfloat16)                 # (c2, TL)
        # cov_out: 1x1x1 conv + bias + relu, then residual x + gamma * (.)
        y = jnp.dot(wo_ref[...], ag,
                    preferred_element_type=jnp.float32) + bo_ref[...]  # (ch, TL)
        y = jnp.maximum(y, 0.0)
        o_ref[0] = x_ref[0] + gamma_ref[0] * y


# ---------------------------------------------------------------------------
# Pallas wrappers
# ---------------------------------------------------------------------------
def fused_projection(x_flat, w_all, b_all, *, tile_l):
    """theta/phi/g 1x1x1 convs fused into one matmul pass over x (bf16 out)."""
    N, Cin, L = x_flat.shape
    Ctot = w_all.shape[0]
    flops = 2 * N * Ctot * Cin * L
    bytes_accessed = (x_flat.size * x_flat.dtype.itemsize + w_all.size * 2
                      + b_all.size * 4 + N * Ctot * L * 2)
    return pl.pallas_call(
        _fused_proj_kernel,
        out_shape=jax.ShapeDtypeStruct((N, Ctot, L), jnp.bfloat16),
        grid_spec=pltpu.PrefetchScalarGridSpec(
            num_scalar_prefetch=0,
            grid=(N, L // tile_l),
            in_specs=[pl.BlockSpec((1, Cin, tile_l), lambda n, l: (n, 0, l)),
                      pl.BlockSpec((Ctot, Cin), lambda n, l: (0, 0)),
                      pl.BlockSpec((Ctot, 1), lambda n, l: (0, 0))],
            out_specs=pl.BlockSpec((1, Ctot, tile_l), lambda n, l: (n, 0, l)),
        ),
        compiler_params=pltpu.CompilerParams(
            dimension_semantics=("parallel", "parallel"),
            vmem_limit_bytes=_VMEM_LIMIT_BYTES),
        cost_estimate=pl.CostEstimate(flops=flops, transcendentals=0,
                                      bytes_accessed=bytes_accessed),
    )(x_flat, w_all, b_all)


def attention_out(theta, phi, g, x_flat, wo, bo, gamma, *, tile_l, tile_lp,
                  use_bf16_exp=_USE_BF16_EXP):
    """softmax(theta^T phi) attention + cov_out(conv+relu) + residual, fused.

    Grid (N, L/tile_l, Lp/tile_lp); the pooled axis is a flash-style online
    softmax reduction, so peak VMEM is O(tile_lp * tile_l), independent of L.
    """
    N, c1, L = theta.shape
    Lp = phi.shape[2]
    c2 = g.shape[1]
    ch = x_flat.shape[1]
    kernel = functools.partial(_attn_out_kernel, use_bf16_exp=use_bf16_exp)
    flops = 2 * N * L * Lp * (c1 + c2) + 2 * N * ch * c2 * L
    bytes_accessed = (theta.size * 2 + (phi.size + g.size) * 2 * (L // tile_l)
                      + wo.size * 2 + (2 * x_flat.size + bo.size + 1) * 4)
    return pl.pallas_call(
        kernel,
        out_shape=jax.ShapeDtypeStruct((N, ch, L), jnp.float32),
        grid_spec=pltpu.PrefetchScalarGridSpec(
            num_scalar_prefetch=0,
            grid=(N, L // tile_l, Lp // tile_lp),
            in_specs=[
                pl.BlockSpec((1, c1, tile_l), lambda n, l, m: (n, 0, l)),
                pl.BlockSpec((1, c1, tile_lp), lambda n, l, m: (n, 0, m)),
                pl.BlockSpec((1, c2, tile_lp), lambda n, l, m: (n, 0, m)),
                pl.BlockSpec((1, ch, tile_l), lambda n, l, m: (n, 0, l)),
                pl.BlockSpec((ch, c2), lambda n, l, m: (0, 0)),
                pl.BlockSpec((ch, 1), lambda n, l, m: (0, 0)),
                pl.BlockSpec(memory_space=pltpu.MemorySpace.SMEM),
            ],
            out_specs=pl.BlockSpec((1, ch, tile_l), lambda n, l, m: (n, 0, l)),
            scratch_shapes=[
                pltpu.VMEM((1, tile_l), jnp.float32),    # running max
                pltpu.VMEM((1, tile_l), jnp.float32),    # running denominator
                pltpu.VMEM((c2, tile_l), jnp.float32),   # PV accumulator
            ],
        ),
        compiler_params=pltpu.CompilerParams(
            dimension_semantics=("parallel", "parallel", "arbitrary"),
            vmem_limit_bytes=_VMEM_LIMIT_BYTES),
        cost_estimate=pl.CostEstimate(flops=flops,
                                      transcendentals=N * L * Lp,
                                      bytes_accessed=bytes_accessed),
    )(theta, phi, g, x_flat, wo, bo, gamma)


# ---------------------------------------------------------------------------
# Glue (plain JAX): maxpool + parameter setup + module forward
# ---------------------------------------------------------------------------
def maxpool3d_2(x):
    """MaxPool3d(kernel=2, stride=2, padding=0) on [N, C, t, h, w] (dims even)."""
    N, C, t, h, w = x.shape
    return x.reshape(N, C, t // 2, 2, h // 2, 2, w // 2, 2).max(axis=(3, 5, 7))


@functools.partial(jax.jit, static_argnames=("C1", "C2"))
def self_attention_forward(x, params, C1=4, C2=2):
    (wf, bf), (wg, bg), (wh, bh), (wo, bo), gamma = params
    N, ch, t, h, w = x.shape
    assert ch % C1 == 0 and ch % C2 == 0
    assert t % 2 == 0 and h % 2 == 0 and w % 2 == 0, "MaxPool3d(2) needs even t/h/w"
    c1 = ch // C1
    c2 = ch // C2
    L = t * h * w
    Lp = L // 8

    # Decoupled tile sizes: kernel A is bandwidth-bound -> large tile; kernel B
    # is constrained by the per-chunk score buffer and megacore occupancy.
    tl_proj = _pick_tile(L, _TILE_L_PROJ_TARGET)
    tl_attn_target = _TILE_L_ATTN_TARGET
    if N == 1:
        # keep >=2 grid steps on a parallel axis so both v7x TCs get work.
        tl_attn_target = min(tl_attn_target, max(128, L // 2))
    tl_attn = _pick_tile(L, tl_attn_target)
    tlp = _pick_tile(Lp, _TILE_LP_TARGET)

    x_flat = x.reshape(N, ch, L)

    # Fused theta/phi/g projections: single pass over x, bf16 intermediates.
    # (x stays f32 here: a wrapper-side bf16 copy would cost an extra HBM pass
    #  unless it fuses into x's producer; the kernel casts in-registers and
    #  accepts an upstream-bf16 x unchanged.)
    w_all = jnp.concatenate([wf, wg, wh], axis=0).astype(jnp.bfloat16)  # (2c1+c2, ch)
    b_all = jnp.concatenate([bf, bg, bh], axis=0)                       # (2c1+c2, 1)
    proj = fused_projection(x_flat, w_all, b_all, tile_l=tl_proj)       # bf16

    theta = proj[:, :c1, :]                                             # (N, c1, L)
    phi = proj[:, c1:2 * c1, :].reshape(N, c1, t, h, w)
    g = proj[:, 2 * c1:, :].reshape(N, c2, t, h, w)

    # TODO(synk): fuse MaxPool3d(2) into kernel A's store path to drop the
    # full-resolution phi/g HBM round trip (needs 2x2x2 pooling over the
    # flattened lane axis, i.e. cross-lane relayouts).
    phi = maxpool3d_2(phi).reshape(N, c1, Lp)                           # (N, c1, L/8)
    g = maxpool3d_2(g).reshape(N, c2, Lp)                               # (N, c2, L/8)

    out_flat = attention_out(theta, phi, g, x_flat,
                             wo.astype(jnp.bfloat16), bo, gamma,
                             tile_l=tl_attn, tile_lp=tlp)
    return out_flat.reshape(N, ch, t, h, w)


def init_spectral_conv(key, cout, cin):
    """1x1x1 conv params with spectral-norm weight rescale (exact sigma)."""
    kw, kb = jax.random.split(key)
    W = jax.random.normal(kw, (cout, cin), jnp.float32) * 0.1
    b = jax.random.normal(kb, (cout, 1), jnp.float32) * 0.1
    sigma = jnp.linalg.svd(W, compute_uv=False)[0]
    return W / sigma, b


def reference_forward(x, params):
    """Pure-JAX f32 reference of the same forward (for correctness checking)."""
    (wf, bf), (wg, bg), (wh, bh), (wo, bo), gamma = params
    N, ch, t, h, w = x.shape
    c1, c2 = wf.shape[0], wh.shape[0]
    L = t * h * w
    hp = "highest"
    xf = x.reshape(N, ch, L)

    def conv(wgt, bias, inp):
        return jax.nn.relu(jnp.einsum("oc,ncl->nol", wgt, inp, precision=hp)
                           + bias[None])

    theta = conv(wf, bf, xf)                                            # (N, c1, L)
    phi = maxpool3d_2(conv(wg, bg, xf).reshape(N, c1, t, h, w)).reshape(N, c1, L // 8)
    g = maxpool3d_2(conv(wh, bh, xf).reshape(N, c2, t, h, w)).reshape(N, c2, L // 8)
    attn = jax.nn.softmax(
        jnp.einsum("ncl,ncm->nlm", theta, phi, precision=hp), axis=-1)  # (N, L, Lp)
    ag = jnp.einsum("ncm,nlm->ncl", g, attn, precision=hp)              # (N, c2, L)
    y = jax.nn.relu(jnp.einsum("oc,ncl->nol", wo, ag, precision=hp) + bo[None])
    return (xf + gamma[0] * y).reshape(N, ch, t, h, w)


# ---------------------------------------------------------------------------
if __name__ == "__main__":
    key = jax.random.PRNGKey(0)
    keys = jax.random.split(key, 6)

    # Shapes: ch=32 -> c1=8, c2=16, Ctot=32 (sublane-aligned channel blocks);
    # t*h*w = 8192 -> Lp = 1024 so the online-softmax path runs >1 Lp chunk.
    N, ch, t, h, w = 2, 32, 8, 32, 32
    C1, C2 = 4, 2

    x = jax.random.normal(keys[0], (N, ch, t, h, w), jnp.float32)

    params = (
        init_spectral_conv(keys[1], ch // C1, ch),    # f
        init_spectral_conv(keys[2], ch // C1, ch),    # g
        init_spectral_conv(keys[3], ch // C2, ch),    # h
        init_spectral_conv(keys[4], ch, ch // C2),    # cov_out
        # torch inits gamma to zeros; use 0.5 here so the check below actually
        # exercises the attention branch (out = x + gamma * attn_g).
        jnp.full((1,), 0.5, jnp.float32),
    )

    out = self_attention_forward(x, params, C1=C1, C2=C2)
    jax.block_until_ready(out)
    assert out.shape == (N, ch, t, h, w) and out.dtype == jnp.float32

    ref = reference_forward(x, params)
    err = float(jnp.max(jnp.abs(out - ref)))
    # bf16 intermediates + approx reciprocal: loose but meaningful tolerance.
    assert err < 5e-2, f"max abs error vs reference: {err}"

    print("KERNEL_OK")
</pallas_src>

<mosaic_0001>
module attributes {stable_mosaic.version = 11 : i64} {
  func.func @_fused_proj_kernel(%arg0: i32, %arg1: i32, %arg2: memref<1x32x2048xf32, #tpu.memory_space<vmem>>, %arg3: memref<32x32xbf16, #tpu.memory_space<vmem>>, %arg4: memref<32x1xf32, #tpu.memory_space<vmem>>, %arg5: memref<1x32x2048xbf16, #tpu.memory_space<vmem>>) attributes {dimension_semantics = [#tpu.dimension_semantics<parallel>, #tpu.dimension_semantics<parallel>], iteration_bounds = array<i64: 2, 4>, scalar_prefetch = 0 : i64, scratch_operands = 0 : i64, tpu.core_type = #tpu.core_type<tc>, window_params = [{transform_indices = @transform_0, window_bounds = array<i64: 1, 32, 2048>}, {pipeline_mode = #tpu.pipeline_mode<synchronous>, transform_indices = @transform_1, window_bounds = array<i64: 32, 32>}, {pipeline_mode = #tpu.pipeline_mode<synchronous>, transform_indices = @transform_2, window_bounds = array<i64: 32, 1>}, {transform_indices = @transform_3, window_bounds = array<i64: 1, 32, 2048>}]} {
    %c0 = arith.constant 0 : index
    %c0_0 = arith.constant 0 : index
    %c0_1 = arith.constant 0 : index
    %0 = vector.load %arg2[%c0, %c0_0, %c0_1] : memref<1x32x2048xf32, #tpu.memory_space<vmem>>, vector<1x32x2048xf32>
    %1 = vector.shape_cast %0 : vector<1x32x2048xf32> to vector<32x2048xf32>
    %2 = arith.truncf %1 : vector<32x2048xf32> to vector<32x2048xbf16>
    %c0_2 = arith.constant 0 : index
    %c0_3 = arith.constant 0 : index
    %3 = vector.load %arg3[%c0_2, %c0_3] : memref<32x32xbf16, #tpu.memory_space<vmem>>, vector<32x32xbf16>
    %cst = arith.constant dense<0.000000e+00> : vector<32x2048xf32>
    %4 = tpu.matmul %3, %2, %cst {dimension_numbers = #tpu.dot_dimension_numbers<[1], [0], [0], [1], [0, 0, 1, 1], [], []>} : vector<32x32xbf16>, vector<32x2048xbf16>, vector<32x2048xf32> -> vector<32x2048xf32>
    %c0_4 = arith.constant 0 : index
    %c0_5 = arith.constant 0 : index
    %5 = vector.load %arg4[%c0_4, %c0_5] : memref<32x1xf32, #tpu.memory_space<vmem>>, vector<32x1xf32>
    %6 = vector.broadcast %5 : vector<32x1xf32> to vector<32x2048xf32>
    %7 = arith.addf %4, %6 : vector<32x2048xf32>
    %cst_6 = arith.constant 0.000000e+00 : f32
    %8 = vector.broadcast %cst_6 : f32 to vector<32x2048xf32>
    %9 = arith.maximumf %7, %8 : vector<32x2048xf32>
    %10 = arith.truncf %9 : vector<32x2048xf32> to vector<32x2048xbf16>
    %c0_7 = arith.constant 0 : index
    %c0_8 = arith.constant 0 : index
    %c0_9 = arith.constant 0 : index
    %11 = vector.load %arg5[%c0_7, %c0_8, %c0_9] : memref<1x32x2048xbf16, #tpu.memory_space<vmem>>, vector<1x32x2048xbf16>
    %12 = vector.shape_cast %11 : vector<1x32x2048xbf16> to vector<32x2048xbf16>
    %13 = vector.shape_cast %10 : vector<32x2048xbf16> to vector<1x32x2048xbf16>
    tpu.vector_store %arg5[%c0_7, %c0_8, %c0_9], %13 {strides = array<i32>} : memref<1x32x2048xbf16, #tpu.memory_space<vmem>>, vector<1x32x2048xbf16>,
    return
  }
  func.func @transform_0(%arg0: i32, %arg1: i32) -> (i32, i32, i32) {
    %c0_i32 = arith.constant 0 : i32
    %c0_i32_0 = arith.constant 0 : i32
    return %arg0, %c0_i32, %arg1 : i32, i32, i32
  }
  func.func @transform_1(%arg0: i32, %arg1: i32) -> (i32, i32) {
    %c0_i32 = arith.constant 0 : i32
    %c0_i32_0 = arith.constant 0 : i32
    %c0_i32_1 = arith.constant 0 : i32
    return %c0_i32, %c0_i32_0 : i32, i32
  }
  func.func @transform_2(%arg0: i32, %arg1: i32) -> (i32, i32) {
    %c0_i32 = arith.constant 0 : i32
    %c0_i32_0 = arith.constant 0 : i32
    %c0_i32_1 = arith.constant 0 : i32
    return %c0_i32, %c0_i32_0 : i32, i32
  }
  func.func @transform_3(%arg0: i32, %arg1: i32) -> (i32, i32, i32) {
    %c0_i32 = arith.constant 0 : i32
    %c0_i32_0 = arith.constant 0 : i32
    return %arg0, %c0_i32, %arg1 : i32, i32, i32
  }
}

module attributes {stable_mosaic.version = 11 : i64} {
  func.func @_attn_out_kernel(%arg0: i32, %arg1: i32, %arg2: i32, %arg3: memref<1x8x256xbf16, #tpu.memory_space<vmem>>, %arg4: memref<1x8x512xbf16, #tpu.memory_space<vmem>>, %arg5: memref<1x16x512xbf16, #tpu.memory_space<vmem>>, %arg6: memref<1x32x256xf32, #tpu.memory_space<vmem>>, %arg7: memref<32x16xbf16, #tpu.memory_space<vmem>>, %arg8: memref<32x1xf32, #tpu.memory_space<vmem>>, %arg9: memref<1xf32, #tpu.memory_space<smem>>, %arg10: memref<1x32x256xf32, #tpu.memory_space<vmem>>, %arg11: memref<1x256xf32, #tpu.memory_space<vmem>>, %arg12: memref<1x256xf32, #tpu.memory_space<vmem>>, %arg13: memref<16x256xf32, #tpu.memory_space<vmem>>) attributes {dimension_semantics = [#tpu.dimension_semantics<parallel>, #tpu.dimension_semantics<parallel>, #tpu.dimension_semantics<arbitrary>], iteration_bounds = array<i64: 2, 32, 2>, scalar_prefetch = 0 : i64, scratch_operands = 3 : i64, tpu.core_type = #tpu.core_type<tc>, window_params = [{transform_indices = @transform_0, window_bounds = array<i64: 1, 8, 256>}, {transform_indices = @transform_1, window_bounds = array<i64: 1, 8, 512>}, {transform_indices = @transform_2, window_bounds = array<i64: 1, 16, 512>}, {transform_indices = @transform_3, window_bounds = array<i64: 1, 32, 256>}, {pipeline_mode = #tpu.pipeline_mode<synchronous>, transform_indices = @transform_4, window_bounds = array<i64: 32, 16>}, {pipeline_mode = #tpu.pipeline_mode<synchronous>, transform_indices = @transform_5, window_bounds = array<i64: 32, 1>}, {transform_indices = @transform_6, window_bounds = array<i64: 1>}, {transform_indices = @transform_7, window_bounds = array<i64: 1, 32, 256>}]} {
    %c0_i32 = arith.constant 0 : i32
    %0 = arith.cmpi eq, %arg2, %c0_i32 : i32
    %1 = arith.extui %0 : i1 to i32
    %c0_i32_0 = arith.constant 0 : i32
    %2 = arith.cmpi ne, %1, %c0_i32_0 : i32
    scf.if %2 {
      %cst_25 = arith.constant 0xFF800000 : f32
      %36 = vector.broadcast %cst_25 : f32 to vector<1x256xf32>
      %c0_26 = arith.constant 0 : index
      %c0_27 = arith.constant 0 : index
      %37 = vector.load %arg11[%c0_26, %c0_27] : memref<1x256xf32, #tpu.memory_space<vmem>>, vector<1x256xf32>
      tpu.vector_store %arg11[%c0_26, %c0_27], %36 {strides = array<i32>} : memref<1x256xf32, #tpu.memory_space<vmem>>, vector<1x256xf32>,
      %cst_28 = arith.constant 0.000000e+00 : f32
      %38 = vector.broadcast %cst_28 : f32 to vector<1x256xf32>
      %c0_29 = arith.constant 0 : index
      %c0_30 = arith.constant 0 : index
      %39 = vector.load %arg12[%c0_29, %c0_30] : memref<1x256xf32, #tpu.memory_space<vmem>>, vector<1x256xf32>
      tpu.vector_store %arg12[%c0_29, %c0_30], %38 {strides = array<i32>} : memref<1x256xf32, #tpu.memory_space<vmem>>, vector<1x256xf32>,
      %cst_31 = arith.constant 0.000000e+00 : f32
      %40 = vector.broadcast %cst_31 : f32 to vector<16x256xf32>
      %c0_32 = arith.constant 0 : index
      %c0_33 = arith.constant 0 : index
      %41 = vector.load %arg13[%c0_32, %c0_33] : memref<16x256xf32, #tpu.memory_space<vmem>>, vector<16x256xf32>
      tpu.vector_store %arg13[%c0_32, %c0_33], %40 {strides = array<i32>} : memref<16x256xf32, #tpu.memory_space<vmem>>, vector<16x256xf32>,
    } else {
    }
    %c0 = arith.constant 0 : index
    %c0_1 = arith.constant 0 : index
    %c0_2 = arith.constant 0 : index
    %3 = vector.load %arg3[%c0, %c0_1, %c0_2] : memref<1x8x256xbf16, #tpu.memory_space<vmem>>, vector<1x8x256xbf16>
    %4 = vector.shape_cast %3 : vector<1x8x256xbf16> to vector<8x256xbf16>
    %c0_3 = arith.constant 0 : index
    %c0_4 = arith.constant 0 : index
    %c0_5 = arith.constant 0 : index
    %5 = vector.load %arg4[%c0_3, %c0_4, %c0_5] : memref<1x8x512xbf16, #tpu.memory_space<vmem>>, vector<1x8x512xbf16>
    %6 = vector.shape_cast %5 : vector<1x8x512xbf16> to vector<8x512xbf16>
    %c0_6 = arith.constant 0 : index
    %c0_7 = arith.constant 0 : index
    %c0_8 = arith.constant 0 : index
    %7 = vector.load %arg5[%c0_6, %c0_7, %c0_8] : memref<1x16x512xbf16, #tpu.memory_space<vmem>>, vector<1x16x512xbf16>
    %8 = vector.shape_cast %7 : vector<1x16x512xbf16> to vector<16x512xbf16>
    %cst = arith.constant dense<0.000000e+00> : vector<512x256xf32>
    %9 = tpu.matmul %6, %4, %cst {dimension_numbers = #tpu.dot_dimension_numbers<[0], [0], [1], [1], [0, 1, 1, 1], [], []>} : vector<8x512xbf16>, vector<8x256xbf16>, vector<512x256xf32> -> vector<512x256xf32>
    %c0_9 = arith.constant 0 : index
    %c0_10 = arith.constant 0 : index
    %10 = vector.load %arg11[%c0_9, %c0_10] : memref<1x256xf32, #tpu.memory_space<vmem>>, vector<1x256xf32>
    %cst_11 = arith.constant dense<0xFF800000> : vector<256xf32>
    %11 = vector.multi_reduction <maximumf>, %9, %cst_11 [0] : vector<512x256xf32> to vector<256xf32>
    %12 = vector.shape_cast %11 : vector<256xf32> to vector<1x256xf32>
    %13 = arith.maximumf %10, %12 : vector<1x256xf32>
    %14 = arith.subf %10, %13 : vector<1x256xf32>
    %15 = math.exp %14 : vector<1x256xf32>
    %16 = vector.broadcast %13 : vector<1x256xf32> to vector<512x256xf32>
    %17 = arith.subf %9, %16 : vector<512x256xf32>
    %18 = math.exp %17 : vector<512x256xf32>
    %cst_12 = arith.constant dense<0.000000e+00> : vector<256xf32>
    %19 = vector.multi_reduction <add>, %18, %cst_12 [0] : vector<512x256xf32> to vector<256xf32>
    %20 = vector.shape_cast %19 : vector<256xf32> to vector<1x256xf32>
    %21 = arith.truncf %18 : vector<512x256xf32> to vector<512x256xbf16>
    %c0_13 = arith.constant 0 : index
    %c0_14 = arith.constant 0 : index
    %22 = vector.load %arg12[%c0_13, %c0_14] : memref<1x256xf32, #tpu.memory_space<vmem>>, vector<1x256xf32>
    %23 = arith.mulf %15, %22 : vector<1x256xf32>
    %24 = arith.addf %23, %20 : vector<1x256xf32>
    %c0_15 = arith.constant 0 : index
    %c0_16 = arith.constant 0 : index
    %25 = vector.load %arg12[%c0_15, %c0_16] : memref<1x256xf32, #tpu.memory_space<vmem>>, vector<1x256xf32>
    tpu.vector_store %arg12[%c0_15, %c0_16], %24 {strides = array<i32>} : memref<1x256xf32, #tpu.memory_space<vmem>>, vector<1x256xf32>,
    %c0_17 = arith.constant 0 : index
    %c0_18 = arith.constant 0 : index
    %26 = vector.load %arg13[%c0_17, %c0_18] : memref<16x256xf32, #tpu.memory_space<vmem>>, vector<16x256xf32>
    %27 = vector.broadcast %15 : vector<1x256xf32> to vector<16x256xf32>
    %28 = arith.mulf %27, %26 : vector<16x256xf32>
    %cst_19 = arith.constant dense<0.000000e+00> : vector<16x256xf32>
    %29 = tpu.matmul %8, %21, %cst_19 {dimension_numbers = #tpu.dot_dimension_numbers<[1], [0], [0], [1], [0, 0, 1, 1], [], []>} : vector<16x512xbf16>, vector<512x256xbf16>, vector<16x256xf32> -> vector<16x256xf32>
    %30 = arith.addf %28, %29 : vector<16x256xf32>
    %c0_20 = arith.constant 0 : index
    %c0_21 = arith.constant 0 : index
    %31 = vector.load %arg13[%c0_20, %c0_21] : memref<16x256xf32, #tpu.memory_space<vmem>>, vector<16x256xf32>
    tpu.vector_store %arg13[%c0_20, %c0_21], %30 {strides = array<i32>} : memref<16x256xf32, #tpu.memory_space<vmem>>, vector<16x256xf32>,
    %c0_22 = arith.constant 0 : index
    %c0_23 = arith.constant 0 : index
    %32 = vector.load %arg11[%c0_22, %c0_23] : memref<1x256xf32, #tpu.memory_space<vmem>>, vector<1x256xf32>
    tpu.vector_store %arg11[%c0_22, %c0_23], %13 {strides = array<i32>} : memref<1x256xf32, #tpu.memory_space<vmem>>, vector<1x256xf32>,
    %c1_i32 = arith.constant 1 : i32
    %33 = arith.cmpi eq, %arg2, %c1_i32 : i32
    %34 = arith.extui %33 : i1 to i32
    %c0_i32_24 = arith.constant 0 : i32
    %35 = arith.cmpi ne, %34, %c0_i32_24 : i32
    scf.if %35 {
      %c0_25 = arith.constant 0 : index
      %c0_26 = arith.constant 0 : index
      %36 = vector.load %arg12[%c0_25, %c0_26] : memref<1x256xf32, #tpu.memory_space<vmem>>, vector<1x256xf32>
      %37 = tpu.reciprocal %36 {approx = true} : vector<1x256xf32> -> vector<1x256xf32>
      %c0_27 = arith.constant 0 : index
      %c0_28 = arith.constant 0 : index
      %38 = vector.load %arg13[%c0_27, %c0_28] : memref<16x256xf32, #tpu.memory_space<vmem>>, vector<16x256xf32>
      %39 = vector.broadcast %37 : vector<1x256xf32> to vector<16x256xf32>
      %40 = arith.mulf %38, %39 : vector<16x256xf32>
      %41 = arith.truncf %40 : vector<16x256xf32> to vector<16x256xbf16>
      %c0_29 = arith.constant 0 : index
      %c0_30 = arith.constant 0 : index
      %42 = vector.load %arg7[%c0_29, %c0_30] : memref<32x16xbf16, #tpu.memory_space<vmem>>, vector<32x16xbf16>
      %cst_31 = arith.constant dense<0.000000e+00> : vector<32x256xf32>
      %43 = tpu.matmul %42, %41, %cst_31 {dimension_numbers = #tpu.dot_dimension_numbers<[1], [0], [0], [1], [0, 0, 1, 1], [], []>} : vector<32x16xbf16>, vector<16x256xbf16>, vector<32x256xf32> -> vector<32x256xf32>
      %c0_32 = arith.constant 0 : index
      %c0_33 = arith.constant 0 : index
      %44 = vector.load %arg8[%c0_32, %c0_33] : memref<32x1xf32, #tpu.memory_space<vmem>>, vector<32x1xf32>
      %45 = vector.broadcast %44 : vector<32x1xf32> to vector<32x256xf32>
      %46 = arith.addf %43, %45 : vector<32x256xf32>
      %cst_34 = arith.constant 0.000000e+00 : f32
      %47 = vector.broadcast %cst_34 : f32 to vector<32x256xf32>
      %48 = arith.maximumf %46, %47 : vector<32x256xf32>
      %c0_35 = arith.constant 0 : index
      %c0_36 = arith.constant 0 : index
      %c0_37 = arith.constant 0 : index
      %49 = vector.load %arg6[%c0_35, %c0_36, %c0_37] : memref<1x32x256xf32, #tpu.memory_space<vmem>>, vector<1x32x256xf32>
      %50 = vector.shape_cast %49 : vector<1x32x256xf32> to vector<32x256xf32>
      %c0_38 = arith.constant 0 : index
      %51 = memref.load %arg9[%c0_38] : memref<1xf32, #tpu.memory_space<smem>>
      %52 = vector.broadcast %51 : f32 to vector<32x256xf32>
      %53 = arith.mulf %52, %48 : vector<32x256xf32>
      %54 = arith.addf %50, %53 : vector<32x256xf32>
      %c0_39 = arith.constant 0 : index
      %c0_40 = arith.constant 0 : index
      %c0_41 = arith.constant 0 : index
      %55 = vector.load %arg10[%c0_39, %c0_40, %c0_41] : memref<1x32x256xf32, #tpu.memory_space<vmem>>, vector<1x32x256xf32>
      %56 = vector.shape_cast %55 : vector<1x32x256xf32> to vector<32x256xf32>
      %57 = vector.shape_cast %54 : vector<32x256xf32> to vector<1x32x256xf32>
      tpu.vector_store %arg10[%c0_39, %c0_40, %c0_41], %57 {strides = array<i32>} : memref<1x32x256xf32, #tpu.memory_space<vmem>>, vector<1x32x256xf32>,
    } else {
    }
    return
  }
  func.func @transform_0(%arg0: i32, %arg1: i32, %arg2: i32) -> (i32, i32, i32) {
    %c0_i32 = arith.constant 0 : i32
    %c0_i32_0 = arith.constant 0 : i32
    return %arg0, %c0_i32, %arg1 : i32, i32, i32
  }
  func.func @transform_1(%arg0: i32, %arg1: i32, %arg2: i32) -> (i32, i32, i32) {
    %c0_i32 = arith.constant 0 : i32
    %c0_i32_0 = arith.constant 0 : i32
    return %arg0, %c0_i32, %arg2 : i32, i32, i32
  }
  func.func @transform_2(%arg0: i32, %arg1: i32, %arg2: i32) -> (i32, i32, i32) {
    %c0_i32 = arith.constant 0 : i32
    %c0_i32_0 = arith.constant 0 : i32
    return %arg0, %c0_i32, %arg2 : i32, i32, i32
  }
  func.func @transform_3(%arg0: i32, %arg1: i32, %arg2: i32) -> (i32, i32, i32) {
    %c0_i32 = arith.constant 0 : i32
    %c0_i32_0 = arith.constant 0 : i32
    return %arg0, %c0_i32, %arg1 : i32, i32, i32
  }
  func.func @transform_4(%arg0: i32, %arg1: i32, %arg2: i32) -> (i32, i32) {
    %c0_i32 = arith.constant 0 : i32
    %c0_i32_0 = arith.constant 0 : i32
    %c0_i32_1 = arith.constant 0 : i32
    return %c0_i32, %c0_i32_0 : i32, i32
  }
  func.func @transform_5(%arg0: i32, %arg1: i32, %arg2: i32) -> (i32, i32) {
    %c0_i32 = arith.constant 0 : i32
    %c0_i32_0 = arith.constant 0 : i32
    %c0_i32_1 = arith.constant 0 : i32
    return %c0_i32, %c0_i32_0 : i32, i32
  }
  func.func @transform_6(%arg0: i32, %arg1: i32, %arg2: i32) -> i32 {
    %c0_i32 = arith.constant 0 : i32
    %c0_i32_0 = arith.constant 0 : i32
    return %c0_i32 : i32
  }
  func.func @transform_7(%arg0: i32, %arg1: i32, %arg2: i32) -> (i32, i32, i32) {
    %c0_i32 = arith.constant 0 : i32
    %c0_i32_0 = arith.constant 0 : i32
    return %arg0, %c0_i32, %arg1 : i32, i32, i32
  }
}

</mosaic_0001>

<bundles_post_ra>
// kernel: self_attention_forward.2
= control target key start
LH: loop header
LB: loop body
LE: loop exit
PB: predicated region body
PF: predicated region fallthrough
CT: control target
= control target key end

     0   :  { %s1587_s12 = smov 0   ;;  %s1589_s13 = smov 0   ;;  %s2129_s0 = inlined_call_operand.vmem [shape: f32[2,32,8192], index: 0, kind: input, shape index: {}]   ;;  %s2130_s1 = inlined_call_operand.vmem [shape: bf16[32,32], index: 1, kind: input, shape index: {}]   ;;  %s2131_s2 = inlined_call_operand.vmem [shape: f32[32,1], index: 2, kind: input, shape index: {}]   ;;  %s2132_s3 = inlined_call_operand.vmem [shape: bf16[2,32,8192], index: 3, kind: output, shape index: {}]  }
   0x1   :  { %s1591_s14 = smov 0   ;;  %s1593_s15 = smov 0  }
   0x2   :  { %s1595_s16 = smov 0   ;;  %s1597_s17 = smov 0  }
   0x3   :  { %s1599_s18 = smov 0  }
   0x4 LB: > { %s22_s19 = sadd.s32 1, %s1556_s16  ;;  %s25_s20 = sadd.s32 1, %s1560_s17  ;;  %s1564_s18 = sphi %s1599_s18, %s13_s18   ;;  %s1560_s17 = sphi %s1597_s17, %s2139_s17   ;;  %s1556_s16 = sphi %s1595_s16, %s2138_s16   ;;  %s1552_s15 = sphi %s1593_s15, %s2137_s15   ;;  %s1548_s14 = sphi %s1591_s14, %s2136_s14   ;;  %s1544_s13 = sphi %s1589_s13, %s2135_s13   ;;  %s1540_s12 = sphi %s1587_s12, %s2134_s12  }
   0x5   : > { %p23_p0 = scmp.ge.s32.totalorder %s22_s19, 4  ;;  %s1350_s21 = sadd.s32 4294967295, %s1564_s18  }
   0x6   : > { %p41_p1 = scmp.ne.s32.totalorder %s1544_s13, %s1540_s12  ;;  %p42_p2 = scmp.eq.s32.totalorder %s1564_s18, 0 }
   0x7   : > { %s2141_s19 = smov (%p23_p0, %s22_s19), 0  ;;  %s2143_s20 = smov (!%p23_p0, %s25_s20), %s1560_s17 }
   0x8   : > { %p27_p3 = scmp.ge.s32.totalorder %s2143_s20, 2  ;;  %p115_p4 = scmp.eq.s32.totalorder %s1350_s21, 7 }
   0x9   : > { %s30_s22 = ssub.s32 %s1556_s16, %s2141_s19  ;;  %p43_p5 = por %p42_p2, %p41_p1 }
   0xa   : > { %s2145_s20 = smov (%p27_p3, %s2143_s20), 0  ;;  %p1635_p6 = por %p115_p4, %p41_p1 }
   0xb   : > { %s29_s24 = ssub.s32 %s1560_s17, %s2145_s20  ;;  %s34_s26 = sadd.s32 1, %s1544_s13 }
   0xc   : > { %s31_s25 = sor.u32 %s30_s22, %s29_s24  ;;  %p1353_p8 = scmp.ge.s32.totalorder %s1564_s18, 8 }
   0xd   : > { %p32_p7 = scmp.eq.s32.totalorder %s31_s25, 0 }
   0xe   : > { %143 = sbr.rel (%p1353_p8) target bundleno = 60 (0x3c), region = 24 }
   0xf   : > { %s1643_s27 = scalar_select %p32_p7, %s1544_s13, %s34_s26  }
  0x15   : > { %146 = sbr.rel (!%p43_p5) target bundleno = 60 (0x3c), region = 28  ;;  %s148_s28 = sand.u32 (%p43_p5), 1, %s1544_s13  }
  0x16   : > { %s1355_s29 = sshll.u32 (%p43_p5), %s1556_s16, 4  ;;  %s1354_s30 = sshll.u32 (%p43_p5), %s148_s28, 9 }
  0x17   : > { %s1356_s4 = sshll.u32 (%p43_p5), %s1560_s17, 8  ;;  %s1657_s10 = scalar_lea.vmem (%p43_p5), [#allocation2], %s1354_s30 }
  0x18   : > { %s153_s5 = sadd.s32 (%p43_p5), %s1356_s4, %s1355_s29 }
  0x19   : > { %s1357_s6 = sshll.u32 (%p43_p5), %s153_s5, 3 }
  0x1a   : > { %s1652_s9 = scalar_lea.vmem (%p43_p5), %s2129_s0, %s1357_s6 }
  0x1b   : > { %v168_v0 = vld [vmem:[%s1652_s9] sm:$0xff] (%p43_p5)  ;;  %v170_v1 = vld [vmem:[%s1652_s9 + $0x8] sm:$0xff] (%p43_p5)  ;;  %v172_v2 = vld [vmem:[%s1652_s9 + $0x10] sm:$0xff] (%p43_p5) }
  0x1c   : > { %169 = vst [vmem:[%s1657_s10] sm:$0xff] %v168_v0  ;;  %171 = vst [vmem:[%s1657_s10 + $0x8] sm:$0xff] %v170_v1  ;;  %v174_v3 = vld [vmem:[%s1652_s9 + $0x18] sm:$0xff]  ;;  %v176_v4 = vld [vmem:[%s1652_s9 + $0x20] sm:$0xff] }
  0x1d   : > { %173 = vst [vmem:[%s1657_s10 + $0x10] sm:$0xff] %v172_v2  ;;  %v178_v5 = vld [vmem:[%s1652_s9 + $0x28] sm:$0xff]  ;;  %175 = vst [vmem:[%s1657_s10 + $0x18] sm:$0xff] %v174_v3  ;;  %v180_v6 = vld [vmem:[%s1652_s9 + $0x30] sm:$0xff] }
  0x1e   : > { %177 = vst [vmem:[%s1657_s10 + $0x20] sm:$0xff] %v176_v4  ;;  %179 = vst [vmem:[%s1657_s10 + $0x28] sm:$0xff] %v178_v5  ;;  %v182_v7 = vld [vmem:[%s1652_s9 + $0x38] sm:$0xff]  ;;  %v184_v8 = vld [vmem:[%s1652_s9 + $0x40] sm:$0xff] }
  0x1f   : > { %181 = vst [vmem:[%s1657_s10 + $0x30] sm:$0xff] %v180_v6  ;;  %183 = vst [vmem:[%s1657_s10 + $0x38] sm:$0xff] %v182_v7  ;;  %v186_v9 = vld [vmem:[%s1652_s9 + $0x48] sm:$0xff]  ;;  %v188_v10 = vld [vmem:[%s1652_s9 + $0x50] sm:$0xff] }
  0x20   : > { %185 = vst [vmem:[%s1657_s10 + $0x40] sm:$0xff] %v184_v8  ;;  %v190_v11 = vld [vmem:[%s1652_s9 + $0x58] sm:$0xff]  ;;  %187 = vst [vmem:[%s1657_s10 + $0x48] sm:$0xff] %v186_v9  ;;  %v192_v12 = vld [vmem:[%s1652_s9 + $0x60] sm:$0xff] }
  0x21   : > { %189 = vst [vmem:[%s1657_s10 + $0x50] sm:$0xff] %v188_v10  ;;  %191 = vst [vmem:[%s1657_s10 + $0x58] sm:$0xff] %v190_v11  ;;  %v194_v13 = vld [vmem:[%s1652_s9 + $0x68] sm:$0xff]  ;;  %v196_v14 = vld [vmem:[%s1652_s9 + $0x70] sm:$0xff] }
  0x22   : > { %193 = vst [vmem:[%s1657_s10 + $0x60] sm:$0xff] %v192_v12  ;;  %195 = vst [vmem:[%s1657_s10 + $0x68] sm:$0xff] %v194_v13  ;;  %v198_v15 = vld [vmem:[%s1652_s9 + $0x78] sm:$0xff]  ;;  %v200_v16 = vld [vmem:[%s1652_s9 + $0x200] sm:$0xff] }
  0x23   : > { %197 = vst [vmem:[%s1657_s10 + $0x70] sm:$0xff] %v196_v14  ;;  %v202_v17 = vld [vmem:[%s1652_s9 + $0x208] sm:$0xff]  ;;  %199 = vst [vmem:[%s1657_s10 + $0x78] sm:$0xff] %v198_v15  ;;  %v204_v18 = vld [vmem:[%s1652_s9 + $0x210] sm:$0xff] }
  0x24   : > { %201 = vst [vmem:[%s1657_s10 + $0x80] sm:$0xff] %v200_v16  ;;  %203 = vst [vmem:[%s1657_s10 + $0x88] sm:$0xff] %v202_v17  ;;  %v206_v19 = vld [vmem:[%s1652_s9 + $0x218] sm:$0xff]  ;;  %v208_v20 = vld [vmem:[%s1652_s9 + $0x220] sm:$0xff] }
  0x25   : > { %205 = vst [vmem:[%s1657_s10 + $0x90] sm:$0xff] %v204_v18  ;;  %207 = vst [vmem:[%s1657_s10 + $0x98] sm:$0xff] %v206_v19  ;;  %v210_v21 = vld [vmem:[%s1652_s9 + $0x228] sm:$0xff]  ;;  %v212_v22 = vld [vmem:[%s1652_s9 + $0x230] sm:$0xff] }
  0x26   : > { %209 = vst [vmem:[%s1657_s10 + $0xa0] sm:$0xff] %v208_v20  ;;  %v214_v23 = vld [vmem:[%s1652_s9 + $0x238] sm:$0xff]  ;;  %211 = vst [vmem:[%s1657_s10 + $0xa8] sm:$0xff] %v210_v21  ;;  %v216_v24 = vld [vmem:[%s1652_s9 + $0x240] sm:$0xff] }
  0x27   : > { %213 = vst [vmem:[%s1657_s10 + $0xb0] sm:$0xff] %v212_v22  ;;  %215 = vst [vmem:[%s1657_s10 + $0xb8] sm:$0xff] %v214_v23  ;;  %v218_v25 = vld [vmem:[%s1652_s9 + $0x248] sm:$0xff]  ;;  %v220_v26 = vld [vmem:[%s1652_s9 + $0x250] sm:$0xff] }
  0x28   : > { %217 = vst [vmem:[%s1657_s10 + $0xc0] sm:$0xff] %v216_v24  ;;  %219 = vst [vmem:[%s1657_s10 + $0xc8] sm:$0xff] %v218_v25  ;;  %v222_v27 = vld [vmem:[%s1652_s9 + $0x258] sm:$0xff]  ;;  %v224_v28 = vld [vmem:[%s1652_s9 + $0x260] sm:$0xff] }
  0x29   : > { %221 = vst [vmem:[%s1657_s10 + $0xd0] sm:$0xff] %v220_v26  ;;  %v226_v29 = vld [vmem:[%s1652_s9 + $0x268] sm:$0xff]  ;;  %223 = vst [vmem:[%s1657_s10 + $0xd8] sm:$0xff] %v222_v27  ;;  %v228_v30 = vld [vmem:[%s1652_s9 + $0x270] sm:$0xff] }
  0x2a   : > { %225 = vst [vmem:[%s1657_s10 + $0xe0] sm:$0xff] %v224_v28  ;;  %227 = vst [vmem:[%s1657_s10 + $0xe8] sm:$0xff] %v226_v29  ;;  %v230_v31 = vld [vmem:[%s1652_s9 + $0x278] sm:$0xff]  ;;  %v232_v32 = vld [vmem:[%s1652_s9 + $0x400] sm:$0xff] }
  0x2b   : > { %229 = vst [vmem:[%s1657_s10 + $0xf0] sm:$0xff] %v228_v30  ;;  %231 = vst [vmem:[%s1657_s10 + $0xf8] sm:$0xff] %v230_v31  ;;  %v234_v33 = vld [vmem:[%s1652_s9 + $0x408] sm:$0xff]  ;;  %v236_v34 = vld [vmem:[%s1652_s9 + $0x410] sm:$0xff] }
  0x2c   : > { %233 = vst [vmem:[%s1657_s10 + $0x100] sm:$0xff] %v232_v32  ;;  %v238_v35 = vld [vmem:[%s1652_s9 + $0x418] sm:$0xff]  ;;  %235 = vst [vmem:[%s1657_s10 + $0x108] sm:$0xff] %v234_v33  ;;  %v240_v36 = vld [vmem:[%s1652_s9 + $0x420] sm:$0xff] }
  0x2d   : > { %237 = vst [vmem:[%s1657_s10 + $0x110] sm:$0xff] %v236_v34  ;;  %239 = vst [vmem:[%s1657_s10 + $0x118] sm:$0xff] %v238_v35  ;;  %v242_v37 = vld [vmem:[%s1652_s9 + $0x428] sm:$0xff]  ;;  %v244_v38 = vld [vmem:[%s1652_s9 + $0x430] sm:$0xff] }
  0x2e   : > { %241 = vst [vmem:[%s1657_s10 + $0x120] sm:$0xff] %v240_v36  ;;  %243 = vst [vmem:[%s1657_s10 + $0x128] sm:$0xff] %v242_v37  ;;  %v246_v39 = vld [vmem:[%s1652_s9 + $0x438] sm:$0xff]  ;;  %v248_v40 = vld [vmem:[%s1652_s9 + $0x440] sm:$0xff] }
  0x2f   : > { %245 = vst [vmem:[%s1657_s10 + $0x130] sm:$0xff] %v244_v38  ;;  %v250_v41 = vld [vmem:[%s1652_s9 + $0x448] sm:$0xff]  ;;  %247 = vst [vmem:[%s1657_s10 + $0x138] sm:$0xff] %v246_v39  ;;  %v252_v42 = vld [vmem:[%s1652_s9 + $0x450] sm:$0xff] }
  0x30   : > { %249 = vst [vmem:[%s1657_s10 + $0x140] sm:$0xff] %v248_v40  ;;  %251 = vst [vmem:[%s1657_s10 + $0x148] sm:$0xff] %v250_v41  ;;  %v254_v43 = vld [vmem:[%s1652_s9 + $0x458] sm:$0xff]  ;;  %v256_v44 = vld [vmem:[%s1652_s9 + $0x460] sm:$0xff] }
  0x31   : > { %253 = vst [vmem:[%s1657_s10 + $0x150] sm:$0xff] %v252_v42  ;;  %255 = vst [vmem:[%s1657_s10 + $0x158] sm:$0xff] %v254_v43  ;;  %v258_v45 = vld [vmem:[%s1652_s9 + $0x468] sm:$0xff]  ;;  %v260_v46 = vld [vmem:[%s1652_s9 + $0x470] sm:$0xff] }
  0x32   : > { %257 = vst [vmem:[%s1657_s10 + $0x160] sm:$0xff] %v256_v44  ;;  %v262_v47 = vld [vmem:[%s1652_s9 + $0x478] sm:$0xff]  ;;  %259 = vst [vmem:[%s1657_s10 + $0x168] sm:$0xff] %v258_v45  ;;  %v264_v48 = vld [vmem:[%s1652_s9 + $0x600] sm:$0xff] }
  0x33   : > { %261 = vst [vmem:[%s1657_s10 + $0x170] sm:$0xff] %v260_v46  ;;  %263 = vst [vmem:[%s1657_s10 + $0x178] sm:$0xff] %v262_v47  ;;  %v266_v49 = vld [vmem:[%s1652_s9 + $0x608] sm:$0xff]  ;;  %v268_v50 = vld [vmem:[%s1652_s9 + $0x610] sm:$0xff] }
  0x34   : > { %265 = vst [vmem:[%s1657_s10 + $0x180] sm:$0xff] %v264_v48  ;;  %267 = vst [vmem:[%s1657_s10 + $0x188] sm:$0xff] %v266_v49  ;;  %v270_v51 = vld [vmem:[%s1652_s9 + $0x618] sm:$0xff]  ;;  %v272_v52 = vld [vmem:[%s1652_s9 + $0x620] sm:$0xff] }
  0x35   : > { %269 = vst [vmem:[%s1657_s10 + $0x190] sm:$0xff] %v268_v50  ;;  %v274_v53 = vld [vmem:[%s1652_s9 + $0x628] sm:$0xff]  ;;  %271 = vst [vmem:[%s1657_s10 + $0x198] sm:$0xff] %v270_v51  ;;  %v276_v54 = vld [vmem:[%s1652_s9 + $0x630] sm:$0xff] }
  0x36   : > { %273 = vst [vmem:[%s1657_s10 + $0x1a0] sm:$0xff] %v272_v52  ;;  %275 = vst [vmem:[%s1657_s10 + $0x1a8] sm:$0xff] %v274_v53  ;;  %v278_v55 = vld [vmem:[%s1652_s9 + $0x638] sm:$0xff]  ;;  %v280_v56 = vld [vmem:[%s1652_s9 + $0x640] sm:$0xff] }
  0x37   : > { %277 = vst [vmem:[%s1657_s10 + $0x1b0] sm:$0xff] %v276_v54  ;;  %279 = vst [vmem:[%s1657_s10 + $0x1b8] sm:$0xff] %v278_v55  ;;  %v282_v57 = vld [vmem:[%s1652_s9 + $0x648] sm:$0xff]  ;;  %v284_v58 = vld [vmem:[%s1652_s9 + $0x650] sm:$0xff] }
  0x38   : > { %281 = vst [vmem:[%s1657_s10 + $0x1c0] sm:$0xff] %v280_v56  ;;  %v286_v59 = vld [vmem:[%s1652_s9 + $0x658] sm:$0xff]  ;;  %283 = vst [vmem:[%s1657_s10 + $0x1c8] sm:$0xff] %v282_v57  ;;  %v288_v60 = vld [vmem:[%s1652_s9 + $0x660] sm:$0xff] }
  0x39   : > { %285 = vst [vmem:[%s1657_s10 + $0x1d0] sm:$0xff] %v284_v58  ;;  %287 = vst [vmem:[%s1657_s10 + $0x1d8] sm:$0xff] %v286_v59  ;;  %v290_v61 = vld [vmem:[%s1652_s9 + $0x668] sm:$0xff]  ;;  %v292_v62 = vld [vmem:[%s1652_s9 + $0x670] sm:$0xff] }
  0x3a   : > { %289 = vst [vmem:[%s1657_s10 + $0x1e0] sm:$0xff] %v288_v60  ;;  %291 = vst [vmem:[%s1657_s10 + $0x1e8] sm:$0xff] %v290_v61  ;;  %v294_v63 = vld [vmem:[%s1652_s9 + $0x678] sm:$0xff] }
  0x3b   : > { %293 = vst [vmem:[%s1657_s10 + $0x1f0] sm:$0xff] %v292_v62  ;;  %295 = vst [vmem:[%s1657_s10 + $0x1f8] sm:$0xff] %v294_v63 }
  0x3c PF: > { %p1358_p9 = scmp.ge.s32.totalorder %s1564_s18, 1  ;;  %p300_p10 = scmp.lt.s32.totalorder %s1564_s18, 9 }
  0x3e   : > { %p301_p11 = pnand %p1358_p9, %p300_p10 }
  0x3f   : > { %s307_s11 = sand.u32 (!%p301_p11), 1, %s1540_s12   ;;  %v1566_v0 = vmov (!%p301_p11), 0   ;;  %v432_v1 = vld [vmem:[%s2131_s2] sm:$0xff] (!%p301_p11)  ;;  %v433_v5 = vld [vmem:[%s2131_s2 + $0x8] sm:$0xff] (!%p301_p11)  ;;  %vm466_vm0 = vcmask (!%p301_p11), 261120   ;;  %v434_v61 = vld [vmem:[%s2131_s2 + $0x10] sm:$0xff] (!%p301_p11) }
  0x40   : > { %304 = sbr.rel (%p301_p11) target bundleno = 365 (0x16d), region = 51  ;;  %s1359_s21 = sshll.u32 (!%p301_p11), %s307_s11, 9  ;;  %505 = vmatprep.mubr.bf16.mxu0 (!%p301_p11), %v1566_v0  ;;  %558 = vmatprep.mubr.bf16.mxu1 (!%p301_p11), %v1566_v0  ;;  %v1820_v26 = vld [vmem:[%s2130_s1] sm:$0xff] (!%p301_p11)   ;;  %v1851_v58 = vld [vmem:[%s2130_s1 + $0x8] sm:$0xff] (!%p301_p11)  }
  0x41   : > { %1506 = vset.pattern.permute.xlu0 (!%p301_p11), %v1566_v0  ;;  %1507 = vset.pattern.permute.xlu1 (!%p301_p11), %v1566_v0  ;;  %s1796_s25 = scalar_lea.vmem (!%p301_p11), [#allocation2], %s1359_s21  ;;  %s1360_s10 = sshll.u32 (!%p301_p11), %s307_s11, 8 }
  0x42   : > { %v333_v2 = vld [vmem:[%s1796_s25 + $0x8] sm:$0xff] (!%p301_p11)  ;;  %v335_v4 = vld [vmem:[%s1796_s25 + $0x18] sm:$0xff] (!%p301_p11)  ;;  %438 = vperm.xlu0 (!%p301_p11), %1506, %v432_v1   ;;  %v332_v8 = vld [vmem:[%s1796_s25] sm:$0xff] (!%p301_p11)  ;;  %448 = vperm.xlu1 (!%p301_p11), %1507, %v434_v61   ;;  %s1943_s12 = scalar_lea.vmem (!%p301_p11), [#allocation3], %s1360_s10 }
  0x43   : > { %v349_v3 = vld [vmem:[%s1796_s25 + $0x88] sm:$0xff] (!%p301_p11)  ;;  %v351_v7 = vld [vmem:[%s1796_s25 + $0x98] sm:$0xff] (!%p301_p11)  ;;  %v348_v9 = vld [vmem:[%s1796_s25 + $0x80] sm:$0xff] (!%p301_p11) }
  0x44   : > { %v397_v6 = vpack.c.bf16 (!%p301_p11), %v349_v3, %v333_v2  ;;  %v399_v10 = vpack.c.bf16 (!%p301_p11), %v351_v7, %v335_v4  ;;  %v396_v11 = vpack.c.bf16 (!%p301_p11), %v348_v9, %v332_v8  ;;  %v334_v12 = vld [vmem:[%s1796_s25 + $0x10] sm:$0xff] (!%p301_p11)  ;;  %v365_v14 = vld [vmem:[%s1796_s25 + $0x108] sm:$0xff] (!%p301_p11)  ;;  %v367_v17 = vld [vmem:[%s1796_s25 + $0x118] sm:$0xff] (!%p301_p11) }
  0x45   : > { %v350_v13 = vld [vmem:[%s1796_s25 + $0x90] sm:$0xff] (!%p301_p11)  ;;  %v381_v16 = vld [vmem:[%s1796_s25 + $0x188] sm:$0xff] (!%p301_p11)  ;;  %v383_v18 = vld [vmem:[%s1796_s25 + $0x198] sm:$0xff] (!%p301_p11) }
  0x46   : > { %473 = vmatprep.subr.bf16.mxu0 (!%p301_p11), %v397_v6  ;;  %v398_v15 = vpack.c.bf16 (!%p301_p11), %v350_v13, %v334_v12  ;;  %526 = vmatprep.subr.bf16.mxu1 (!%p301_p11), %v399_v10  ;;  %v413_v19 = vpack.c.bf16 (!%p301_p11), %v381_v16, %v365_v14  ;;  %v415_v20 = vpack.c.bf16 (!%p301_p11), %v383_v18, %v367_v17  ;;  %v364_v21 = vld [vmem:[%s1796_s25 + $0x100] sm:$0xff] (!%p301_p11)  ;;  %v366_v23 = vld [vmem:[%s1796_s25 + $0x110] sm:$0xff] (!%p301_p11)  ;;  %v337_v27 = vld [vmem:[%s1796_s25 + $0x28] sm:$0xff] (!%p301_p11) }
  0x47   : > { %474 = vmatpush1.bf16.msra.mxu0 %v396_v11  ;;  %v380_v22 = vld [vmem:[%s1796_s25 + $0x180] sm:$0xff]  ;;  %v382_v25 = vld [vmem:[%s1796_s25 + $0x190] sm:$0xff]  ;;  %v353_v28 = vld [vmem:[%s1796_s25 + $0xa8] sm:$0xff]  ;;  %443 = vperm.xlu0 %1506, %v433_v5   ;;  %s1412_s11 = sshll.u32 (%p1635_p6), %s1548_s14, 4  ;;  %s1413_s21 = sshll.u32 (%p1635_p6), %s1552_s15, 8 }
  0x48   : > { %527 = vmatpush1.bf16.msra.mxu1 %v398_v15  ;;  %v412_v24 = vpack.c.bf16 %v380_v22, %v364_v21  ;;  %475 = vmatprep.subr.bf16.mxu0 %v413_v19  ;;  %v414_v29 = vpack.c.bf16 %v382_v25, %v366_v23  ;;  %v401_v30 = vpack.c.bf16 %v353_v28, %v337_v27  ;;  %v339_v31 = vld [vmem:[%s1796_s25 + $0x38] sm:$0xff]  ;;  %v336_v33 = vld [vmem:[%s1796_s25 + $0x20] sm:$0xff]  ;;  %v338_v36 = vld [vmem:[%s1796_s25 + $0x30] sm:$0xff]  ;;  %s1194_s23 = sadd.s32 (%p1635_p6), %s1413_s21, %s1412_s11 }
  0x49   : > { %528 = vmatprep.subr.bf16.mxu1 %v415_v20  ;;  %v355_v32 = vld [vmem:[%s1796_s25 + $0xb8] sm:$0xff]  ;;  %v352_v35 = vld [vmem:[%s1796_s25 + $0xa0] sm:$0xff]  ;;  %v354_v37 = vld [vmem:[%s1796_s25 + $0xb0] sm:$0xff]  ;;  %s1414_s22 = sshll.u32 (%p1635_p6), %s1194_s23, 2 }
  0x4a   : > { %v403_v34 = vpack.c.bf16 %v355_v32, %v339_v31  ;;  %v400_v38 = vpack.c.bf16 %v352_v35, %v336_v33  ;;  %v369_v39 = vld [vmem:[%s1796_s25 + $0x128] sm:$0xff]  ;;  %v371_v41 = vld [vmem:[%s1796_s25 + $0x138] sm:$0xff]  ;;  %v402_v42 = vpack.c.bf16 %v354_v37, %v338_v36  ;;  %v368_v44 = vld [vmem:[%s1796_s25 + $0x120] sm:$0xff]  ;;  %s2051_s26 = scalar_lea.vmem (%p1635_p6), %s2132_s3, %s1414_s22 }
  0x4b   : > { %476 = vmatpush1.bf16.msra.mxu0 %v412_v24  ;;  %v385_v40 = vld [vmem:[%s1796_s25 + $0x1a8] sm:$0xff]  ;;  %v387_v43 = vld [vmem:[%s1796_s25 + $0x1b8] sm:$0xff]  ;;  %v384_v45 = vld [vmem:[%s1796_s25 + $0x1a0] sm:$0xff] }
  0x4c   : > { %529 = vmatpush1.bf16.msra.mxu1 %v414_v29  ;;  %579 = vmatprep.subr.bf16.mxu0 %v401_v30  ;;  %v417_v46 = vpack.c.bf16 %v385_v40, %v369_v39  ;;  %v370_v47 = vld [vmem:[%s1796_s25 + $0x130] sm:$0xff]  ;;  %v341_v49 = vld [vmem:[%s1796_s25 + $0x48] sm:$0xff]  ;;  %v419_v50 = vpack.c.bf16 %v387_v43, %v371_v41  ;;  %v343_v52 = vld [vmem:[%s1796_s25 + $0x58] sm:$0xff]  ;;  %v416_v54 = vpack.c.bf16 %v384_v45, %v368_v44 }
  0x4d   : > { %632 = vmatprep.subr.bf16.mxu1 %v403_v34  ;;  %v386_v48 = vld [vmem:[%s1796_s25 + $0x1b0] sm:$0xff]  ;;  %v357_v51 = vld [vmem:[%s1796_s25 + $0xc8] sm:$0xff]  ;;  %v359_v53 = vld [vmem:[%s1796_s25 + $0xd8] sm:$0xff] }
  0x4e   : > { %1363 = vmatmul.mubr.msk.bf16.vlgmr.msra.gmra.mrb[0].mxu0 %vm466_vm0, %v1820_v26  ;;  %v418_v55 = vpack.c.bf16 %v386_v48, %v370_v47  ;;  %v405_v56 = vpack.c.bf16 %v357_v51, %v341_v49  ;;  %v407_v57 = vpack.c.bf16 %v359_v53, %v343_v52  ;;  %v340_v59 = vld [vmem:[%s1796_s25 + $0x40] sm:$0xff]  ;;  %v342_v62 = vld [vmem:[%s1796_s25 + $0x50] sm:$0xff]  ;;  %v373_v1 = vld [vmem:[%s1796_s25 + $0x148] sm:$0xff] }
  0x4f   : > { %1365 = vmatmul.mubr.msk.bf16.vlgmr.msra.gmra.mrb[0].mxu1 %vm466_vm0, %v1820_v26  ;;  %580 = vmatpush1.bf16.msra.mxu0 %v400_v38  ;;  %v356_v60 = vld [vmem:[%s1796_s25 + $0xc0] sm:$0xff]  ;;  %v358_v63 = vld [vmem:[%s1796_s25 + $0xd0] sm:$0xff]  ;;  %v389_v2 = vld [vmem:[%s1796_s25 + $0x1c8] sm:$0xff] }
  0x50   : > { %633 = vmatpush1.bf16.msra.mxu1 %v402_v42  ;;  %515 = vmatprep.mubr.bf16.mxu0 %v1566_v0  ;;  %v435_v3 = vld [vmem:[%s2131_s2 + $0x18] sm:$0xff]  ;;  %v404_v4 = vpack.c.bf16 %v356_v60, %v340_v59  ;;  %v406_v7 = vpack.c.bf16 %v358_v63, %v342_v62  ;;  %v372_v8 = vld [vmem:[%s1796_s25 + $0x140] sm:$0xff]  ;;  %v374_v10 = vld [vmem:[%s1796_s25 + $0x150] sm:$0xff]  ;;  %v421_v11 = vpack.c.bf16 %v389_v2, %v373_v1 }
  0x51   : > { %568 = vmatprep.mubr.bf16.mxu1 %v1566_v0  ;;  %581 = vmatprep.subr.bf16.mxu0 %v417_v46  ;;  %v375_v5 = vld [vmem:[%s1796_s25 + $0x158] sm:$0xff]  ;;  %v388_v9 = vld [vmem:[%s1796_s25 + $0x1c0] sm:$0xff]  ;;  %v390_v12 = vld [vmem:[%s1796_s25 + $0x1d0] sm:$0xff] }
  0x52   : > { %634 = vmatprep.subr.bf16.mxu1 %v419_v50  ;;  %v391_v6 = vld [vmem:[%s1796_s25 + $0x1d8] sm:$0xff]  ;;  %v345_v13 = vld [vmem:[%s1796_s25 + $0x68] sm:$0xff]  ;;  %453 = vperm.xlu1 %1507, %v435_v3   ;;  %v420_v18 = vpack.c.bf16 %v388_v9, %v372_v8  ;;  %v422_v19 = vpack.c.bf16 %v390_v12, %v374_v10  ;;  %v344_v22 = vld [vmem:[%s1796_s25 + $0x60] sm:$0xff] }
  0x53   : > { %582 = vmatpush1.bf16.msra.mxu0 %v416_v54  ;;  %v361_v14 = vld [vmem:[%s1796_s25 + $0xe8] sm:$0xff]  ;;  %v423_v15 = vpack.c.bf16 %v391_v6, %v375_v5  ;;  %v347_v16 = vld [vmem:[%s1796_s25 + $0x78] sm:$0xff]  ;;  %v360_v23 = vld [vmem:[%s1796_s25 + $0xe0] sm:$0xff] }
  0x54   : > { %635 = vmatpush1.bf16.msra.mxu1 %v418_v55  ;;  %685 = vmatprep.subr.bf16.mxu0 %v405_v56  ;;  %v363_v17 = vld [vmem:[%s1796_s25 + $0xf8] sm:$0xff]  ;;  %v409_v20 = vpack.c.bf16 %v361_v14, %v345_v13  ;;  %v346_v24 = vld [vmem:[%s1796_s25 + $0x70] sm:$0xff]  ;;  %v377_v27 = vld [vmem:[%s1796_s25 + $0x168] sm:$0xff]  ;;  %v408_v29 = vpack.c.bf16 %v360_v23, %v344_v22 }
  0x55   : > { %738 = vmatprep.subr.bf16.mxu1 %v407_v57  ;;  %v411_v21 = vpack.c.bf16 %v363_v17, %v347_v16  ;;  %v362_v25 = vld [vmem:[%s1796_s25 + $0xf0] sm:$0xff]  ;;  %v393_v28 = vld [vmem:[%s1796_s25 + $0x1e8] sm:$0xff]  ;;  %v379_v30 = vld [vmem:[%s1796_s25 + $0x178] sm:$0xff] }
  0x56   : > { %1364 = vmatmul.mubr.msk.bf16.gmra.mrb[4].mxu0 %vm466_vm0, %v1851_v58  ;;  %v395_v31 = vld [vmem:[%s1796_s25 + $0x1f8] sm:$0xff]  ;;  %v410_v32 = vpack.c.bf16 %v362_v25, %v346_v24  ;;  %v376_v33 = vld [vmem:[%s1796_s25 + $0x160] sm:$0xff]  ;;  %v425_v35 = vpack.c.bf16 %v393_v28, %v377_v27  ;;  %v378_v36 = vld [vmem:[%s1796_s25 + $0x170] sm:$0xff] }
  0x57   : > { %1366 = vmatmul.mubr.msk.bf16.gmra.mrb[4].mxu1 %vm466_vm0, %v1851_v58  ;;  %611 = vmatprep.mubr.bf16.mxu0 %v1566_v0  ;;  %v392_v34 = vld [vmem:[%s1796_s25 + $0x1e0] sm:$0xff]  ;;  %v394_v37 = vld [vmem:[%s1796_s25 + $0x1f0] sm:$0xff]  ;;  %v427_v38 = vpack.c.bf16 %v395_v31, %v379_v30 }
  0x58   : > { %664 = vmatprep.mubr.bf16.mxu1 %v1566_v0  ;;  %v424_v39 = vpack.c.bf16 %v392_v34, %v376_v33  ;;  %v426_v40 = vpack.c.bf16 %v394_v37, %v378_v36 }
  0x5e   : > { %1367 = vmatmul.mubr.msk.bf16.vlgmr.msra.gmra.mrb[8].mxu0 %vm466_vm0, %v1820_v26 }
  0x5f   : > { %1369 = vmatmul.mubr.msk.bf16.vlgmr.msra.gmra.mrb[8].mxu1 %vm466_vm0, %v1820_v26  ;;  %686 = vmatpush1.bf16.msra.mxu0 %v404_v4 }
  0x60   : > { %739 = vmatpush1.bf16.msra.mxu1 %v406_v7  ;;  %621 = vmatprep.mubr.bf16.mxu0 %v1566_v0 }
  0x61   : > { %674 = vmatprep.mubr.bf16.mxu1 %v1566_v0  ;;  %687 = vmatprep.subr.bf16.mxu0 %v421_v11 }
  0x62   : > { %740 = vmatprep.subr.bf16.mxu1 %v423_v15 }
  0x63   : > { %688 = vmatpush1.bf16.msra.mxu0 %v420_v18 }
  0x64   : > { %741 = vmatpush1.bf16.msra.mxu1 %v422_v19  ;;  %791 = vmatprep.subr.bf16.mxu0 %v409_v20 }
  0x65   : > { %844 = vmatprep.subr.bf16.mxu1 %v411_v21 }
  0x66   : > { %1368 = vmatmul.mubr.msk.bf16.gmra.mrb[12].mxu0 %vm466_vm0, %v1851_v58 }
  0x67   : > { %1370 = vmatmul.mubr.msk.bf16.gmra.mrb[12].mxu1 %vm466_vm0, %v1851_v58  ;;  %717 = vmatprep.mubr.bf16.mxu0 %v1566_v0 }
  0x68   : > { %770 = vmatprep.mubr.bf16.mxu1 %v1566_v0 }
  0x6e   : > { %1371 = vmatmul.mubr.msk.bf16.vlgmr.msra.gmra.mrb[16].mxu0 %vm466_vm0, %v1820_v26 }
  0x6f   : > { %1373 = vmatmul.mubr.msk.bf16.vlgmr.msra.gmra.mrb[16].mxu1 %vm466_vm0, %v1820_v26  ;;  %792 = vmatpush1.bf16.msra.mxu0 %v408_v29 }
  0x70   : > { %845 = vmatpush1.bf16.msra.mxu1 %v410_v32  ;;  %727 = vmatprep.mubr.bf16.mxu0 %v1566_v0 }
  0x71   : > { %780 = vmatprep.mubr.bf16.mxu1 %v1566_v0  ;;  %793 = vmatprep.subr.bf16.mxu0 %v425_v35 }
  0x72   : > { %846 = vmatprep.subr.bf16.mxu1 %v427_v38 }
  0x73   : > { %794 = vmatpush1.bf16.msra.mxu0 %v424_v39 }
  0x74   : > { %847 = vmatpush1.bf16.msra.mxu1 %v426_v40 }
  0x76   : > { %1372 = vmatmul.mubr.msk.bf16.gmra.mrb[20].mxu0 %vm466_vm0, %v1851_v58 }
  0x77   : > { %1374 = vmatmul.mubr.msk.bf16.gmra.mrb[20].mxu1 %vm466_vm0, %v1851_v58  ;;  %823 = vmatprep.mubr.bf16.mxu0 %v1566_v0 }
  0x78   : > { %876 = vmatprep.mubr.bf16.mxu1 %v1566_v0 }
  0x7e   : > { %1375 = vmatmul.mubr.msk.bf16.vlgmr.msra.gmra.mrb[24].mxu0 %vm466_vm0, %v1820_v26 }
  0x7f   : > { %1377 = vmatmul.mubr.msk.bf16.vlgmr.msra.gmra.mrb[24].mxu1 %vm466_vm0, %v1820_v26  ;;  %833 = vmatprep.mubr.bf16.mxu0 %v1566_v0 }
  0x80   : > { %886 = vmatprep.mubr.bf16.mxu1 %v1566_v0 }
  0x86   : > { %1376 = vmatmul.mubr.msk.bf16.gmra.mrb[28].mxu0 %vm466_vm0, %v1851_v58 }
  0x87   : > { %1378 = vmatmul.mubr.msk.bf16.gmra.mrb[28].mxu1 %vm466_vm0, %v1851_v58 }
  0xc1   : > { %v1927_v41 = vpop.permute.xlu0 %438  ;;  %v1931_v44 = vpop.permute.xlu1 %448 }
  0xc6   : > { %v1929_v42 = vpop.permute.xlu0 %443 }
  0xd1   : > { %v1946_v7 = vpop.permute.xlu1 %453 }
 0x121   : > { %v507_v43 = vpop.f32.mrb[0].mxu0 }
 0x122   : > { %v508_v45 = vadd.f32 %v507_v43, %v1927_v41  ;;  %v560_v26 = vpop.f32.mrb[0].mxu1  ;;  %v509_v46 = vpop.f32.mrb[1].mxu0 }
 0x123   : > { %v561_v47 = vadd.f32 %v560_v26, %v1927_v41  ;;  %v510_v0 = vadd.f32 %v509_v46, %v1927_v41  ;;  %v562_v48 = vpop.f32.mrb[1].mxu1  ;;  %v511_v49 = vpop.f32.mrb[2].mxu0 }
 0x124   : > { %v897_v50 = vmax.f32 %v508_v45, 0.0  ;;  %v563_v51 = vadd.f32 %v562_v48, %v1927_v41  ;;  %v512_v52 = vadd.f32 %v511_v49, %v1929_v42  ;;  %v564_v53 = vpop.f32.mrb[2].mxu1  ;;  %v513_v54 = vpop.f32.mrb[3].mxu0 }
 0x125   : > { %v899_v55 = vmax.f32 %v561_v47, 0.0  ;;  %v898_v56 = vmax.f32 %v510_v0, 0.0  ;;  %v565_v57 = vadd.f32 %v564_v53, %v1929_v42  ;;  %v514_v58 = vadd.f32 %v513_v54, %v1929_v42  ;;  %v566_v59 = vpop.f32.mrb[3].mxu1 }
 0x126   : > { %v900_v60 = vmax.f32 %v563_v51, 0.0  ;;  %v913_v61 = vmax.f32 %v512_v52, 0.0  ;;  %v567_v62 = vadd.f32 %v566_v59, %v1929_v42 }
 0x127   : > { %v1417_v63 = vpack.c.bf16 %v898_v56, %v897_v50  ;;  %v915_v1 = vmax.f32 %v565_v57, 0.0  ;;  %v914_v2 = vmax.f32 %v514_v58, 0.0 }
 0x128   : > { %v1418_v3 = vpack.c.bf16 %v900_v60, %v899_v55  ;;  %v916_v4 = vmax.f32 %v567_v62, 0.0 }
 0x129   : > { %1153 = vst [vmem:[%s1943_s12] sm:$0xff] %v1417_v63  ;;  %v1425_v5 = vpack.c.bf16 %v914_v2, %v913_v61  ;;  %v517_v6 = vpop.f32.mrb[4].mxu0 }
 0x12a   : > { %1154 = vst [vmem:[%s1943_s12 + $0x8] sm:$0xff] %v1418_v3  ;;  %v1426_v8 = vpack.c.bf16 %v916_v4, %v915_v1  ;;  %v518_v9 = vadd.f32 %v517_v6, %v1931_v44  ;;  %v570_v10 = vpop.f32.mrb[4].mxu1  ;;  %v519_v11 = vpop.f32.mrb[5].mxu0 }
 0x12b   : > { %1161 = vst [vmem:[%s1943_s12 + $0x40] sm:$0xff] %v1425_v5  ;;  %v571_v12 = vadd.f32 %v570_v10, %v1931_v44  ;;  %v520_v13 = vadd.f32 %v519_v11, %v1931_v44  ;;  %v572_v14 = vpop.f32.mrb[5].mxu1  ;;  %v521_v15 = vpop.f32.mrb[6].mxu0 }
 0x12c   : > { %1162 = vst [vmem:[%s1943_s12 + $0x48] sm:$0xff] %v1426_v8  ;;  %v929_v16 = vmax.f32 %v518_v9, 0.0  ;;  %v573_v17 = vadd.f32 %v572_v14, %v1931_v44  ;;  %v522_v18 = vadd.f32 %v521_v15, %v1946_v7  ;;  %v574_v19 = vpop.f32.mrb[6].mxu1  ;;  %v523_v20 = vpop.f32.mrb[7].mxu0 }
 0x12d   : > { %v931_v21 = vmax.f32 %v571_v12, 0.0  ;;  %v930_v22 = vmax.f32 %v520_v13, 0.0  ;;  %v575_v23 = vadd.f32 %v574_v19, %v1946_v7  ;;  %v524_v24 = vadd.f32 %v523_v20, %v1946_v7  ;;  %v576_v25 = vpop.f32.mrb[7].mxu1 }
 0x12e   : > { %v932_v27 = vmax.f32 %v573_v17, 0.0  ;;  %v945_v28 = vmax.f32 %v522_v18, 0.0  ;;  %v577_v29 = vadd.f32 %v576_v25, %v1946_v7 }
 0x12f   : > { %v1433_v30 = vpack.c.bf16 %v930_v22, %v929_v16  ;;  %v947_v31 = vmax.f32 %v575_v23, 0.0  ;;  %v946_v32 = vmax.f32 %v524_v24, 0.0 }
 0x130   : > { %v1434_v33 = vpack.c.bf16 %v932_v27, %v931_v21  ;;  %v948_v34 = vmax.f32 %v577_v29, 0.0 }
 0x131   : > { %1169 = vst [vmem:[%s1943_s12 + $0x80] sm:$0xff] %v1433_v30  ;;  %v1441_v35 = vpack.c.bf16 %v946_v32, %v945_v28  ;;  %v613_v36 = vpop.f32.mrb[8].mxu0 }
 0x132   : > { %1170 = vst [vmem:[%s1943_s12 + $0x88] sm:$0xff] %v1434_v33  ;;  %v1442_v37 = vpack.c.bf16 %v948_v34, %v947_v31  ;;  %v614_v38 = vadd.f32 %v613_v36, %v1927_v41  ;;  %v666_v39 = vpop.f32.mrb[8].mxu1  ;;  %v615_v40 = vpop.f32.mrb[9].mxu0 }
 0x133   : > { %1177 = vst [vmem:[%s1943_s12 + $0xc0] sm:$0xff] %v1441_v35  ;;  %v667_v43 = vadd.f32 %v666_v39, %v1927_v41  ;;  %v616_v45 = vadd.f32 %v615_v40, %v1927_v41  ;;  %v668_v26 = vpop.f32.mrb[9].mxu1  ;;  %v617_v46 = vpop.f32.mrb[10].mxu0 }
 0x134   : > { %1178 = vst [vmem:[%s1943_s12 + $0xc8] sm:$0xff] %v1442_v37  ;;  %v901_v47 = vmax.f32 %v614_v38, 0.0  ;;  %v669_v0 = vadd.f32 %v668_v26, %v1927_v41  ;;  %v618_v48 = vadd.f32 %v617_v46, %v1929_v42  ;;  %v670_v49 = vpop.f32.mrb[10].mxu1  ;;  %v619_v50 = vpop.f32.mrb[11].mxu0 }
 0x135   : > { %v903_v51 = vmax.f32 %v667_v43, 0.0  ;;  %v902_v52 = vmax.f32 %v616_v45, 0.0  ;;  %v671_v53 = vadd.f32 %v670_v49, %v1929_v42  ;;  %v620_v54 = vadd.f32 %v619_v50, %v1929_v42  ;;  %v672_v55 = vpop.f32.mrb[11].mxu1 }
 0x136   : > { %v904_v56 = vmax.f32 %v669_v0, 0.0  ;;  %v917_v57 = vmax.f32 %v618_v48, 0.0  ;;  %v673_v58 = vadd.f32 %v672_v55, %v1929_v42 }
 0x137   : > { %v1419_v59 = vpack.c.bf16 %v902_v52, %v901_v47  ;;  %v919_v60 = vmax.f32 %v671_v53, 0.0  ;;  %v918_v61 = vmax.f32 %v620_v54, 0.0 }
 0x138   : > { %v1420_v62 = vpack.c.bf16 %v904_v56, %v903_v51  ;;  %v920_v63 = vmax.f32 %v673_v58, 0.0 }
 0x139   : > { %1155 = vst [vmem:[%s1943_s12 + $0x10] sm:$0xff] %v1419_v59  ;;  %v1427_v1 = vpack.c.bf16 %v918_v61, %v917_v57  ;;  %v623_v2 = vpop.f32.mrb[12].mxu0 }
 0x13a   : > { %1156 = vst [vmem:[%s1943_s12 + $0x18] sm:$0xff] %v1420_v62  ;;  %v1428_v3 = vpack.c.bf16 %v920_v63, %v919_v60  ;;  %v624_v4 = vadd.f32 %v623_v2, %v1931_v44  ;;  %v676_v5 = vpop.f32.mrb[12].mxu1  ;;  %v625_v6 = vpop.f32.mrb[13].mxu0 }
 0x13b   : > { %1163 = vst [vmem:[%s1943_s12 + $0x50] sm:$0xff] %v1427_v1  ;;  %v677_v8 = vadd.f32 %v676_v5, %v1931_v44  ;;  %v626_v9 = vadd.f32 %v625_v6, %v1931_v44  ;;  %v678_v10 = vpop.f32.mrb[13].mxu1  ;;  %v627_v11 = vpop.f32.mrb[14].mxu0 }
 0x13c   : > { %1164 = vst [vmem:[%s1943_s12 + $0x58] sm:$0xff] %v1428_v3  ;;  %v933_v12 = vmax.f32 %v624_v4, 0.0  ;;  %v679_v13 = vadd.f32 %v678_v10, %v1931_v44  ;;  %v628_v14 = vadd.f32 %v627_v11, %v1946_v7  ;;  %v680_v15 = vpop.f32.mrb[14].mxu1  ;;  %v629_v16 = vpop.f32.mrb[15].mxu0 }
 0x13d   : > { %v935_v17 = vmax.f32 %v677_v8, 0.0  ;;  %v934_v18 = vmax.f32 %v626_v9, 0.0  ;;  %v681_v19 = vadd.f32 %v680_v15, %v1946_v7  ;;  %v630_v20 = vadd.f32 %v629_v16, %v1946_v7  ;;  %v682_v21 = vpop.f32.mrb[15].mxu1 }
 0x13e   : > { %v936_v22 = vmax.f32 %v679_v13, 0.0  ;;  %v949_v23 = vmax.f32 %v628_v14, 0.0  ;;  %v683_v24 = vadd.f32 %v682_v21, %v1946_v7 }
 0x13f   : > { %v1435_v25 = vpack.c.bf16 %v934_v18, %v933_v12  ;;  %v951_v27 = vmax.f32 %v681_v19, 0.0  ;;  %v950_v28 = vmax.f32 %v630_v20, 0.0 }
 0x140   : > { %v1436_v29 = vpack.c.bf16 %v936_v22, %v935_v17  ;;  %v952_v30 = vmax.f32 %v683_v24, 0.0 }
 0x141   : > { %1171 = vst [vmem:[%s1943_s12 + $0x90] sm:$0xff] %v1435_v25  ;;  %v1443_v31 = vpack.c.bf16 %v950_v28, %v949_v23  ;;  %v719_v32 = vpop.f32.mrb[16].mxu0 }
 0x142   : > { %1172 = vst [vmem:[%s1943_s12 + $0x98] sm:$0xff] %v1436_v29  ;;  %v1444_v33 = vpack.c.bf16 %v952_v30, %v951_v27  ;;  %v720_v34 = vadd.f32 %v719_v32, %v1927_v41  ;;  %v772_v35 = vpop.f32.mrb[16].mxu1  ;;  %v721_v36 = vpop.f32.mrb[17].mxu0 }
 0x143   : > { %1179 = vst [vmem:[%s1943_s12 + $0xd0] sm:$0xff] %v1443_v31  ;;  %v773_v37 = vadd.f32 %v772_v35, %v1927_v41  ;;  %v722_v38 = vadd.f32 %v721_v36, %v1927_v41  ;;  %v774_v39 = vpop.f32.mrb[17].mxu1  ;;  %v723_v40 = vpop.f32.mrb[18].mxu0 }
 0x144   : > { %1180 = vst [vmem:[%s1943_s12 + $0xd8] sm:$0xff] %v1444_v33  ;;  %v905_v43 = vmax.f32 %v720_v34, 0.0  ;;  %v775_v45 = vadd.f32 %v774_v39, %v1927_v41  ;;  %v724_v26 = vadd.f32 %v723_v40, %v1929_v42  ;;  %v776_v46 = vpop.f32.mrb[18].mxu1  ;;  %v725_v47 = vpop.f32.mrb[19].mxu0 }
 0x145   : > { %v907_v0 = vmax.f32 %v773_v37, 0.0  ;;  %v906_v48 = vmax.f32 %v722_v38, 0.0  ;;  %v777_v49 = vadd.f32 %v776_v46, %v1929_v42  ;;  %v726_v50 = vadd.f32 %v725_v47, %v1929_v42  ;;  %v778_v51 = vpop.f32.mrb[19].mxu1 }
 0x146   : > { %v908_v52 = vmax.f32 %v775_v45, 0.0  ;;  %v921_v53 = vmax.f32 %v724_v26, 0.0  ;;  %v779_v54 = vadd.f32 %v778_v51, %v1929_v42 }
 0x147   : > { %v1421_v55 = vpack.c.bf16 %v906_v48, %v905_v43  ;;  %v923_v56 = vmax.f32 %v777_v49, 0.0  ;;  %v922_v57 = vmax.f32 %v726_v50, 0.0 }
 0x148   : > { %v1422_v58 = vpack.c.bf16 %v908_v52, %v907_v0  ;;  %v924_v59 = vmax.f32 %v779_v54, 0.0 }
 0x149   : > { %1157 = vst [vmem:[%s1943_s12 + $0x20] sm:$0xff] %v1421_v55  ;;  %v1429_v60 = vpack.c.bf16 %v922_v57, %v921_v53  ;;  %v729_v61 = vpop.f32.mrb[20].mxu0 }
 0x14a   : > { %1158 = vst [vmem:[%s1943_s12 + $0x28] sm:$0xff] %v1422_v58  ;;  %v1430_v62 = vpack.c.bf16 %v924_v59, %v923_v56  ;;  %v730_v63 = vadd.f32 %v729_v61, %v1931_v44  ;;  %v782_v1 = vpop.f32.mrb[20].mxu1  ;;  %v731_v2 = vpop.f32.mrb[21].mxu0 }
 0x14b   : > { %1165 = vst [vmem:[%s1943_s12 + $0x60] sm:$0xff] %v1429_v60  ;;  %v783_v3 = vadd.f32 %v782_v1, %v1931_v44  ;;  %v732_v4 = vadd.f32 %v731_v2, %v1931_v44  ;;  %v784_v5 = vpop.f32.mrb[21].mxu1  ;;  %v733_v6 = vpop.f32.mrb[22].mxu0 }
 0x14c   : > { %1166 = vst [vmem:[%s1943_s12 + $0x68] sm:$0xff] %v1430_v62  ;;  %v937_v8 = vmax.f32 %v730_v63, 0.0  ;;  %v785_v9 = vadd.f32 %v784_v5, %v1931_v44  ;;  %v734_v10 = vadd.f32 %v733_v6, %v1946_v7  ;;  %v786_v11 = vpop.f32.mrb[22].mxu1  ;;  %v735_v12 = vpop.f32.mrb[23].mxu0 }
 0x14d   : > { %v939_v13 = vmax.f32 %v783_v3, 0.0  ;;  %v938_v14 = vmax.f32 %v732_v4, 0.0  ;;  %v787_v15 = vadd.f32 %v786_v11, %v1946_v7  ;;  %v736_v16 = vadd.f32 %v735_v12, %v1946_v7  ;;  %v788_v17 = vpop.f32.mrb[23].mxu1 }
 0x14e   : > { %v940_v18 = vmax.f32 %v785_v9, 0.0  ;;  %v953_v19 = vmax.f32 %v734_v10, 0.0  ;;  %v789_v20 = vadd.f32 %v788_v17, %v1946_v7 }
 0x14f   : > { %v1437_v21 = vpack.c.bf16 %v938_v14, %v937_v8  ;;  %v955_v22 = vmax.f32 %v787_v15, 0.0  ;;  %v954_v23 = vmax.f32 %v736_v16, 0.0 }
 0x150   : > { %v1438_v24 = vpack.c.bf16 %v940_v18, %v939_v13  ;;  %v956_v25 = vmax.f32 %v789_v20, 0.0 }
 0x151   : > { %1173 = vst [vmem:[%s1943_s12 + $0xa0] sm:$0xff] %v1437_v21  ;;  %v1445_v27 = vpack.c.bf16 %v954_v23, %v953_v19  ;;  %v825_v28 = vpop.f32.mrb[24].mxu0  ;;  %v1211_v21 = vld [vmem:[%s1943_s12 + $0x8] sm:$0xff] (%p1635_p6)  ;;  %v1215_v23 = vld [vmem:[%s1943_s12 + $0x18] sm:$0xff] (%p1635_p6) }
 0x152   : > { %1174 = vst [vmem:[%s1943_s12 + $0xa8] sm:$0xff] %v1438_v24  ;;  %v1446_v29 = vpack.c.bf16 %v956_v25, %v955_v22  ;;  %v826_v30 = vadd.f32 %v825_v28, %v1927_v41  ;;  %v878_v31 = vpop.f32.mrb[24].mxu1  ;;  %v827_v32 = vpop.f32.mrb[25].mxu0  ;;  %v1213_v22 = vld [vmem:[%s1943_s12 + $0x10] sm:$0xff] (%p1635_p6)  ;;  %v1217_v24 = vld [vmem:[%s1943_s12 + $0x20] sm:$0xff] (%p1635_p6)  ;;  %v1219_v25 = vld [vmem:[%s1943_s12 + $0x28] sm:$0xff] (%p1635_p6) }
 0x153   : > { %1181 = vst [vmem:[%s1943_s12 + $0xe0] sm:$0xff] %v1445_v27  ;;  %v879_v33 = vadd.f32 %v878_v31, %v1927_v41  ;;  %v828_v34 = vadd.f32 %v827_v32, %v1927_v41  ;;  %v880_v35 = vpop.f32.mrb[25].mxu1  ;;  %v829_v36 = vpop.f32.mrb[26].mxu0  ;;  %v1229_v31 = vld [vmem:[%s1943_s12 + $0x50] sm:$0xff] (%p1635_p6)  ;;  %v1231_v32 = vld [vmem:[%s1943_s12 + $0x58] sm:$0xff] (%p1635_p6)  ;;  %1212 = vst [vmem:[%s2051_s26 + $0x8] sm:$0xff] (%p1635_p6), %v1211_v21 }
 0x154   : > { %1182 = vst [vmem:[%s1943_s12 + $0xe8] sm:$0xff] %v1446_v29  ;;  %v909_v37 = vmax.f32 %v826_v30, 0.0  ;;  %v881_v38 = vadd.f32 %v880_v35, %v1927_v41  ;;  %v830_v39 = vadd.f32 %v829_v36, %v1929_v42  ;;  %v882_v40 = vpop.f32.mrb[26].mxu1  ;;  %v831_v43 = vpop.f32.mrb[27].mxu0  ;;  %v1225_v29 = vld [vmem:[%s1943_s12 + $0x40] sm:$0xff] (%p1635_p6)  ;;  %v1227_v30 = vld [vmem:[%s1943_s12 + $0x48] sm:$0xff] (%p1635_p6) }
 0x155   : > { %v911_v45 = vmax.f32 %v879_v33, 0.0  ;;  %v910_v26 = vmax.f32 %v828_v34, 0.0  ;;  %v883_v46 = vadd.f32 %v882_v40, %v1929_v42  ;;  %v832_v47 = vadd.f32 %v831_v43, %v1929_v42  ;;  %v884_v0 = vpop.f32.mrb[27].mxu1  ;;  %1214 = vst [vmem:[%s2051_s26 + $0x10] sm:$0xff] (%p1635_p6), %v1213_v22  ;;  %1216 = vst [vmem:[%s2051_s26 + $0x18] sm:$0xff] (%p1635_p6), %v1215_v23  ;;  %v1233_v33 = vld [vmem:[%s1943_s12 + $0x60] sm:$0xff] (%p1635_p6) }
 0x156   : > { %v912_v48 = vmax.f32 %v881_v38, 0.0  ;;  %v925_v49 = vmax.f32 %v830_v39, 0.0  ;;  %v885_v50 = vadd.f32 %v884_v0, %v1929_v42  ;;  %1218 = vst [vmem:[%s2051_s26 + $0x20] sm:$0xff] (%p1635_p6), %v1217_v24  ;;  %1220 = vst [vmem:[%s2051_s26 + $0x28] sm:$0xff] (%p1635_p6), %v1219_v25  ;;  %v1235_v34 = vld [vmem:[%s1943_s12 + $0x68] sm:$0xff] (%p1635_p6)  ;;  %v1245_v39 = vld [vmem:[%s1943_s12 + $0x90] sm:$0xff] (%p1635_p6) }
 0x157   : > { %v1423_v51 = vpack.c.bf16 %v910_v26, %v909_v37  ;;  %v927_v41 = vmax.f32 %v883_v46, 0.0  ;;  %v926_v52 = vmax.f32 %v832_v47, 0.0  ;;  %1226 = vst [vmem:[%s2051_s26 + $0x100] sm:$0xff] (%p1635_p6), %v1225_v29  ;;  %1228 = vst [vmem:[%s2051_s26 + $0x108] sm:$0xff] (%p1635_p6), %v1227_v30  ;;  %v1241_v37 = vld [vmem:[%s1943_s12 + $0x80] sm:$0xff] (%p1635_p6)  ;;  %v1243_v38 = vld [vmem:[%s1943_s12 + $0x88] sm:$0xff] (%p1635_p6) }
 0x158   : > { %v1424_v53 = vpack.c.bf16 %v912_v48, %v911_v45  ;;  %v928_v54 = vmax.f32 %v885_v50, 0.0  ;;  %1230 = vst [vmem:[%s2051_s26 + $0x110] sm:$0xff] (%p1635_p6), %v1229_v31  ;;  %1232 = vst [vmem:[%s2051_s26 + $0x118] sm:$0xff] (%p1635_p6), %v1231_v32  ;;  %v1247_v40 = vld [vmem:[%s1943_s12 + $0x98] sm:$0xff] (%p1635_p6)  ;;  %v1249_v43 = vld [vmem:[%s1943_s12 + $0xa0] sm:$0xff] (%p1635_p6) }
 0x159   : > { %1159 = vst [vmem:[%s1943_s12 + $0x30] sm:$0xff] %v1423_v51  ;;  %v1431_v55 = vpack.c.bf16 %v926_v52, %v925_v49  ;;  %v835_v56 = vpop.f32.mrb[28].mxu0  ;;  %1234 = vst [vmem:[%s2051_s26 + $0x120] sm:$0xff] (%p1635_p6), %v1233_v33  ;;  %v1251_v45 = vld [vmem:[%s1943_s12 + $0xa8] sm:$0xff] (%p1635_p6)  ;;  %v1257_v47 = vld [vmem:[%s1943_s12 + $0xc0] sm:$0xff] (%p1635_p6) }
 0x15a   : > { %1160 = vst [vmem:[%s1943_s12 + $0x38] sm:$0xff] %v1424_v53  ;;  %v1432_v57 = vpack.c.bf16 %v928_v54, %v927_v41  ;;  %v836_v58 = vadd.f32 %v835_v56, %v1931_v44  ;;  %v888_v59 = vpop.f32.mrb[28].mxu1  ;;  %v837_v60 = vpop.f32.mrb[29].mxu0  ;;  %1236 = vst [vmem:[%s2051_s26 + $0x128] sm:$0xff] (%p1635_p6), %v1235_v34  ;;  %v1259_v0 = vld [vmem:[%s1943_s12 + $0xc8] sm:$0xff] (%p1635_p6)  ;;  %v1261_v48 = vld [vmem:[%s1943_s12 + $0xd0] sm:$0xff] (%p1635_p6) }
 0x15b   : > { %1167 = vst [vmem:[%s1943_s12 + $0x70] sm:$0xff] %v1431_v55  ;;  %v889_v61 = vadd.f32 %v888_v59, %v1931_v44  ;;  %v838_v42 = vadd.f32 %v837_v60, %v1931_v44  ;;  %v890_v62 = vpop.f32.mrb[29].mxu1  ;;  %v839_v63 = vpop.f32.mrb[30].mxu0  ;;  %1242 = vst [vmem:[%s2051_s26 + $0x200] sm:$0xff] (%p1635_p6), %v1241_v37  ;;  %v1263_v49 = vld [vmem:[%s1943_s12 + $0xd8] sm:$0xff] (%p1635_p6)  ;;  %v1265_v50 = vld [vmem:[%s1943_s12 + $0xe0] sm:$0xff] (%p1635_p6) }
 0x15c   : > { %1168 = vst [vmem:[%s1943_s12 + $0x78] sm:$0xff] %v1432_v57  ;;  %v941_v1 = vmax.f32 %v836_v58, 0.0  ;;  %v891_v2 = vadd.f32 %v890_v62, %v1931_v44  ;;  %v840_v3 = vadd.f32 %v839_v63, %v1946_v7  ;;  %v892_v4 = vpop.f32.mrb[30].mxu1  ;;  %v841_v5 = vpop.f32.mrb[31].mxu0  ;;  %1244 = vst [vmem:[%s2051_s26 + $0x208] sm:$0xff] (%p1635_p6), %v1243_v38  ;;  %v1267_v51 = vld [vmem:[%s1943_s12 + $0xe8] sm:$0xff] (%p1635_p6) }
 0x15d   : > { %v943_v6 = vmax.f32 %v889_v61, 0.0  ;;  %v942_v8 = vmax.f32 %v838_v42, 0.0  ;;  %v893_v9 = vadd.f32 %v892_v4, %v1946_v7  ;;  %v842_v10 = vadd.f32 %v841_v5, %v1946_v7  ;;  %v894_v11 = vpop.f32.mrb[31].mxu1  ;;  %1246 = vst [vmem:[%s2051_s26 + $0x210] sm:$0xff] (%p1635_p6), %v1245_v39  ;;  %1248 = vst [vmem:[%s2051_s26 + $0x218] sm:$0xff] (%p1635_p6), %v1247_v40 }
 0x15e   : > { %v944_v12 = vmax.f32 %v891_v2, 0.0  ;;  %v957_v13 = vmax.f32 %v840_v3, 0.0  ;;  %v895_v14 = vadd.f32 %v894_v11, %v1946_v7  ;;  %1191 = sbr.rel (!%p1635_p6) target bundleno = 365 (0x16d), region = 59  ;;  %v1209_v7 = vld [vmem:[%s1943_s12] sm:$0xff] (%p1635_p6)  ;;  %1250 = vst [vmem:[%s2051_s26 + $0x220] sm:$0xff] (%p1635_p6), %v1249_v43  ;;  %1252 = vst [vmem:[%s2051_s26 + $0x228] sm:$0xff] (%p1635_p6), %v1251_v45 }
 0x15f   : > { %v1439_v44 = vpack.c.bf16 %v942_v8, %v941_v1  ;;  %v959_v15 = vmax.f32 %v893_v9, 0.0  ;;  %v958_v16 = vmax.f32 %v842_v10, 0.0  ;;  %1210 = vst [vmem:[%s2051_s26] sm:$0xff] (%p1635_p6), %v1209_v7  ;;  %1258 = vst [vmem:[%s2051_s26 + $0x300] sm:$0xff] (%p1635_p6), %v1257_v47 }
 0x160   : > { %v1440_v17 = vpack.c.bf16 %v944_v12, %v943_v6  ;;  %v960_v18 = vmax.f32 %v895_v14, 0.0  ;;  %v1221_v27 = vld [vmem:[%s1943_s12 + $0x30] sm:$0xff] (%p1635_p6)  ;;  %1260 = vst [vmem:[%s2051_s26 + $0x308] sm:$0xff] (%p1635_p6), %v1259_v0  ;;  %1262 = vst [vmem:[%s2051_s26 + $0x310] sm:$0xff] (%p1635_p6), %v1261_v48 }
 0x161   : > { %1175 = vst [vmem:[%s1943_s12 + $0xb0] sm:$0xff] %v1439_v44  ;;  %v1447_v19 = vpack.c.bf16 %v958_v16, %v957_v13  ;;  %v1223_v28 = vld [vmem:[%s1943_s12 + $0x38] sm:$0xff] (%p1635_p6)  ;;  %1222 = vst [vmem:[%s2051_s26 + $0x30] sm:$0xff] (%p1635_p6), %v1221_v27 }
 0x162   : > { %1176 = vst [vmem:[%s1943_s12 + $0xb8] sm:$0xff] %v1440_v17  ;;  %v1448_v20 = vpack.c.bf16 %v960_v18, %v959_v15  ;;  %1224 = vst [vmem:[%s2051_s26 + $0x38] sm:$0xff] (%p1635_p6), %v1223_v28  ;;  %v1237_v35 = vld [vmem:[%s1943_s12 + $0x70] sm:$0xff] (%p1635_p6) }
 0x163   : > { %1183 = vst [vmem:[%s1943_s12 + $0xf0] sm:$0xff] %v1447_v19  ;;  %1238 = vst [vmem:[%s2051_s26 + $0x130] sm:$0xff] (%p1635_p6), %v1237_v35  ;;  %v1239_v36 = vld [vmem:[%s1943_s12 + $0x78] sm:$0xff] (%p1635_p6) }
 0x164   : > { %1184 = vst [vmem:[%s1943_s12 + $0xf8] sm:$0xff] %v1448_v20  ;;  %1240 = vst [vmem:[%s2051_s26 + $0x138] sm:$0xff] (%p1635_p6), %v1239_v36 }
 0x165   : > { %1264 = vst [vmem:[%s2051_s26 + $0x318] sm:$0xff] %v1263_v49  ;;  %1266 = vst [vmem:[%s2051_s26 + $0x320] sm:$0xff] %v1265_v50 }
 0x166   : > { %1268 = vst [vmem:[%s2051_s26 + $0x328] sm:$0xff] %v1267_v51 }
 0x168   : > { %v1253_v26 = vld [vmem:[%s1943_s12 + $0xb0] sm:$0xff] }
 0x169   : > { %v1255_v46 = vld [vmem:[%s1943_s12 + $0xb8] sm:$0xff]  ;;  %1254 = vst [vmem:[%s2051_s26 + $0x230] sm:$0xff] %v1253_v26 }
 0x16a   : > { %1256 = vst [vmem:[%s2051_s26 + $0x238] sm:$0xff] %v1255_v46  ;;  %v1269_v41 = vld [vmem:[%s1943_s12 + $0xf0] sm:$0xff] }
 0x16b   : > { %v1271_v52 = vld [vmem:[%s1943_s12 + $0xf8] sm:$0xff]  ;;  %1270 = vst [vmem:[%s2051_s26 + $0x330] sm:$0xff] %v1269_v41 }
 0x16c   : > { %1272 = vst [vmem:[%s2051_s26 + $0x338] sm:$0xff] %v1271_v52 }
 0x16d PF: > { %s13_s18 = sadd.s32 1, %s1564_s18   ;;  %s2134_s12 = smov %s1544_s13 }
 0x16e   : > { %p10_p12 = scmp.ge.s32.totalorder %s13_s18, 10   ;;  %s2135_s13 = smov %s1643_s27 }
 0x16f   : > { %s2136_s14 = smov %s1556_s16  ;;  %s2137_s15 = smov %s1560_s17 }
 0x170   : > { %s2138_s16 = smov %s2141_s19  ;;  %s2139_s17 = smov %s2145_s20 }
 0x171   :  { %12 = sbr.rel (!%p10_p12) target bundleno = 4 (0x4), region = 113 }

// kernel: self_attention_forward.3
= control target key start
LH: loop header
LB: loop body
LE: loop exit
PB: predicated region body
PF: predicated region fallthrough
CT: control target
= control target key end

     0   :  { %s4741_s0 = inlined_call_operand.vmem [shape: bf16[2,8,8192], index: 0, kind: input, shape index: {}]   ;;  %s4742_s1 = inlined_call_operand.vmem [shape: bf16[2,8,1024], index: 1, kind: input, shape index: {}]   ;;  %s4743_s2 = inlined_call_operand.vmem [shape: bf16[2,16,1024], index: 2, kind: input, shape index: {}]   ;;  %s4744_s3 = inlined_call_operand.vmem [shape: f32[2,32,8192], index: 3, kind: input, shape index: {}]   ;;  %s4745_s4 = inlined_call_operand.vmem [shape: bf16[32,16], index: 4, kind: input, shape index: {}]   ;;  %s4746_s5 = inlined_call_operand.vmem [shape: f32[32,1], index: 5, kind: input, shape index: {}]   ;;  %s4747_s6 = inlined_call_operand.<no memory space> [shape: f32[1], index: 6, kind: input, shape index: {}]   ;;  %s4748_s7 = inlined_call_operand.vmem [shape: f32[2,32,8192], index: 7, kind: output, shape index: {}]  }
   0x1   :  { %4919 = sst [smem:[#allocation141_spill]] %s4743_s2 }
   0x2   :  { %4920 = sst [smem:[#allocation142_spill]] %s4744_s3 }
   0x3   :  { %4921 = sst [smem:[#allocation143_spill]] %s4745_s4 }
   0x4   :  { %4922 = sst [smem:[#allocation144_spill]] %s4748_s7 }
   0x5   :  { %12 = sst [smem:[#allocation5]] %s4747_s6 }
   0x6   :  { %s2875_s26 = smov 0   ;;  %s2877_s27 = smov 0  }
   0x7   :  { %s2879_s28 = smov 0   ;;  %s2881_s29 = smov 0  }
   0x8   :  { %s2883_s30 = smov 0   ;;  %s2885_s8 = smov 0  }
   0x9   :  { %s2887_s9 = smov 0   ;;  %s2889_s10 = smov 0  }
   0xa   :  { %s2891_s11 = smov 0   ;;  %s2893_s12 = smov 0  }
   0xb   :  { %s2895_s6 = smov 0  }
   0xc LB: > { %4923 = sst [smem:[#allocation9_spill]] %s2813_s10  ;;  %s30_s13 = sadd.s32 1, %s2813_s10  ;;  %s2825_s6 = sphi %s2895_s6, %s18_s6   ;;  %s2821_s12 = sphi %s2893_s12, %s5327_s12   ;;  %s2817_s11 = sphi %s2891_s11, %s5326_s11   ;;  %s2813_s10 = sphi %s2889_s10, %s5325_s10   ;;  %s2809_s9 = sphi %s2887_s9, %s5324_s9   ;;  %s2805_s8 = sphi %s2885_s8, %s5323_s8   ;;  %s2801_s30 = sphi %s2883_s30, %s5322_s30   ;;  %s2797_s29 = sphi %s2881_s29, %s5331_s29   ;;  %s2793_s28 = sphi %s2879_s28, %s5330_s28   ;;  %s2789_s27 = sphi %s2877_s27, %s5329_s27   ;;  %s2785_s26 = sphi %s2875_s26, %s5328_s26  }
   0xd   : > { %4924 = sst [smem:[#allocation10_spill]] %s2817_s11  ;;  %p31_p0 = scmp.ge.s32.totalorder %s30_s13, 2 }
   0xe   : > { %4925 = sst [smem:[#allocation11_spill]] %s2821_s12  ;;  %s33_s14 = sadd.s32 1, %s2817_s11 }
   0xf   : > { %s5333_s13 = smov (%p31_p0, %s30_s13), 0  ;;  %s5335_s14 = smov (!%p31_p0, %s33_s14), %s2817_s11 }
  0x10   : > { %4926 = sst [smem:[#allocation12_spill]] %s5333_s13  ;;  %s37_s15 = sadd.s32 1, %s2821_s12 }
  0x11   : > { %p109_p1 = scmp.ne.s32.totalorder %s2797_s29, %s2793_s28  ;;  %p35_p2 = scmp.ge.s32.totalorder %s5335_s14, 32 }
  0x12   : > { %p110_p3 = scmp.eq.s32.totalorder %s2825_s6, 0  ;;  %s2285_s16 = sadd.s32 4294967295, %s2825_s6  }
  0x13   : > { %p137_p4 = scmp.ne.s32.totalorder %s2789_s27, %s2785_s26  ;;  %s5337_s14 = smov (%p35_p2, %s5335_s14), 0 }
  0x14   : > { %4927 = sst [smem:[#allocation13_spill]] %s5337_s14  ;;  %s5339_s15 = smov (!%p35_p2, %s37_s15), %s2821_s12 }
  0x15   : > { %s98_s17 = ssub.s32 %s2813_s10, %s5333_s13  ;;  %p2947_p5 = por %p110_p3, %p109_p1 }
  0x16   : > { %p39_p6 = scmp.ge.s32.totalorder %s5339_s15, 2  ;;  %p2951_p7 = por %p137_p4, %p110_p3 }
  0x17   : > { %s126_s20 = ssub.s32 %s2817_s11, %s5337_s14  ;;  %p232_p8 = scmp.eq.s32.totalorder %s2285_s16, 127 }
  0x18   : > { %s5341_s15 = smov (%p39_p6, %s5339_s15), 0  ;;  %s102_s21 = sadd.s32 1, %s2797_s29 }
  0x19   : > { %4930 = sst [smem:[#allocation14_spill]] %s5341_s15  ;;  %p2960_p9 = por %p232_p8, %p137_p4 }
  0x1a   : > { %s97_s23 = ssub.s32 %s2821_s12, %s5341_s15  ;;  %s130_s24 = sadd.s32 1, %s2789_s27 }
  0x1b   : > { %s99_s25 = sor.u32 %s98_s17, %s97_s23  ;;  %s127_s13 = sor.u32 %s126_s20, %s97_s23 }
  0x1c   : > { %p100_p10 = scmp.eq.s32.totalorder %s99_s25, 0  ;;  %p128_p11 = scmp.eq.s32.totalorder %s127_s13, 0 }
  0x1d   : > { %p2288_p12 = scmp.ge.s32.totalorder %s2825_s6, 128 }
  0x1e   : > { %s2968_s7 = scalar_select %p100_p10, %s2797_s29, %s102_s21  }
  0x1f   : > { %s2971_s4 = scalar_select %p128_p11, %s2789_s27, %s130_s24  }
  0x20   : > { %4932 = sst [smem:[#allocation15_spill]] %s2968_s7  ;;  %263 = sbr.rel (%p2288_p12) target bundleno = 65 (0x41), region = 28 }
  0x27   : > { %292 = sbr.rel (!%p2947_p5) target bundleno = 51 (0x33), region = 40  ;;  %s294_s16 = sand.u32 (%p2947_p5), 1, %s2797_s29  }
  0x28   : > { %s2290_s15 = sshll.u32 (%p2947_p5), %s2813_s10, 2  ;;  %s2289_s14 = sshll.u32 (%p2947_p5), %s294_s16, 5 }
  0x29   : > { %s2291_s17 = sshll.u32 (%p2947_p5), %s2821_s12, 4  ;;  %s4933_s2 = sld [smem:[#allocation141_spill]] (%p2947_p5) }
  0x2a   : > { %s299_s20 = sadd.s32 (%p2947_p5), %s2291_s17, %s2290_s15  ;;  %s296_s25 = scalar_lea.vmem (%p2947_p5), [#allocation6], %s2289_s14 }
  0x2b   : > { %s2292_s23 = sshll.u32 (%p2947_p5), %s299_s20, 2 }
  0x2f   : > { %s301_s24 = scalar_lea.vmem %s4933_s2, %s2292_s23 }
  0x30   : > { %v314_v0 = vld [vmem:[%s301_s24] sm:$0xff]  ;;  %v316_v1 = vld [vmem:[%s301_s24 + $0x8] sm:$0xff] }
  0x31   : > { %v318_v2 = vld [vmem:[%s301_s24 + $0x20] sm:$0xff]  ;;  %315 = vst [vmem:[%s296_s25] sm:$0xff] %v314_v0  ;;  %317 = vst [vmem:[%s296_s25 + $0x8] sm:$0xff] %v316_v1  ;;  %v320_v3 = vld [vmem:[%s301_s24 + $0x28] sm:$0xff] }
  0x32   : > { %319 = vst [vmem:[%s296_s25 + $0x10] sm:$0xff] %v318_v2  ;;  %321 = vst [vmem:[%s296_s25 + $0x18] sm:$0xff] %v320_v3 }
  0x33 PF: > { %327 = sbr.rel (!%p2951_p7) target bundleno = 65 (0x41), region = 63  ;;  %s329_s15 = sand.u32 (%p2951_p7), 1, %s2789_s27  }
  0x34   : > { %s2294_s18 = sshll.u32 (%p2951_p7), %s2817_s11, 1  ;;  %s2293_s16 = sshll.u32 (%p2951_p7), %s329_s15, 6 }
  0x35   : > { %s2295_s17 = sshll.u32 (%p2951_p7), %s2821_s12, 8  ;;  %s4934_s3 = sld [smem:[#allocation142_spill]] (%p2951_p7) }
  0x36   : > { %s334_s20 = sadd.s32 (%p2951_p7), %s2295_s17, %s2294_s18  ;;  %s331_s24 = scalar_lea.vmem (%p2951_p7), [#allocation7], %s2293_s16 }
  0x37   : > { %s2296_s23 = sshll.u32 (%p2951_p7), %s334_s20, 3 }
  0x3b   : > { %s336_s21 = scalar_lea.vmem %s4934_s3, %s2296_s23 }
  0x3c   : > { %v349_v4 = vld [vmem:[%s336_s21] sm:$0xff]  ;;  %v351_v5 = vld [vmem:[%s336_s21 + $0x8] sm:$0xff] }
  0x3d   : > { %v353_v6 = vld [vmem:[%s336_s21 + $0x200] sm:$0xff]  ;;  %350 = vst [vmem:[%s331_s24] sm:$0xff] %v349_v4  ;;  %352 = vst [vmem:[%s331_s24 + $0x8] sm:$0xff] %v351_v5  ;;  %v355_v7 = vld [vmem:[%s336_s21 + $0x208] sm:$0xff] }
  0x3e   : > { %354 = vst [vmem:[%s331_s24 + $0x10] sm:$0xff] %v353_v6  ;;  %v357_v8 = vld [vmem:[%s336_s21 + $0x400] sm:$0xff]  ;;  %v359_v9 = vld [vmem:[%s336_s21 + $0x408] sm:$0xff]  ;;  %356 = vst [vmem:[%s331_s24 + $0x18] sm:$0xff] %v355_v7 }
  0x3f   : > { %358 = vst [vmem:[%s331_s24 + $0x20] sm:$0xff] %v357_v8  ;;  %360 = vst [vmem:[%s331_s24 + $0x28] sm:$0xff] %v359_v9  ;;  %v361_v10 = vld [vmem:[%s336_s21 + $0x600] sm:$0xff]  ;;  %v363_v11 = vld [vmem:[%s336_s21 + $0x608] sm:$0xff] }
  0x40   : > { %362 = vst [vmem:[%s331_s24 + $0x30] sm:$0xff] %v361_v10  ;;  %364 = vst [vmem:[%s331_s24 + $0x38] sm:$0xff] %v363_v11 }
  0x41 PF: > { %p2297_p13 = scmp.ge.s32.totalorder %s2825_s6, 1  ;;  %p369_p0 = scmp.lt.s32.totalorder %s2825_s6, 129 }
  0x43   : > { %p370_p1 = pnand %p2297_p13, %p369_p0 }
  0x45   : > { %373 = sbr.rel (%p370_p1) target bundleno = 1278 (0x4fe), region = 86 }
  0x4c   : > { %s376_s19 = sand.u32 1, %s2793_s28   ;;  %s383_s25 = sand.u32 1, %s2785_s26  }
  0x4d   : > { %s2298_s15 = sshll.u32 %s376_s19, 5  ;;  %s2299_s18 = sshll.u32 %s383_s25, 6 }
  0x4e   : > { %s2995_s16 = sshll.u32 %s2805_s8, 1  ;;  %p436_p2 = scmp.lt.s32.totalorder %s2809_s9, 1 }
  0x4f   : > { %p438_p3 = scmp.lt.s32.totalorder %s2995_s16, 63  ;;  %s2304_s17 = sshll.u32 %s2801_s30, 2 }
  0x50   : > { %s437_s20 = scalar_select %p436_p2, %s2809_s9, 1 }
  0x51   : > { %s439_s23 = scalar_select %p438_p3, %s2995_s16, 63 }
  0x52   : > { %s2302_s13 = sshll.u32 %s437_s20, 6  ;;  %p448_p4 = scmp.lt.s32.totalorder %s2304_s17, 7 }
  0x53   : > { %s441_s14 = sadd.s32 %s2302_s13, %s439_s23  ;;  %s2305_s26 = sshll.u32 %s437_s20, 3 }
  0x54   : > { %s2303_s21 = sshll.u32 %s441_s14, 2  ;;  %s5343_s17 = smov (!%p448_p4, %s2304_s17), 7 }
  0x55   : > { %s443_s28 = scalar_lea.vmem %s4741_s0, %s2303_s21  ;;  %s451_s19 = sadd.s32 %s2305_s26, %s5343_s17 }
  0x56   : > { %s2306_s8 = sshll.u32 %s451_s19, 2  ;;  %s3008_s11 = scalar_lea.vmem [#allocation6], %s2298_s15 }
  0x57   : > { %s453_s12 = scalar_lea.vmem %s4742_s1, %s2306_s8  ;;  %s3010_s10 = scalar_lea.vmem [#allocation7], %s2299_s18 }
  0x58   : > { %s3012_s7 = scalar_lea.vmem [#allocation8], %s2299_s18  ;;  %p2307_p5 = scmp.ne.s32.totalorder %s2801_s30, 0 }
  0x59   : > { %v463_v12 = vlaneseq (!%p2307_p5)  ;;  %v2827_v13 = vmov (!%p2307_p5), 0.0   ;;  %v2828_v14 = vmov (!%p2307_p5), -inf  }
  0x5a   : > { %462 = sbr.rel (%p2307_p5) target bundleno = 97 (0x61), region = 98  ;;  %469 = vst [vmem:[#allocation4] sm:$0xff] (!%p2307_p5), %v2827_v13  ;;  %470 = vst [vmem:[#allocation4 + $0x8] sm:$0xff] (!%p2307_p5), %v2827_v13 }
  0x5b   : > { %471 = vst [vmem:[#allocation4 + $0x10] sm:$0xff] (!%p2307_p5), %v2827_v13  ;;  %472 = vst [vmem:[#allocation4 + $0x18] sm:$0xff] (!%p2307_p5), %v2827_v13  ;;  %vm465_vm0 = vcmp.lt.s32.totalorder (!%p2307_p5), %v463_v12, 256 }
  0x5c   : > { %467 = vst.msk [vmem:[#allocation2] sm:$0x3] (!%p2307_p5), %vm465_vm0, %v2828_v14  ;;  %468 = vst.msk [vmem:[#allocation3] sm:$0x3] (!%p2307_p5), %vm465_vm0, %v2827_v13 }
  0x61 PF: > { %v474_v15 = vld [vmem:[%s453_s12] sm:$0xff]  ;;  %v475_v16 = vld [vmem:[%s453_s12 + $0x8] sm:$0xff]  ;;  %vm660_vm1 = vcmask 1043456   ;;  %v2829_v21 = vmov 0   ;;  %vm563_vm2 = vcmask 64512   ;;  %p2351_p6 = scmp.ne.s32.totalorder %s2801_s30, 1 }
  0x62   : > { %v473_v17 = vld [vmem:[%s443_s28] sm:$0xff]  ;;  %v2308_v18 = vcombine.low %v474_v15, %v474_v15  ;;  %v2310_v19 = vcombine.low %v475_v16, %v475_v16  ;;  %699 = vmatprep.mubr.bf16.mxu0 %v2829_v21  ;;  %909 = vmatprep.mubr.bf16.mxu1 %v2829_v21  ;;  %v2309_v24 = vcombine.high %v474_v15, %v474_v15  ;;  %s5319_s13 = sld [smem:[#allocation143_spill]] (!%p2351_p6)  ;;  %vm2003_vm4 = vcmask (!%p2351_p6), 130048   ;;  %s2079_s24 = sld [smem:[#allocation5]] (!%p2351_p6) }
  0x63   : > { %v2313_v20 = vcombine.high %v473_v17, %v473_v17  ;;  %v2312_v22 = vcombine.low %v473_v17, %v473_v17  ;;  %v2311_v25 = vcombine.high %v475_v16, %v475_v16 }
  0x64   : > { %494 = vxpose.xlu0.c.b16.start.end [1/1] (short) %v2308_v18, 128  ;;  %526 = vxpose.xlu1.c.b16.start.end [1/1] (short) %v2310_v19, 128 }
  0x65   : > { %2314 = vmatprep.subr.msk.bf16.mxu0 %vm660_vm1, %v2313_v20  ;;  %v662_v23 = vsel %vm660_vm1, %v2312_v22, 0  ;;  %2362 = vmatprep.subr.msk.bf16.mxu1 %vm660_vm1, %v2313_v20 }
  0x66   : > { %668 = vmatpush1.bf16.msra.mxu0 %v662_v23  ;;  %2363 = vmatpush1.bf16.msra.mxu1 %v662_v23 }
  0x81   : > { %510 = vxpose.xlu0.c.b16.start.end [1/1] (short) %v2309_v24, 128  ;;  %542 = vxpose.xlu1.c.b16.start.end [1/1] (short) %v2311_v25, 128 }
  0xca   : > { %v502_v26 = vpop.trf.xlu0  ;;  %v3017_v27 = vpop.trf.xlu1 }
  0xcb   : > { %2315 = vmatmul.mubr.msk.bf16.vlgmr.msra.gmra.mrb[0].mxu0 %vm563_vm2, %v502_v26 }
  0xcc   : > { %709 = vmatprep.mubr.bf16.mxu0 %v2829_v21 }
  0xce   : > { %v3021_v28 = vpop.trf.xlu1  ;;  %v503_v29 = vpop.trf.xlu0 }
  0xd2   : > { %v3023_v30 = vpop.trf.xlu1  ;;  %v504_v32 = vpop.trf.xlu0 }
  0xd3   : > { %2316 = vmatmul.mubr.msk.bf16.gmra.mrb[4].mxu0 %vm563_vm2, %v503_v29 }
  0xd4   : > { %719 = vmatprep.mubr.bf16.mxu0 %v2829_v21 }
  0xd6   : > { %v3027_v31 = vpop.trf.xlu1  ;;  %v505_v35 = vpop.trf.xlu0 }
  0xda   : > { %v3029_v33 = vpop.trf.xlu1  ;;  %v506_v37 = vpop.trf.xlu0 }
  0xdb   : > { %2317 = vmatmul.mubr.msk.bf16.gmra.mrb[8].mxu0 %vm563_vm2, %v504_v32 }
  0xdc   : > { %729 = vmatprep.mubr.bf16.mxu0 %v2829_v21 }
  0xde   : > { %v539_v34 = vpop.trf.xlu1  ;;  %v507_v39 = vpop.trf.xlu0 }
  0xdf   : > { %2336 = vmatmul.mubr.msk.bf16.vlgmr.msra.gmra.mrb[0].mxu1 %vm563_vm2, %v539_v34 }
  0xe0   : > { %919 = vmatprep.mubr.bf16.mxu1 %v2829_v21 }
  0xe2   : > { %v540_v36 = vpop.trf.xlu1  ;;  %v508_v41 = vpop.trf.xlu0 }
  0xe3   : > { %2318 = vmatmul.mubr.msk.bf16.gmra.mrb[12].mxu0 %vm563_vm2, %v505_v35 }
  0xe4   : > { %739 = vmatprep.mubr.bf16.mxu0 %v2829_v21 }
  0xe6   : > { %v541_v38 = vpop.trf.xlu1  ;;  %v509_v43 = vpop.trf.xlu0 }
  0xe7   : > { %2337 = vmatmul.mubr.msk.bf16.gmra.mrb[4].mxu1 %vm563_vm2, %v540_v36 }
  0xe8   : > { %929 = vmatprep.mubr.bf16.mxu1 %v2829_v21 }
  0xea   : > { %v550_v40 = vpop.trf.xlu1  ;;  %v518_v45 = vpop.trf.xlu0 }
  0xeb   : > { %2319 = vmatmul.mubr.msk.bf16.gmra.mrb[16].mxu0 %vm563_vm2, %v506_v37 }
  0xec   : > { %749 = vmatprep.mubr.bf16.mxu0 %v2829_v21 }
  0xee   : > { %v551_v42 = vpop.trf.xlu1  ;;  %v519_v47 = vpop.trf.xlu0 }
  0xef   : > { %2338 = vmatmul.mubr.msk.bf16.gmra.mrb[8].mxu1 %vm563_vm2, %v541_v38 }
  0xf0   : > { %939 = vmatprep.mubr.bf16.mxu1 %v2829_v21 }
  0xf2   : > { %v552_v44 = vpop.trf.xlu1  ;;  %v520_v49 = vpop.trf.xlu0 }
  0xf3   : > { %2320 = vmatmul.mubr.msk.bf16.gmra.mrb[20].mxu0 %vm563_vm2, %v507_v39 }
  0xf4   : > { %759 = vmatprep.mubr.bf16.mxu0 %v2829_v21 }
  0xf6   : > { %v553_v46 = vpop.trf.xlu1  ;;  %v521_v51 = vpop.trf.xlu0 }
  0xf7   : > { %2339 = vmatmul.mubr.msk.bf16.gmra.mrb[12].mxu1 %vm563_vm2, %v550_v40 }
  0xf8   : > { %949 = vmatprep.mubr.bf16.mxu1 %v2829_v21 }
  0xfa   : > { %v554_v48 = vpop.trf.xlu1  ;;  %v522_v53 = vpop.trf.xlu0 }
  0xfb   : > { %2321 = vmatmul.mubr.msk.bf16.gmra.mrb[24].mxu0 %vm563_vm2, %v508_v41 }
  0xfc   : > { %769 = vmatprep.mubr.bf16.mxu0 %v2829_v21 }
  0xfe   : > { %v555_v50 = vpop.trf.xlu1  ;;  %v523_v55 = vpop.trf.xlu0 }
  0xff   : > { %2340 = vmatmul.mubr.msk.bf16.gmra.mrb[16].mxu1 %vm563_vm2, %v551_v42 }
 0x100   : > { %959 = vmatprep.mubr.bf16.mxu1 %v2829_v21 }
 0x102   : > { %v556_v52 = vpop.trf.xlu1  ;;  %v524_v56 = vpop.trf.xlu0 }
 0x103   : > { %2322 = vmatmul.mubr.msk.bf16.gmra.mrb[28].mxu0 %vm563_vm2, %v509_v43 }
 0x104   : > { %779 = vmatprep.mubr.bf16.mxu0 %v2829_v21 }
 0x106   : > { %v557_v54 = vpop.trf.xlu1  ;;  %v525_v57 = vpop.trf.xlu0 }
 0x107   : > { %2341 = vmatmul.mubr.msk.bf16.gmra.mrb[20].mxu1 %vm563_vm2, %v552_v44 }
 0x108   : > { %969 = vmatprep.mubr.bf16.mxu1 %v2829_v21 }
 0x10b   : > { %2323 = vmatmul.mubr.msk.bf16.gmra.mrb[32].mxu0 %vm563_vm2, %v518_v45 }
 0x10c   : > { %789 = vmatprep.mubr.bf16.mxu0 %v2829_v21 }
 0x10f   : > { %2342 = vmatmul.mubr.msk.bf16.gmra.mrb[24].mxu1 %vm563_vm2, %v553_v46 }
 0x110   : > { %979 = vmatprep.mubr.bf16.mxu1 %v2829_v21 }
 0x113   : > { %2324 = vmatmul.mubr.msk.bf16.gmra.mrb[36].mxu0 %vm563_vm2, %v519_v47 }
 0x114   : > { %799 = vmatprep.mubr.bf16.mxu0 %v2829_v21 }
 0x117   : > { %2343 = vmatmul.mubr.msk.bf16.gmra.mrb[28].mxu1 %vm563_vm2, %v554_v48 }
 0x118   : > { %989 = vmatprep.mubr.bf16.mxu1 %v2829_v21 }
 0x11b   : > { %2325 = vmatmul.mubr.msk.bf16.gmra.mrb[40].mxu0 %vm563_vm2, %v520_v49 }
 0x11c   : > { %809 = vmatprep.mubr.bf16.mxu0 %v2829_v21 }
 0x11f   : > { %2344 = vmatmul.mubr.msk.bf16.gmra.mrb[32].mxu1 %vm563_vm2, %v555_v50 }
 0x120   : > { %999 = vmatprep.mubr.bf16.mxu1 %v2829_v21 }
 0x123   : > { %2326 = vmatmul.mubr.msk.bf16.gmra.mrb[44].mxu0 %vm563_vm2, %v521_v51 }
 0x124   : > { %819 = vmatprep.mubr.bf16.mxu0 %v2829_v21 }
 0x127   : > { %2345 = vmatmul.mubr.msk.bf16.gmra.mrb[36].mxu1 %vm563_vm2, %v556_v52 }
 0x128   : > { %1009 = vmatprep.mubr.bf16.mxu1 %v2829_v21 }
 0x12b   : > { %2327 = vmatmul.mubr.msk.bf16.gmra.mrb[48].mxu0 %vm563_vm2, %v522_v53 }
 0x12c   : > { %829 = vmatprep.mubr.bf16.mxu0 %v2829_v21 }
 0x12f   : > { %2346 = vmatmul.mubr.msk.bf16.gmra.mrb[40].mxu1 %vm563_vm2, %v557_v54 }
 0x133   : > { %2328 = vmatmul.mubr.msk.bf16.gmra.mrb[52].mxu0 %vm563_vm2, %v523_v55 }
 0x134   : > { %839 = vmatprep.mubr.bf16.mxu0 %v2829_v21 }
 0x13b   : > { %2329 = vmatmul.mubr.msk.bf16.gmra.mrb[56].mxu0 %vm563_vm2, %v524_v56 }
 0x13c   : > { %849 = vmatprep.mubr.bf16.mxu0 %v2829_v21 }
 0x143   : > { %2330 = vmatmul.mubr.msk.bf16.gmra.mrb[60].mxu0 %vm563_vm2, %v525_v57 }
 0x144   : > { %859 = vmatprep.mubr.bf16.mxu0 %v2829_v21 }
 0x14b   : > { %2331 = vmatmul.mubr.msk.bf16.gmra.mrb[64].mxu0 %vm563_vm2, %v3017_v27 }
 0x14c   : > { %869 = vmatprep.mubr.bf16.mxu0 %v2829_v21 }
 0x153   : > { %2332 = vmatmul.mubr.msk.bf16.gmra.mrb[68].mxu0 %vm563_vm2, %v3021_v28 }
 0x154   : > { %879 = vmatprep.mubr.bf16.mxu0 %v2829_v21 }
 0x15b   : > { %2333 = vmatmul.mubr.msk.bf16.gmra.mrb[72].mxu0 %vm563_vm2, %v3023_v30 }
 0x15c   : > { %889 = vmatprep.mubr.bf16.mxu0 %v2829_v21 }
 0x163   : > { %2334 = vmatmul.mubr.msk.bf16.gmra.mrb[76].mxu0 %vm563_vm2, %v3027_v31 }
 0x164   : > { %899 = vmatprep.mubr.bf16.mxu0 %v2829_v21 }
 0x16b   : > { %2335 = vmatmul.mubr.msk.bf16.gmra.mrb[80].mxu0 %vm563_vm2, %v3029_v33 }
 0x19e   : > { %v3094_v58 = vpop.f32.mrb[0].mxu0 }
 0x19f   : > { %v3096_v59 = vpop.f32.mrb[1].mxu0 }
 0x1a0   : > { %v3098_v60 = vpop.f32.mrb[2].mxu0 }
 0x1a1   : > { %v3100_v61 = vpop.f32.mrb[3].mxu0 }
 0x1a6   : > { %v3102_v62 = vpop.f32.mrb[4].mxu0 }
 0x1a7   : > { %v1021_v63 = vmax.f32 %v3094_v58, %v3102_v62  ;;  %v3106_v0 = vpop.f32.mrb[5].mxu0 }
 0x1a8   : > { %v1090_v1 = vmax.f32 %v3096_v59, %v3106_v0  ;;  %v3110_v2 = vpop.f32.mrb[6].mxu0 }
 0x1a9   : > { %v1022_v3 = vmax.f32 %v3098_v60, %v3110_v2  ;;  %v3114_v4 = vpop.f32.mrb[7].mxu0 }
 0x1aa   : > { %4935 = vst [vmem:[#allocation16_spill] sm:$0xff] %v3114_v4  ;;  %v1091_v5 = vmax.f32 %v3100_v61, %v3114_v4 }
 0x1ae   : > { %v3118_v6 = vpop.f32.mrb[8].mxu0 }
 0x1af   : > { %4936 = vst [vmem:[#allocation17_spill] sm:$0xff] %v3118_v6  ;;  %v1023_v7 = vmax.f32 %v1021_v63, %v3118_v6  ;;  %v3121_v8 = vpop.f32.mrb[9].mxu0 }
 0x1b0   : > { %4937 = vst [vmem:[#allocation18_spill] sm:$0xff] %v3121_v8  ;;  %v1092_v9 = vmax.f32 %v1090_v1, %v3121_v8  ;;  %v3124_v10 = vpop.f32.mrb[10].mxu0 }
 0x1b1   : > { %4938 = vst [vmem:[#allocation19_spill] sm:$0xff] %v3124_v10  ;;  %v1024_v11 = vmax.f32 %v1022_v3, %v3124_v10  ;;  %v3127_v12 = vpop.f32.mrb[11].mxu0 }
 0x1b2   : > { %4939 = vst [vmem:[#allocation20_spill] sm:$0xff] %v3127_v12  ;;  %v1093_v13 = vmax.f32 %v1091_v5, %v3127_v12  ;;  %v3130_v14 = vpop.f32.mrb[0].mxu1 }
 0x1b3   : > { %4940 = vst [vmem:[#allocation21_spill] sm:$0xff] %v3130_v14  ;;  %v3132_v15 = vpop.f32.mrb[1].mxu1 }
 0x1b4   : > { %4941 = vst [vmem:[#allocation22_spill] sm:$0xff] %v3132_v15  ;;  %v3134_v16 = vpop.f32.mrb[2].mxu1 }
 0x1b5   : > { %4942 = vst [vmem:[#allocation23_spill] sm:$0xff] %v3134_v16  ;;  %v3136_v17 = vpop.f32.mrb[3].mxu1 }
 0x1b6   : > { %4943 = vst [vmem:[#allocation24_spill] sm:$0xff] %v3136_v17  ;;  %v3138_v18 = vpop.f32.mrb[12].mxu0  ;;  %v1130_v19 = vmax.f32 %v3136_v17, %v3132_v15 }
 0x1b7   : > { %4944 = vst [vmem:[#allocation25_spill] sm:$0xff] %v3138_v18  ;;  %v1025_v20 = vmax.f32 %v1023_v7, %v3138_v18  ;;  %v3143_v21 = vpop.f32.mrb[13].mxu0 }
 0x1b8   : > { %4945 = vst [vmem:[#allocation26_spill] sm:$0xff] %v3143_v21  ;;  %v1094_v22 = vmax.f32 %v1092_v9, %v3143_v21  ;;  %v3146_v23 = vpop.f32.mrb[14].mxu0 }
 0x1b9   : > { %4946 = vst [vmem:[#allocation27_spill] sm:$0xff] %v3146_v23  ;;  %v1026_v24 = vmax.f32 %v1024_v11, %v3146_v23  ;;  %v3149_v25 = vpop.f32.mrb[15].mxu0 }
 0x1ba   : > { %4947 = vst [vmem:[#allocation28_spill] sm:$0xff] %v3149_v25  ;;  %v1095_v26 = vmax.f32 %v1093_v13, %v3149_v25  ;;  %v3152_v27 = vpop.f32.mrb[4].mxu1 }
 0x1bb   : > { %4948 = vst [vmem:[#allocation29_spill] sm:$0xff] %v3152_v27  ;;  %v3154_v28 = vpop.f32.mrb[5].mxu1 }
 0x1bc   : > { %4949 = vst [vmem:[#allocation30_spill] sm:$0xff] %v3154_v28  ;;  %v1132_v29 = vmax.f32 %v1130_v19, %v3154_v28  ;;  %v3157_v30 = vpop.f32.mrb[6].mxu1 }
 0x1bd   : > { %4950 = vst [vmem:[#allocation31_spill] sm:$0xff] %v3157_v30  ;;  %v3159_v31 = vpop.f32.mrb[7].mxu1 }
 0x1be   : > { %4951 = vst [vmem:[#allocation32_spill] sm:$0xff] %v3159_v31  ;;  %v3161_v32 = vpop.f32.mrb[16].mxu0  ;;  %v1134_v33 = vmax.f32 %v1132_v29, %v3159_v31 }
 0x1bf   : > { %4952 = vst [vmem:[#allocation33_spill] sm:$0xff] %v3161_v32  ;;  %v1027_v34 = vmax.f32 %v1025_v20, %v3161_v32  ;;  %v3165_v35 = vpop.f32.mrb[17].mxu0 }
 0x1c0   : > { %4953 = vst [vmem:[#allocation34_spill] sm:$0xff] %v3165_v35  ;;  %v1096_v36 = vmax.f32 %v1094_v22, %v3165_v35  ;;  %v3168_v37 = vpop.f32.mrb[18].mxu0 }
 0x1c1   : > { %4954 = vst [vmem:[#allocation35_spill] sm:$0xff] %v3168_v37  ;;  %v1028_v38 = vmax.f32 %v1026_v24, %v3168_v37  ;;  %v3171_v39 = vpop.f32.mrb[19].mxu0 }
 0x1c2   : > { %4955 = vst [vmem:[#allocation36_spill] sm:$0xff] %v3171_v39  ;;  %v1097_v40 = vmax.f32 %v1095_v26, %v3171_v39  ;;  %v3174_v41 = vpop.f32.mrb[8].mxu1 }
 0x1c3   : > { %4956 = vst [vmem:[#allocation37_spill] sm:$0xff] %v3174_v41  ;;  %v3176_v42 = vpop.f32.mrb[9].mxu1 }
 0x1c4   : > { %4957 = vst [vmem:[#allocation38_spill] sm:$0xff] %v3176_v42  ;;  %v1136_v43 = vmax.f32 %v1134_v33, %v3176_v42  ;;  %v3179_v44 = vpop.f32.mrb[10].mxu1 }
 0x1c5   : > { %4958 = vst [vmem:[#allocation39_spill] sm:$0xff] %v3179_v44  ;;  %v3181_v45 = vpop.f32.mrb[11].mxu1 }
 0x1c6   : > { %4959 = vst [vmem:[#allocation40_spill] sm:$0xff] %v3181_v45  ;;  %v3183_v46 = vpop.f32.mrb[20].mxu0  ;;  %v1131_v47 = vmax.f32 %v3181_v45, %v1136_v43 }
 0x1c7   : > { %4960 = vst [vmem:[#allocation41_spill] sm:$0xff] %v3183_v46  ;;  %v1029_v48 = vmax.f32 %v1027_v34, %v3183_v46  ;;  %v3187_v49 = vpop.f32.mrb[21].mxu0 }
 0x1c8   : > { %4961 = vst [vmem:[#allocation42_spill] sm:$0xff] %v3187_v49  ;;  %v1098_v50 = vmax.f32 %v1096_v36, %v3187_v49  ;;  %v3190_v51 = vpop.f32.mrb[22].mxu0 }
 0x1c9   : > { %4962 = vst [vmem:[#allocation43_spill] sm:$0xff] %v3190_v51  ;;  %v1030_v52 = vmax.f32 %v1028_v38, %v3190_v51  ;;  %v3193_v53 = vpop.f32.mrb[23].mxu0 }
 0x1ca   : > { %4963 = vst [vmem:[#allocation44_spill] sm:$0xff] %v3193_v53  ;;  %v1099_v54 = vmax.f32 %v1097_v40, %v3193_v53  ;;  %v3196_v55 = vpop.f32.mrb[12].mxu1 }
 0x1cb   : > { %4964 = vst [vmem:[#allocation45_spill] sm:$0xff] %v3196_v55  ;;  %v3198_v56 = vpop.f32.mrb[13].mxu1 }
 0x1cc   : > { %4965 = vst [vmem:[#allocation46_spill] sm:$0xff] %v3198_v56  ;;  %v1133_v57 = vmax.f32 %v1131_v47, %v3198_v56  ;;  %v3201_v63 = vpop.f32.mrb[14].mxu1 }
 0x1cd   : > { %4966 = vst [vmem:[#allocation47_spill] sm:$0xff] %v3201_v63  ;;  %v3203_v1 = vpop.f32.mrb[15].mxu1 }
 0x1ce   : > { %4967 = vst [vmem:[#allocation48_spill] sm:$0xff] %v3203_v1  ;;  %v3205_v3 = vpop.f32.mrb[24].mxu0  ;;  %v1135_v5 = vmax.f32 %v1133_v57, %v3203_v1 }
 0x1cf   : > { %4968 = vst [vmem:[#allocation49_spill] sm:$0xff] %v3205_v3  ;;  %v1031_v7 = vmax.f32 %v1029_v48, %v3205_v3  ;;  %v3209_v9 = vpop.f32.mrb[25].mxu0 }
 0x1d0   : > { %4969 = vst [vmem:[#allocation50_spill] sm:$0xff] %v3209_v9  ;;  %v1100_v11 = vmax.f32 %v1098_v50, %v3209_v9  ;;  %v3212_v13 = vpop.f32.mrb[26].mxu0 }
 0x1d1   : > { %4970 = vst [vmem:[#allocation51_spill] sm:$0xff] %v3212_v13  ;;  %v1032_v19 = vmax.f32 %v1030_v52, %v3212_v13  ;;  %v3215_v20 = vpop.f32.mrb[27].mxu0 }
 0x1d2   : > { %4971 = vst [vmem:[#allocation52_spill] sm:$0xff] %v3215_v20  ;;  %v1101_v22 = vmax.f32 %v1099_v54, %v3215_v20  ;;  %v3218_v24 = vpop.f32.mrb[16].mxu1 }
 0x1d3   : > { %4972 = vst [vmem:[#allocation53_spill] sm:$0xff] %v3218_v24  ;;  %v3220_v26 = vpop.f32.mrb[17].mxu1 }
 0x1d4   : > { %4973 = vst [vmem:[#allocation54_spill] sm:$0xff] %v3220_v26  ;;  %v1137_v29 = vmax.f32 %v1135_v5, %v3220_v26  ;;  %v3223_v33 = vpop.f32.mrb[18].mxu1 }
 0x1d5   : > { %4974 = vst [vmem:[#allocation55_spill] sm:$0xff] %v3223_v33  ;;  %v3225_v34 = vpop.f32.mrb[19].mxu1 }
 0x1d6   : > { %4975 = vst [vmem:[#allocation56_spill] sm:$0xff] %v3225_v34  ;;  %v3227_v36 = vpop.f32.mrb[28].mxu0  ;;  %v1138_v38 = vmax.f32 %v3225_v34, %v1137_v29 }
 0x1d7   : > { %4976 = vst [vmem:[#allocation57_spill] sm:$0xff] %v3227_v36  ;;  %v1033_v40 = vmax.f32 %v1031_v7, %v3227_v36  ;;  %v3231_v43 = vpop.f32.mrb[29].mxu0 }
 0x1d8   : > { %4977 = vst [vmem:[#allocation58_spill] sm:$0xff] %v3231_v43  ;;  %v1102_v47 = vmax.f32 %v1100_v11, %v3231_v43  ;;  %v3234_v48 = vpop.f32.mrb[30].mxu0 }
 0x1d9   : > { %4978 = vst [vmem:[#allocation59_spill] sm:$0xff] %v3234_v48  ;;  %v1034_v50 = vmax.f32 %v1032_v19, %v3234_v48  ;;  %v3237_v52 = vpop.f32.mrb[31].mxu0 }
 0x1da   : > { %4979 = vst [vmem:[#allocation60_spill] sm:$0xff] %v3237_v52  ;;  %v1103_v54 = vmax.f32 %v1101_v22, %v3237_v52  ;;  %v3240_v57 = vpop.f32.mrb[20].mxu1 }
 0x1db   : > { %4980 = vst [vmem:[#allocation61_spill] sm:$0xff] %v3240_v57  ;;  %v3242_v5 = vpop.f32.mrb[21].mxu1 }
 0x1dc   : > { %4981 = vst [vmem:[#allocation62_spill] sm:$0xff] %v3242_v5  ;;  %v1140_v29 = vmax.f32 %v1138_v38, %v3242_v5  ;;  %v3245_v20 = vpop.f32.mrb[22].mxu1 }
 0x1dd   : > { %4982 = vst [vmem:[#allocation63_spill] sm:$0xff] %v3245_v20  ;;  %v3247_v7 = vpop.f32.mrb[23].mxu1 }
 0x1de   : > { %4983 = vst [vmem:[#allocation64_spill] sm:$0xff] %v3247_v7  ;;  %v3249_v36 = vpop.f32.mrb[32].mxu0  ;;  %v1142_v11 = vmax.f32 %v1140_v29, %v3247_v7 }
 0x1df   : > { %4984 = vst [vmem:[#allocation65_spill] sm:$0xff] %v3249_v36  ;;  %v1035_v19 = vmax.f32 %v1033_v40, %v3249_v36  ;;  %v3253_v48 = vpop.f32.mrb[33].mxu0 }
 0x1e0   : > { %4985 = vst [vmem:[#allocation66_spill] sm:$0xff] %v3253_v48  ;;  %v1104_v22 = vmax.f32 %v1102_v47, %v3253_v48  ;;  %v3256_v52 = vpop.f32.mrb[34].mxu0 }
 0x1e1   : > { %4986 = vst [vmem:[#allocation67_spill] sm:$0xff] %v3256_v52  ;;  %v1036_v43 = vmax.f32 %v1034_v50, %v3256_v52  ;;  %v3259_v13 = vpop.f32.mrb[35].mxu0 }
 0x1e2   : > { %4987 = vst [vmem:[#allocation68_spill] sm:$0xff] %v3259_v13  ;;  %v1105_v38 = vmax.f32 %v1103_v54, %v3259_v13  ;;  %v3262_v9 = vpop.f32.mrb[24].mxu1 }
 0x1e3   : > { %4988 = vst [vmem:[#allocation69_spill] sm:$0xff] %v3262_v9  ;;  %v3264_v3 = vpop.f32.mrb[25].mxu1 }
 0x1e4   : > { %4989 = vst [vmem:[#allocation70_spill] sm:$0xff] %v3264_v3  ;;  %v1144_v29 = vmax.f32 %v1142_v11, %v3264_v3  ;;  %v3267_v53 = vpop.f32.mrb[26].mxu1 }
 0x1e5   : > { %4990 = vst [vmem:[#allocation71_spill] sm:$0xff] %v3267_v53  ;;  %v3269_v40 = vpop.f32.mrb[27].mxu1 }
 0x1e6   : > { %4991 = vst [vmem:[#allocation72_spill] sm:$0xff] %v3269_v40  ;;  %v3271_v36 = vpop.f32.mrb[36].mxu0  ;;  %v1146_v47 = vmax.f32 %v1144_v29, %v3269_v40 }
 0x1e7   : > { %4992 = vst [vmem:[#allocation73_spill] sm:$0xff] %v3271_v36  ;;  %v1037_v50 = vmax.f32 %v1035_v19, %v3271_v36  ;;  %v3275_v52 = vpop.f32.mrb[37].mxu0 }
 0x1e8   : > { %4993 = vst [vmem:[#allocation74_spill] sm:$0xff] %v3275_v52  ;;  %v1106_v54 = vmax.f32 %v1104_v22, %v3275_v52  ;;  %v3278_v13 = vpop.f32.mrb[38].mxu0 }
 0x1e9   : > { %4994 = vst [vmem:[#allocation75_spill] sm:$0xff] %v3278_v13  ;;  %v1038_v48 = vmax.f32 %v1036_v43, %v3278_v13  ;;  %v3281_v51 = vpop.f32.mrb[39].mxu0 }
 0x1ea   : > { %4995 = vst [vmem:[#allocation76_spill] sm:$0xff] %v3281_v51  ;;  %v1107_v11 = vmax.f32 %v1105_v38, %v3281_v51  ;;  %v3284_v49 = vpop.f32.mrb[28].mxu1 }
 0x1eb   : > { %4996 = vst [vmem:[#allocation77_spill] sm:$0xff] %v3284_v49  ;;  %v3286_v46 = vpop.f32.mrb[29].mxu1 }
 0x1ec   : > { %4997 = vst [vmem:[#allocation78_spill] sm:$0xff] %v3286_v46  ;;  %v3289_v29 = vmax.f32 %v3286_v46, %v1146_v47  ;;  %v3291_v19 = vpop.f32.mrb[30].mxu1 }
 0x1ed   : > { %4998 = vst [vmem:[#allocation79_spill] sm:$0xff] %v3291_v19  ;;  %v3293_v36 = vpop.f32.mrb[31].mxu1 }
 0x1ee   : > { %4999 = vst [vmem:[#allocation80_spill] sm:$0xff] %v3293_v36  ;;  %v3295_v22 = vpop.f32.mrb[40].mxu0 }
 0x1ef   : > { %5000 = vst [vmem:[#allocation81_spill] sm:$0xff] %v3295_v22  ;;  %v1039_v13 = vmax.f32 %v1037_v50, %v3295_v22  ;;  %v3300_v52 = vpop.f32.mrb[41].mxu0 }
 0x1f0   : > { %5001 = vst [vmem:[#allocation82_spill] sm:$0xff] %v3300_v52  ;;  %v1108_v38 = vmax.f32 %v1106_v54, %v3300_v52  ;;  %v3303_v51 = vpop.f32.mrb[42].mxu0 }
 0x1f1   : > { %5002 = vst [vmem:[#allocation83_spill] sm:$0xff] %v3303_v51  ;;  %v1040_v47 = vmax.f32 %v1038_v48, %v3303_v51  ;;  %v3306_v39 = vpop.f32.mrb[43].mxu0 }
 0x1f2   : > { %5003 = vst [vmem:[#allocation84_spill] sm:$0xff] %v3306_v39  ;;  %v1109_v37 = vmax.f32 %v1107_v11, %v3306_v39  ;;  %v3309_v35 = vpop.f32.mrb[32].mxu1 }
 0x1f3   : > { %5004 = vst [vmem:[#allocation85_spill] sm:$0xff] %v3309_v35  ;;  %v3311_v32 = vpop.f32.mrb[33].mxu1 }
 0x1f4   : > { %5005 = vst [vmem:[#allocation86_spill] sm:$0xff] %v3311_v32  ;;  %v3313_v25 = vpop.f32.mrb[34].mxu1 }
 0x1f5   : > { %5006 = vst [vmem:[#allocation87_spill] sm:$0xff] %v3313_v25  ;;  %v3315_v43 = vpop.f32.mrb[35].mxu1 }
 0x1f6   : > { %5007 = vst [vmem:[#allocation88_spill] sm:$0xff] %v3315_v43  ;;  %v3317_v50 = vpop.f32.mrb[44].mxu0 }
 0x1f7   : > { %5008 = vst [vmem:[#allocation89_spill] sm:$0xff] %v3317_v50  ;;  %v1041_v54 = vmax.f32 %v1039_v13, %v3317_v50  ;;  %v3320_v52 = vpop.f32.mrb[45].mxu0 }
 0x1f8   : > { %5009 = vst [vmem:[#allocation90_spill] sm:$0xff] %v3320_v52  ;;  %v1110_v48 = vmax.f32 %v1108_v38, %v3320_v52  ;;  %v3323_v51 = vpop.f32.mrb[46].mxu0 }
 0x1f9   : > { %5010 = vst [vmem:[#allocation91_spill] sm:$0xff] %v3323_v51  ;;  %v1042_v11 = vmax.f32 %v1040_v47, %v3323_v51  ;;  %v3326_v39 = vpop.f32.mrb[47].mxu0 }
 0x1fa   : > { %5011 = vst [vmem:[#allocation92_spill] sm:$0xff] %v3326_v39  ;;  %v1111_v22 = vmax.f32 %v1109_v37, %v3326_v39  ;;  %v3329_v23 = vpop.f32.mrb[36].mxu1 }
 0x1fb   : > { %5012 = vst [vmem:[#allocation93_spill] sm:$0xff] %v3329_v23  ;;  %v3331_v21 = vpop.f32.mrb[37].mxu1 }
 0x1fc   : > { %5013 = vst [vmem:[#allocation94_spill] sm:$0xff] %v3331_v21  ;;  %v3333_v18 = vpop.f32.mrb[38].mxu1 }
 0x1fd   : > { %5014 = vst [vmem:[#allocation95_spill] sm:$0xff] %v3333_v18  ;;  %v3335_v12 = vpop.f32.mrb[39].mxu1 }
 0x1fe   : > { %5015 = vst [vmem:[#allocation96_spill] sm:$0xff] %v3335_v12  ;;  %v3337_v13 = vpop.f32.mrb[48].mxu0 }
 0x1ff   : > { %5016 = vst [vmem:[#allocation97_spill] sm:$0xff] %v3337_v13  ;;  %v1043_v38 = vmax.f32 %v1041_v54, %v3337_v13  ;;  %v3340_v52 = vpop.f32.mrb[49].mxu0 }
 0x200   : > { %5017 = vst [vmem:[#allocation98_spill] sm:$0xff] %v3340_v52  ;;  %v1112_v47 = vmax.f32 %v1110_v48, %v3340_v52  ;;  %v3343_v51 = vpop.f32.mrb[50].mxu0 }
 0x201   : > { %5018 = vst [vmem:[#allocation99_spill] sm:$0xff] %v3343_v51  ;;  %v1044_v37 = vmax.f32 %v1042_v11, %v3343_v51  ;;  %v3346_v39 = vpop.f32.mrb[51].mxu0 }
 0x202   : > { %5019 = vst [vmem:[#allocation100_spill] sm:$0xff] %v3346_v39  ;;  %v1113_v50 = vmax.f32 %v1111_v22, %v3346_v39  ;;  %v3349_v10 = vpop.f32.mrb[40].mxu1 }
 0x203   : > { %5020 = vst [vmem:[#allocation101_spill] sm:$0xff] %v3349_v10  ;;  %v3351_v8 = vpop.f32.mrb[41].mxu1 }
 0x204   : > { %5021 = vst [vmem:[#allocation102_spill] sm:$0xff] %v3351_v8  ;;  %v3353_v6 = vpop.f32.mrb[42].mxu1 }
 0x205   : > { %5022 = vst [vmem:[#allocation103_spill] sm:$0xff] %v3353_v6  ;;  %v3355_v4 = vpop.f32.mrb[43].mxu1 }
 0x206   : > { %5023 = vst [vmem:[#allocation104_spill] sm:$0xff] %v3355_v4  ;;  %v3357_v54 = vpop.f32.mrb[52].mxu0 }
 0x207   : > { %5024 = vst [vmem:[#allocation105_spill] sm:$0xff] %v3357_v54  ;;  %v1045_v48 = vmax.f32 %v1043_v38, %v3357_v54  ;;  %v3360_v52 = vpop.f32.mrb[53].mxu0 }
 0x208   : > { %5025 = vst [vmem:[#allocation106_spill] sm:$0xff] %v3360_v52  ;;  %v1114_v11 = vmax.f32 %v1112_v47, %v3360_v52  ;;  %v3363_v51 = vpop.f32.mrb[54].mxu0 }
 0x209   : > { %5026 = vst [vmem:[#allocation107_spill] sm:$0xff] %v3363_v51  ;;  %v1046_v22 = vmax.f32 %v1044_v37, %v3363_v51  ;;  %v3366_v39 = vpop.f32.mrb[55].mxu0 }
 0x20a   : > { %5027 = vst [vmem:[#allocation108_spill] sm:$0xff] %v3366_v39  ;;  %v1115_v13 = vmax.f32 %v1113_v50, %v3366_v39 }
 0x20e   : > { %v3369_v46 = vpop.f32.mrb[56].mxu0 }
 0x20f   : > { %5028 = vst [vmem:[#allocation109_spill] sm:$0xff] %v3369_v46  ;;  %v1047_v40 = vmax.f32 %v1045_v48, %v3369_v46  ;;  %v3372_v3 = vpop.f32.mrb[57].mxu0 }
 0x210   : > { %5029 = vst [vmem:[#allocation110_spill] sm:$0xff] %v3372_v3  ;;  %v1116_v38 = vmax.f32 %v1114_v11, %v3372_v3  ;;  %v3375_v54 = vpop.f32.mrb[58].mxu0 }
 0x211   : > { %5030 = vst [vmem:[#allocation111_spill] sm:$0xff] %v3375_v54  ;;  %v1048_v47 = vmax.f32 %v1046_v22, %v3375_v54  ;;  %v3378_v52 = vpop.f32.mrb[59].mxu0 }
 0x212   : > { %5031 = vst [vmem:[#allocation112_spill] sm:$0xff] %v3378_v52  ;;  %v1117_v37 = vmax.f32 %v1115_v13, %v3378_v52 }
 0x216   : > { %v3381_v51 = vpop.f32.mrb[60].mxu0 }
 0x217   : > { %5032 = vst [vmem:[#allocation113_spill] sm:$0xff] %v3381_v51  ;;  %v1049_v50 = vmax.f32 %v1047_v40, %v3381_v51  ;;  %v3384_v39 = vpop.f32.mrb[61].mxu0 }
 0x218   : > { %5033 = vst [vmem:[#allocation114_spill] sm:$0xff] %v3384_v39  ;;  %v1118_v48 = vmax.f32 %v1116_v38, %v3384_v39  ;;  %v3387_v46 = vpop.f32.mrb[62].mxu0 }
 0x219   : > { %5034 = vst [vmem:[#allocation115_spill] sm:$0xff] %v3387_v46  ;;  %v1050_v11 = vmax.f32 %v1048_v47, %v3387_v46  ;;  %v3390_v3 = vpop.f32.mrb[63].mxu0 }
 0x21a   : > { %5035 = vst [vmem:[#allocation116_spill] sm:$0xff] %v3390_v3  ;;  %v1119_v22 = vmax.f32 %v1117_v37, %v3390_v3 }
 0x21e   : > { %v3393_v54 = vpop.f32.mrb[64].mxu0 }
 0x21f   : > { %5036 = vst [vmem:[#allocation117_spill] sm:$0xff] %v3393_v54  ;;  %v1051_v13 = vmax.f32 %v1049_v50, %v3393_v54  ;;  %v3396_v52 = vpop.f32.mrb[65].mxu0 }
 0x220   : > { %5037 = vst [vmem:[#allocation118_spill] sm:$0xff] %v3396_v52  ;;  %v1120_v40 = vmax.f32 %v1118_v48, %v3396_v52  ;;  %v3399_v51 = vpop.f32.mrb[66].mxu0 }
 0x221   : > { %5038 = vst [vmem:[#allocation119_spill] sm:$0xff] %v3399_v51  ;;  %v1052_v38 = vmax.f32 %v1050_v11, %v3399_v51  ;;  %v3402_v39 = vpop.f32.mrb[67].mxu0 }
 0x222   : > { %5039 = vst [vmem:[#allocation120_spill] sm:$0xff] %v3402_v39  ;;  %v1121_v47 = vmax.f32 %v1119_v22, %v3402_v39 }
 0x226   : > { %v3405_v46 = vpop.f32.mrb[68].mxu0 }
 0x227   : > { %5040 = vst [vmem:[#allocation121_spill] sm:$0xff] %v3405_v46  ;;  %v1053_v37 = vmax.f32 %v1051_v13, %v3405_v46  ;;  %v3408_v3 = vpop.f32.mrb[69].mxu0 }
 0x228   : > { %5041 = vst [vmem:[#allocation122_spill] sm:$0xff] %v3408_v3  ;;  %v1122_v50 = vmax.f32 %v1120_v40, %v3408_v3  ;;  %v3411_v54 = vpop.f32.mrb[70].mxu0  ;;  %v5152_v3 = vld [vmem:[#allocation116_spill] sm:$0xff] }
 0x229   : > { %5042 = vst [vmem:[#allocation123_spill] sm:$0xff] %v3411_v54  ;;  %v1054_v48 = vmax.f32 %v1052_v38, %v3411_v54  ;;  %v3414_v52 = vpop.f32.mrb[71].mxu0 }
 0x22a   : > { %5043 = vst [vmem:[#allocation124_spill] sm:$0xff] %v3414_v52  ;;  %v1123_v11 = vmax.f32 %v1121_v47, %v3414_v52 }
 0x22e   : > { %v3417_v7 = vpop.f32.mrb[72].mxu0 }
 0x22f   : > { %5044 = vst [vmem:[#allocation125_spill] sm:$0xff] %v3417_v7  ;;  %v1055_v22 = vmax.f32 %v1053_v37, %v3417_v7  ;;  %v3420_v5 = vpop.f32.mrb[73].mxu0  ;;  %v5144_v7 = vld [vmem:[#allocation108_spill] sm:$0xff] }
 0x230   : > { %5045 = vst [vmem:[#allocation126_spill] sm:$0xff] %v3420_v5  ;;  %v1124_v13 = vmax.f32 %v1122_v50, %v3420_v5  ;;  %v3423_v34 = vpop.f32.mrb[74].mxu0  ;;  %v5143_v5 = vld [vmem:[#allocation107_spill] sm:$0xff] }
 0x231   : > { %5046 = vst [vmem:[#allocation127_spill] sm:$0xff] %v3423_v34  ;;  %v1056_v40 = vmax.f32 %v1054_v48, %v3423_v34  ;;  %v3426_v26 = vpop.f32.mrb[75].mxu0  ;;  %v5142_v34 = vld [vmem:[#allocation106_spill] sm:$0xff] }
 0x232   : > { %5047 = vst [vmem:[#allocation128_spill] sm:$0xff] %v3426_v26  ;;  %v1125_v38 = vmax.f32 %v1123_v11, %v3426_v26  ;;  %v5141_v26 = vld [vmem:[#allocation105_spill] sm:$0xff] }
 0x236   : > { %v3429_v1 = vpop.f32.mrb[76].mxu0 }
 0x237   : > { %5048 = vst [vmem:[#allocation129_spill] sm:$0xff] %v3429_v1  ;;  %v1057_v47 = vmax.f32 %v1055_v22, %v3429_v1  ;;  %v3432_v56 = vpop.f32.mrb[77].mxu0  ;;  %v5140_v1 = vld [vmem:[#allocation100_spill] sm:$0xff] }
 0x238   : > { %5049 = vst [vmem:[#allocation130_spill] sm:$0xff] %v3432_v56  ;;  %v1126_v37 = vmax.f32 %v1124_v13, %v3432_v56  ;;  %v3435_v45 = vpop.f32.mrb[78].mxu0 }
 0x239   : > { %5050 = vst [vmem:[#allocation131_spill] sm:$0xff] %v3435_v45  ;;  %v1058_v50 = vmax.f32 %v1056_v40, %v3435_v45  ;;  %v3438_v42 = vpop.f32.mrb[79].mxu0  ;;  %v5056_v40 = vmax.f32 %v3289_v29, %v3293_v36 }
 0x23a   : > { %5051 = vst [vmem:[#allocation132_spill] sm:$0xff] %v3438_v42  ;;  %v1127_v48 = vmax.f32 %v1125_v38, %v3438_v42 }
 0x23e   : > { %v3441_v31 = vpop.f32.mrb[80].mxu0 }
 0x23f   : > { %5052 = vst [vmem:[#allocation133_spill] sm:$0xff] %v3441_v31  ;;  %v1059_v11 = vmax.f32 %v1057_v47, %v3441_v31  ;;  %v3444_v28 = vpop.f32.mrb[81].mxu0 }
 0x240   : > { %5053 = vst [vmem:[#allocation134_spill] sm:$0xff] %v3444_v28  ;;  %v1128_v22 = vmax.f32 %v1126_v37, %v3444_v28  ;;  %v3447_v17 = vpop.f32.mrb[82].mxu0 }
 0x241   : > { %5054 = vst [vmem:[#allocation135_spill] sm:$0xff] %v3447_v17  ;;  %v1061_v13 = vmax.f32 %v1059_v11, %v3130_v14  ;;  %v1060_v15 = vmax.f32 %v1058_v50, %v3447_v17  ;;  %v3451_v56 = vpop.f32.mrb[83].mxu0  ;;  %v5134_v17 = vld [vmem:[#allocation90_spill] sm:$0xff] }
 0x242   : > { %5055 = vst [vmem:[#allocation136_spill] sm:$0xff] %v3451_v56  ;;  %v1143_v38 = vmax.f32 %v5056_v40, %v1128_v22  ;;  %v1129_v42 = vmax.f32 %v1127_v48, %v3451_v56  ;;  %v5133_v56 = vld [vmem:[#allocation89_spill] sm:$0xff] }
 0x243   : > { %v1063_v47 = vmax.f32 %v1061_v13, %v3152_v27  ;;  %v1062_v31 = vmax.f32 %v1060_v15, %v3134_v16  ;;  %v5128_v27 = vld [vmem:[#allocation76_spill] sm:$0xff]  ;;  %v5130_v16 = vld [vmem:[#allocation82_spill] sm:$0xff] }
 0x244   : > { %v1145_v45 = vmax.f32 %v1143_v38, %v1129_v42 }
 0x245   : > { %v1065_v37 = vmax.f32 %v1063_v47, %v3174_v41  ;;  %v1064_v28 = vmax.f32 %v1062_v31, %v3157_v30  ;;  %v5126_v30 = vld [vmem:[#allocation74_spill] sm:$0xff] }
 0x246   : > { %v1147_v11 = vmax.f32 %v1145_v45, %v3311_v32 }
 0x247   : > { %v1067_v50 = vmax.f32 %v1065_v37, %v3196_v55  ;;  %v1066_v14 = vmax.f32 %v1064_v28, %v3179_v44 }
 0x248   : > { %v1148_v29 = vmax.f32 %v3315_v43, %v1147_v11  ;;  %v4879_v43 = vlaneseq }
 0x249   : > { %v1068_v22 = vmax.f32 %v1066_v14, %v3201_v63  ;;  %v1069_v48 = vmax.f32 %v1067_v50, %v3218_v24 }
 0x24a   : > { %v1149_v13 = vmax.f32 %v3331_v21, %v1148_v29  ;;  %v2830_v21 = vmov 1966171168  }
 0x24b   : > { %v1071_v15 = vmax.f32 %v1069_v48, %v3240_v57  ;;  %v1070_v42 = vmax.f32 %v1068_v22, %v3223_v33  ;;  %v5091_v33 = vld [vmem:[#allocation16_spill] sm:$0xff] }
 0x24c   : > { %v1150_v31 = vmax.f32 %v3335_v12, %v1149_v13 }
 0x24d   : > { %v1073_v45 = vmax.f32 %v1071_v15, %v3262_v9  ;;  %v1072_v40 = vmax.f32 %v1070_v42, %v3245_v20  ;;  %v5094_v20 = vld [vmem:[#allocation17_spill] sm:$0xff]  ;;  %v5116_v9 = vld [vmem:[#allocation52_spill] sm:$0xff] }
 0x24e   : > { %v1151_v28 = vmax.f32 %v3351_v8, %v1150_v31 }
 0x24f   : > { %v1075_v38 = vmax.f32 %v1073_v45, %v3284_v49  ;;  %v1074_v14 = vmax.f32 %v1072_v40, %v3267_v53 }
 0x250   : > { %v1152_v47 = vmax.f32 %v3355_v4, %v1151_v28 }
 0x251   : > { %v1077_v37 = vmax.f32 %v1075_v38, %v3309_v35  ;;  %v1076_v11 = vmax.f32 %v1074_v14, %v3291_v19 }
 0x252   : > { %v1153_v50 = vrot.slane %v1152_v47, 4 }
 0x253   : > { %v1078_v29 = vmax.f32 %v1076_v11, %v3313_v25  ;;  %v1079_v22 = vmax.f32 %v1077_v37, %v3329_v23  ;;  %v1163_v11 = vunpack.c.l.s4 %v2830_v21 }
 0x254   : > { %v1154_v15 = vmax.f32 %v1152_v47, %v1153_v50  ;;  %v1166_v47 = vshrl.u32 %v4879_v43, 7  ;;  %v5131_v43 = vld [vmem:[#allocation83_spill] sm:$0xff] }
 0x255   : > { %v1080_v48 = vmax.f32 %v1078_v29, %v3333_v18  ;;  %v1081_v13 = vmax.f32 %v1079_v22, %v3349_v10  ;;  %v1164_v18 = vunpack.c.0.s8 %v1163_v11  ;;  %v5127_v11 = vld [vmem:[#allocation75_spill] sm:$0xff] }
 0x256   : > { %v1155_v45 = vrot.slane %v1154_v15, 2  ;;  %v3496_v21 = vsub.s32 1, %v1166_v47 }
 0x257   : > { %v1082_v42 = vmax.f32 %v1080_v48, %v3353_v6  ;;  %v3485_v50 = vsub.s32 %v1164_v18, %v1166_v47  ;;  %v5120_v18 = vld [vmem:[#allocation60_spill] sm:$0xff] }
 0x258   : > { %v1156_v4 = vmax.f32 %v1154_v15, %v1155_v45  ;;  %5060 = vst [vmem:[#allocation140_spill] sm:$0xff] %v3496_v21  ;;  %v5123_v45 = vld [vmem:[#allocation67_spill] sm:$0xff] }
 0x259   : > { %v1083_v31 = vmax.f32 %v1081_v13, %v1082_v42  ;;  %5057 = vst [vmem:[#allocation137_spill] sm:$0xff] %v3485_v50  ;;  %v3489_v13 = vld [vmem:[#allocation2] sm:$0x3]  ;;  %v3494_v42 = vsub.s32 0, %v1166_v47  ;;  %v5138_v47 = vld [vmem:[#allocation98_spill] sm:$0xff] }
 0x25a   : > { %v1157_v14 = vrot.slane %v1156_v4, 1  ;;  %5058 = vst [vmem:[#allocation138_spill] sm:$0xff] %v3489_v13 }
 0x25b   : > { %v1084_v40 = vrot.slane %v1083_v31, 4  ;;  %5059 = vst [vmem:[#allocation139_spill] sm:$0xff] %v3494_v42 }
 0x25c   : > { %v1158_v23 = vmax.f32 %v1156_v4, %v1157_v14  ;;  %v5135_v14 = vld [vmem:[#allocation91_spill] sm:$0xff] }
 0x25d   : > { %v1085_v28 = vmax.f32 %v1083_v31, %v1084_v40  ;;  %v5125_v31 = vld [vmem:[#allocation73_spill] sm:$0xff] }
 0x25e   : > { %v5129_v40 = vld [vmem:[#allocation81_spill] sm:$0xff] }
 0x25f   : > { %v1086_v38 = vrot.slane %v1085_v28, 2 }
 0x261   : > { %v1087_v8 = vmax.f32 %v1085_v28, %v1086_v38  ;;  %v5124_v28 = vld [vmem:[#allocation68_spill] sm:$0xff] }
 0x262   : > { %v5132_v38 = vld [vmem:[#allocation84_spill] sm:$0xff] }
 0x263   : > { %v1088_v12 = vrot.slane %v1087_v8, 1 }
 0x265   : > { %v1089_v37 = vmax.f32 %v1087_v8, %v1088_v12  ;;  %v5119_v12 = vld [vmem:[#allocation59_spill] sm:$0xff] }
 0x267   : > { %v1161_v29 = vcombine.low %v1089_v37, %v1158_v23  ;;  %v5121_v23 = vld [vmem:[#allocation65_spill] sm:$0xff]  ;;  %v5122_v37 = vld [vmem:[#allocation66_spill] sm:$0xff] }
 0x269   : > { %v1168_v22 = vrot.slane %v1161_v29, %v3485_v50  ;;  %v5139_v29 = vld [vmem:[#allocation99_spill] sm:$0xff] }
 0x26b   : > { %v1175_v48 = vrot.slane %v1168_v22, %v3485_v50  ;;  %v5137_v22 = vld [vmem:[#allocation97_spill] sm:$0xff] }
 0x26d   : > { %v3492_v15 = vmax.f32 %v3489_v13, %v1175_v48  ;;  %v5136_v48 = vld [vmem:[#allocation92_spill] sm:$0xff] }
 0x26f   : > { %v3500_v4 = vrot.slane %v3492_v15, %v3494_v42  ;;  %v3504_v8 = vrot.slane %v3492_v15, %v3496_v21  ;;  %v5117_v42 = vld [vmem:[#allocation57_spill] sm:$0xff]  ;;  %v5118_v21 = vld [vmem:[#allocation58_spill] sm:$0xff] }
 0x271   : > { %v5089_v19 = vsub.f32 %v3094_v58, %v3500_v4  ;;  %v5090_v36 = vsub.f32 %v3096_v59, %v3504_v8  ;;  %v1199_v55 = vsub.f32 %v5091_v33, %v3504_v8  ;;  %v5092_v25 = vsub.f32 %v3098_v60, %v3500_v4  ;;  %v5098_v33 = vld [vmem:[#allocation19_spill] sm:$0xff] }
 0x272   : > { %v5093_v49 = vsub.f32 %v3100_v61, %v3504_v8  ;;  %v1200_v41 = vsub.f32 %v5094_v20, %v3500_v4  ;;  %v5095_v58 = vsub.f32 %v3102_v62, %v3500_v4  ;;  %v5097_v60 = vsub.f32 %v3106_v0, %v3504_v8  ;;  %v5102_v0 = vld [vmem:[#allocation26_spill] sm:$0xff] }
 0x273   : > { %v1320_v24 = vmul.f32 1.442695, %v5089_v19  ;;  %v1322_v35 = vmul.f32 1.442695, %v5090_v36  ;;  %v1324_v57 = vmul.f32 1.442695, %v5092_v25  ;;  %v1202_v61 = vsub.f32 %v5098_v33, %v3500_v4 }
 0x274   : > { %v1326_v6 = vmul.f32 1.442695, %v5093_v49  ;;  %v1328_v59 = vmul.f32 1.442695, %v5095_v58  ;;  %v5096_v36 = vld [vmem:[#allocation18_spill] sm:$0xff]  ;;  %v5099_v49 = vsub.f32 %v3110_v2, %v3500_v4 }
 0x275   : > { %2475 = vpow2.f32 %v1320_v24  ;;  %v1201_v19 = vsub.f32 %v5096_v36, %v3504_v8  ;;  %v1330_v25 = vmul.f32 1.442695, %v5097_v60  ;;  %v5100_v24 = vld [vmem:[#allocation20_spill] sm:$0xff]  ;;  %v1334_v58 = vmul.f32 1.442695, %v1199_v55  ;;  %v5101_v36 = vld [vmem:[#allocation25_spill] sm:$0xff] }
 0x276   : > { %2477 = vpow2.f32 %v1322_v35  ;;  %v1332_v20 = vmul.f32 1.442695, %v5099_v49  ;;  %v1203_v62 = vsub.f32 %v5100_v24, %v3504_v8  ;;  %v1204_v35 = vsub.f32 %v5101_v36, %v3500_v4  ;;  %v5104_v49 = vld [vmem:[#allocation28_spill] sm:$0xff]  ;;  %v5105_v55 = vld [vmem:[#allocation33_spill] sm:$0xff] }
 0x277   : > { %2479 = vpow2.f32 %v1324_v57  ;;  %v1336_v10 = vmul.f32 1.442695, %v1200_v41  ;;  %v1205_v60 = vsub.f32 %v5102_v0, %v3504_v8  ;;  %v1338_v33 = vmul.f32 1.442695, %v1201_v19  ;;  %v5103_v57 = vld [vmem:[#allocation27_spill] sm:$0xff] }
 0x278   : > { %2481 = vpow2.f32 %v1326_v6  ;;  %v1206_v44 = vsub.f32 %v5103_v57, %v3500_v4  ;;  %v1340_v2 = vmul.f32 1.442695, %v1202_v61  ;;  %v1207_v24 = vsub.f32 %v5104_v49, %v3504_v8 }
 0x279   : > { %2483 = vpow2.f32 %v1328_v59  ;;  %v1342_v6 = vmul.f32 1.442695, %v1203_v62  ;;  %v1208_v36 = vsub.f32 %v5105_v55, %v3500_v4  ;;  %v1344_v41 = vmul.f32 1.442695, %v1204_v35  ;;  %v5106_v59 = vld [vmem:[#allocation34_spill] sm:$0xff]  ;;  %v5108_v62 = vld [vmem:[#allocation36_spill] sm:$0xff] }
 0x27a   : > { %2485 = vpow2.f32 %v1330_v25  ;;  %v1209_v0 = vsub.f32 %v5106_v59, %v3504_v8  ;;  %v1346_v19 = vmul.f32 1.442695, %v1205_v60  ;;  %v1348_v57 = vmul.f32 1.442695, %v1206_v44  ;;  %v5109_v55 = vld [vmem:[#allocation41_spill] sm:$0xff] }
 0x27b   : > { %2487 = vpow2.f32 %v1332_v20  ;;  %v5107_v20 = vld [vmem:[#allocation35_spill] sm:$0xff]  ;;  %v1352_v60 = vmul.f32 1.442695, %v1208_v36 }
 0x27c   : > { %2489 = vpow2.f32 %v1334_v58  ;;  %v1210_v61 = vsub.f32 %v5107_v20, %v3500_v4  ;;  %v1211_v58 = vsub.f32 %v5108_v62, %v3504_v8  ;;  %v5110_v20 = vld [vmem:[#allocation42_spill] sm:$0xff]  ;;  %v1354_v44 = vmul.f32 1.442695, %v1209_v0  ;;  %v5111_v62 = vld [vmem:[#allocation43_spill] sm:$0xff] }
 0x27d   : > { %2491 = vpow2.f32 %v1336_v10  ;;  %v1350_v10 = vmul.f32 1.442695, %v1207_v24  ;;  %v5114_v0 = vld [vmem:[#allocation50_spill] sm:$0xff] }
 0x27e   : > { %2493 = vpow2.f32 %v1338_v33  ;;  %v1212_v33 = vsub.f32 %v5109_v55, %v3500_v4  ;;  %v1356_v24 = vmul.f32 1.442695, %v1210_v61  ;;  %v5112_v55 = vld [vmem:[#allocation44_spill] sm:$0xff]  ;;  %v1358_v36 = vmul.f32 1.442695, %v1211_v58  ;;  %v5115_v61 = vld [vmem:[#allocation51_spill] sm:$0xff] }
 0x27f   : > { %v3687_v25 = vpop.eup %2475  ;;  %2495 = vpow2.f32 %v1340_v2  ;;  %v1213_v2 = vsub.f32 %v5110_v20, %v3504_v8  ;;  %v5113_v20 = vld [vmem:[#allocation49_spill] sm:$0xff]  ;;  %v1217_v53 = vsub.f32 %v5114_v0, %v3504_v8  ;;  %v1221_v0 = vsub.f32 %v5118_v21, %v3504_v8 }
 0x280   : > { %v3691_v49 = vpop.eup %2477  ;;  %2497 = vpow2.f32 %v1342_v6  ;;  %v1214_v6 = vsub.f32 %v5111_v62, %v3500_v4  ;;  %v1360_v50 = vmul.f32 1.442695, %v1212_v33  ;;  %v1225_v21 = vsub.f32 %v5122_v37, %v3504_v8 }
 0x281   : > { %v3695_v35 = vpop.eup %2479  ;;  %2499 = vpow2.f32 %v1344_v41  ;;  %v1215_v41 = vsub.f32 %v5112_v55, %v3504_v8  ;;  %v1219_v55 = vsub.f32 %v5116_v9, %v3504_v8  ;;  %v1362_v58 = vmul.f32 1.442695, %v1213_v2 }
 0x282   : > { %v3699_v59 = vpop.eup %2481  ;;  %2501 = vpow2.f32 %v1346_v19  ;;  %v1216_v19 = vsub.f32 %v5113_v20, %v3500_v4  ;;  %v1220_v20 = vsub.f32 %v5117_v42, %v3500_v4  ;;  %v1364_v33 = vmul.f32 1.442695, %v1214_v6 }
 0x283   : > { %v3703_v63 = vpop.eup %2483  ;;  %2503 = vpow2.f32 %v1348_v57  ;;  %v1218_v57 = vsub.f32 %v5115_v61, %v3500_v4  ;;  %v1222_v61 = vsub.f32 %v5119_v12, %v3500_v4  ;;  %v1223_v9 = vsub.f32 %v5120_v18, %v3504_v8 }
 0x284   : > { %v3707_v32 = vpop.eup %2485  ;;  %2505 = vpow2.f32 %v1350_v10  ;;  %v1366_v2 = vmul.f32 1.442695, %v1215_v41  ;;  %v1224_v42 = vsub.f32 %v5121_v23, %v3500_v4  ;;  %v1368_v6 = vmul.f32 1.442695, %v1216_v19 }
 0x285   : > { %v3711_v13 = vpop.eup %2487  ;;  %2507 = vpow2.f32 %v1352_v60  ;;  %v1226_v12 = vsub.f32 %v5123_v45, %v3500_v4  ;;  %v1227_v18 = vsub.f32 %v5124_v28, %v3504_v8  ;;  %v1370_v41 = vmul.f32 1.442695, %v1217_v53 }
 0x286   : > { %v3717_v62 = vpop.eup %2489  ;;  %2509 = vpow2.f32 %v1354_v44  ;;  %v1228_v23 = vsub.f32 %v5125_v31, %v3500_v4  ;;  %v1229_v37 = vsub.f32 %v5126_v30, %v3504_v8  ;;  %v1230_v45 = vsub.f32 %v5127_v11, %v3500_v4 }
 0x287   : > { %v3723_v10 = vpop.eup %2491  ;;  %2511 = vpow2.f32 %v1356_v24  ;;  %v1231_v28 = vsub.f32 %v5128_v27, %v3504_v8  ;;  %v1374_v53 = vmul.f32 1.442695, %v1219_v55  ;;  %v1232_v31 = vsub.f32 %v5129_v40, %v3500_v4 }
 0x288   : > { %v3729_v60 = vpop.eup %2493  ;;  %2513 = vpow2.f32 %v1358_v36  ;;  %v1233_v30 = vsub.f32 %v5130_v16, %v3504_v8  ;;  %v1234_v11 = vsub.f32 %v5131_v43, %v3500_v4  ;;  %v1235_v27 = vsub.f32 %v5132_v38, %v3504_v8 }
 0x289   : > { %v3735_v44 = vpop.eup %2495  ;;  %2515 = vpow2.f32 %v1360_v50  ;;  %v1372_v50 = vmul.f32 1.442695, %v1218_v57  ;;  %v1376_v57 = vmul.f32 1.442695, %v1220_v20  ;;  %v1378_v55 = vmul.f32 1.442695, %v1221_v0 }
 0x28a   : > { %v3741_v24 = vpop.eup %2497  ;;  %2517 = vpow2.f32 %v1362_v58  ;;  %v1236_v40 = vsub.f32 %v5133_v56, %v3500_v4  ;;  %v1237_v16 = vsub.f32 %v5134_v17, %v3504_v8  ;;  %v1380_v20 = vmul.f32 1.442695, %v1222_v61 }
 0x28b   : > { %v3747_v36 = vpop.eup %2499  ;;  %2519 = vpow2.f32 %v1364_v33  ;;  %v1238_v43 = vsub.f32 %v5135_v14, %v3500_v4  ;;  %v1239_v38 = vsub.f32 %v5136_v48, %v3504_v8  ;;  %v1382_v0 = vmul.f32 1.442695, %v1223_v9 }
 0x28c   : > { %v3753_v19 = vpop.eup %2501  ;;  %2521 = vpow2.f32 %v1366_v2  ;;  %v1240_v56 = vsub.f32 %v5137_v22, %v3500_v4  ;;  %v1241_v17 = vsub.f32 %v5138_v47, %v3504_v8  ;;  %v1384_v61 = vmul.f32 1.442695, %v1224_v42 }
 0x28d   : > { %v3759_v58 = vpop.eup %2503  ;;  %2523 = vpow2.f32 %v1368_v6  ;;  %v1242_v14 = vsub.f32 %v5139_v29, %v3500_v4  ;;  %v1243_v48 = vsub.f32 %v5140_v1, %v3504_v8  ;;  %v1386_v9 = vmul.f32 1.442695, %v1225_v21 }
 0x28e   : > { %v3765_v33 = vpop.eup %2505  ;;  %2525 = vpow2.f32 %v1370_v41  ;;  %v1244_v22 = vsub.f32 %v5141_v26, %v3500_v4  ;;  %v1245_v47 = vsub.f32 %v5142_v34, %v3504_v8  ;;  %v1388_v42 = vmul.f32 1.442695, %v1226_v12 }
 0x28f   : > { %v3771_v2 = vpop.eup %2507  ;;  %2527 = vpow2.f32 %v1372_v50  ;;  %v1246_v29 = vsub.f32 %v5143_v5, %v3500_v4  ;;  %v1247_v1 = vsub.f32 %v5144_v7, %v3504_v8  ;;  %v1390_v21 = vmul.f32 1.442695, %v1227_v18 }
 0x290   : > { %v3777_v6 = vpop.eup %2509  ;;  %2529 = vpow2.f32 %v1374_v53  ;;  %v1392_v12 = vmul.f32 1.442695, %v1228_v23  ;;  %v1394_v18 = vmul.f32 1.442695, %v1229_v37  ;;  %v1396_v23 = vmul.f32 1.442695, %v1230_v45 }
 0x291   : > { %v3783_v41 = vpop.eup %2511  ;;  %2531 = vpow2.f32 %v1376_v57  ;;  %v1398_v37 = vmul.f32 1.442695, %v1231_v28  ;;  %v1400_v46 = vmul.f32 1.442695, %v1232_v31  ;;  %v1402_v26 = vmul.f32 1.442695, %v1233_v30 }
 0x292   : > { %v3789_v50 = vpop.eup %2513  ;;  %2533 = vpow2.f32 %v1378_v55  ;;  %v1404_v39 = vmul.f32 1.442695, %v1234_v11  ;;  %v1406_v45 = vmul.f32 1.442695, %v1235_v27  ;;  %v1410_v34 = vmul.f32 1.442695, %v1237_v16 }
 0x293   : > { %v3795_v53 = vpop.eup %2515  ;;  %2535 = vpow2.f32 %v1380_v20  ;;  %v1412_v5 = vmul.f32 1.442695, %v1238_v43  ;;  %v1414_v54 = vmul.f32 1.442695, %v1239_v38  ;;  %v1416_v7 = vmul.f32 1.442695, %v1240_v56 }
 0x294   : > { %v3801_v57 = vpop.eup %2517  ;;  %2537 = vpow2.f32 %v1382_v0  ;;  %v1418_v28 = vmul.f32 1.442695, %v1241_v17  ;;  %v1422_v31 = vmul.f32 1.442695, %v1243_v48  ;;  %v3841_v11 = vmul.f32 1.442695, %v1244_v22 }
 0x295   : > { %v3807_v55 = vpop.eup %2519  ;;  %2539 = vpow2.f32 %v1384_v61  ;;  %v3843_v27 = vmul.f32 1.442695, %v1245_v47  ;;  %v1576_v43 = vadd.f32 %v3695_v35, %v3687_v25  ;;  %v1645_v38 = vadd.f32 %v3699_v59, %v3691_v49 }
 0x296   : > { %v3813_v20 = vpop.eup %2521  ;;  %2541 = vpow2.f32 %v1386_v9  ;;  %v5153_v56 = vlaneseq  ;;  %v1715_v48 = vpack.c.bf16 %v3699_v59, %v3691_v49  ;;  %v1714_v22 = vpack.c.bf16 %v3695_v35, %v3687_v25 }
 0x297   : > { %v3819_v0 = vpop.eup %2523  ;;  %2543 = vpow2.f32 %v1388_v42  ;;  %v1408_v42 = vmul.f32 1.442695, %v1236_v40  ;;  %v3845_v40 = vmul.f32 1.442695, %v1246_v29  ;;  %v1577_v29 = vadd.f32 %v3703_v63, %v1576_v43 }
 0x298   : > { %v3825_v61 = vpop.eup %2525  ;;  %2545 = vpow2.f32 %v1390_v21  ;;  %vm3854_vm3 = vcmp.lt.s32.totalorder %v5153_v56, 256  ;;  %1843 = vmatprep.subr.bf16.mxu1 %v1715_v48  ;;  %v1716_v49 = vpack.c.bf16 %v3711_v13, %v3703_v63  ;;  %v1719_v25 = vpack.c.bf16 %v3741_v24, %v3729_v60 }
 0x299   : > { %v3831_v9 = vpop.eup %2527  ;;  %2547 = vpow2.f32 %v1392_v12  ;;  %v1420_v12 = vmul.f32 1.442695, %v1242_v14  ;;  %v3860_v14 = vmul.f32 1.442695, %v1247_v1  ;;  %1937 = vst.msk [vmem:[#allocation2] sm:$0x3] %vm3854_vm3, %v3492_v15  ;;  %v1718_v35 = vpack.c.bf16 %v3735_v44, %v3723_v10  ;;  %1844 = vmatpush1.bf16.msra.mxu1 %v1714_v22 }
 0x29a   : > { %v3833_v52 = vpop.eup %2529  ;;  %2549 = vpow2.f32 %v1394_v18  ;;  %v1578_v18 = vadd.f32 %v3711_v13, %v1577_v29  ;;  %v1720_v63 = vpack.c.bf16 %v3759_v58, %v3747_v36  ;;  %v1726_v48 = vpack.c.bf16 %v3831_v9, %v3819_v0 }
 0x29b   : > { %v3835_v51 = vpop.eup %2531  ;;  %2551 = vpow2.f32 %v1396_v23  ;;  %v1721_v23 = vpack.c.bf16 %v3765_v33, %v3753_v19  ;;  %v1727_v56 = vpack.c.bf16 %v3833_v52, %v3825_v61 }
 0x29c   : > { %v3837_v21 = vpop.eup %2533  ;;  %2553 = vpow2.f32 %v1398_v37 }
 0x29d   : > { %v3839_v30 = vpop.eup %2535  ;;  %2555 = vpow2.f32 %v1400_v46 }
 0x29e   : > { %v3847_v16 = vpop.eup %2537  ;;  %2557 = vpow2.f32 %v1402_v26  ;;  %v1646_v26 = vadd.f32 %v3707_v32, %v1645_v38  ;;  %v1724_v38 = vpack.c.bf16 %v3807_v55, %v3795_v53  ;;  %v1728_v29 = vpack.c.bf16 %v3839_v30, %v3835_v51 }
 0x29f   : > { %v3858_v46 = vpop.eup %2539  ;;  %2559 = vpow2.f32 %v1404_v39  ;;  %v1717_v39 = vpack.c.bf16 %v3717_v62, %v3707_v32 }
 0x2a0   : > { %v3869_v47 = vpop.eup %2541  ;;  %2561 = vpow2.f32 %v1406_v45  ;;  %v1647_v32 = vadd.f32 %v3717_v62, %v1646_v26  ;;  %v1723_v45 = vpack.c.bf16 %v3789_v50, %v3777_v6  ;;  %v1579_v62 = vadd.f32 %v3723_v10, %v1578_v18 }
 0x2a1   : > { %v3875_v1 = vpop.eup %2543  ;;  %2563 = vpow2.f32 %v1408_v42  ;;  %1845 = vmatprep.subr.bf16.mxu1 %v1717_v39 }
 0x2a2   : > { %v3883_v59 = vpop.eup %2545  ;;  %2565 = vpow2.f32 %v1410_v34  ;;  %v1722_v34 = vpack.c.bf16 %v3783_v41, %v3771_v2  ;;  %v1648_v42 = vadd.f32 %v3729_v60, %v1647_v32  ;;  %v1580_v10 = vadd.f32 %v3735_v44, %v1579_v62  ;;  %1846 = vmatpush1.bf16.msra.mxu1 %v1716_v49  ;;  %v5158_v62 = vld [vmem:[#allocation110_spill] sm:$0xff] }
 0x2a3   : > { %v3889_v37 = vpop.eup %2547  ;;  %2567 = vpow2.f32 %v1412_v5  ;;  %v1725_v5 = vpack.c.bf16 %v3813_v20, %v3801_v57  ;;  %1847 = vmatprep.subr.bf16.mxu1 %v1719_v25  ;;  %v5156_v25 = vld [vmem:[#allocation109_spill] sm:$0xff] }
 0x2a4   : > { %v3897_v13 = vpop.eup %2549  ;;  %2569 = vpow2.f32 %v1414_v54  ;;  %v1649_v60 = vadd.f32 %v3741_v24, %v1648_v42  ;;  %v1581_v24 = vadd.f32 %v3747_v36, %v1580_v10  ;;  %v5157_v18 = vsub.f32 %v5156_v25, %v3500_v4  ;;  %v5160_v25 = vld [vmem:[#allocation117_spill] sm:$0xff] }
 0x2a5   : > { %v3903_v43 = vpop.eup %2551  ;;  %2571 = vpow2.f32 %v1416_v7  ;;  %v1729_v7 = vpack.c.bf16 %v3847_v16, %v3837_v21  ;;  %v5159_v42 = vsub.f32 %v5158_v62, %v3504_v8  ;;  %v5161_v62 = vld [vmem:[#allocation111_spill] sm:$0xff] }
 0x2a6   : > { %v3911_v54 = vpop.eup %2553  ;;  %2573 = vpow2.f32 %v1418_v28  ;;  %v1650_v39 = vadd.f32 %v3753_v19, %v1649_v60  ;;  %v1432_v32 = vmul.f32 1.442695, %v5157_v18  ;;  %v1582_v19 = vadd.f32 %v3759_v58, %v1581_v24  ;;  %1848 = vmatpush1.bf16.msra.mxu1 %v1718_v35 }
 0x2a7   : > { %v3917_v22 = vpop.eup %2555  ;;  %2575 = vpow2.f32 %v1420_v12  ;;  %v1434_v28 = vmul.f32 1.442695, %v5159_v42  ;;  %v1256_v18 = vsub.f32 %v5160_v25, %v3500_v4  ;;  %v5162_v42 = vsub.f32 %v5161_v62, %v3500_v4  ;;  %1849 = vmatprep.subr.bf16.mxu1 %v1721_v23  ;;  %v5165_v62 = vld [vmem:[#allocation118_spill] sm:$0xff] }
 0x2a8   : > { %v3925_v44 = vpop.eup %2557  ;;  %2577 = vpow2.f32 %v1422_v31  ;;  %v1651_v10 = vadd.f32 %v3765_v33, %v1650_v39  ;;  %v1583_v39 = vadd.f32 %v3771_v2, %v1582_v19  ;;  %v1257_v23 = vsub.f32 %v5165_v62, %v3504_v8  ;;  %v5168_v12 = vld [vmem:[#allocation114_spill] sm:$0xff] }
 0x2a9   : > { %v3931_v49 = vpop.eup %2559  ;;  %2579 = vpow2.f32 %v3841_v11  ;;  %v1436_v36 = vmul.f32 1.442695, %v5162_v42  ;;  %v5166_v42 = vld [vmem:[#allocation113_spill] sm:$0xff] }
 0x2aa   : > { %v3942_v31 = vpop.eup %2561  ;;  %2581 = vpow2.f32 %v3843_v27  ;;  %v5163_v27 = vld [vmem:[#allocation112_spill] sm:$0xff]  ;;  %v5167_v11 = vsub.f32 %v5166_v42, %v3500_v4  ;;  %v1584_v19 = vadd.f32 %v3783_v41, %v1583_v39  ;;  %1850 = vmatpush1.bf16.msra.mxu1 %v1720_v63  ;;  %v5172_v63 = vsub.f32 %v5152_v3, %v3504_v8 }
 0x2ab   : > { %v3949_v60 = vpop.eup %2563  ;;  %2583 = vpow2.f32 %v3845_v40  ;;  %v5164_v35 = vsub.f32 %v5163_v27, %v3504_v8  ;;  %v1652_v40 = vadd.f32 %v3777_v6, %v1651_v10  ;;  %1851 = vmatprep.subr.bf16.mxu1 %v1723_v45  ;;  %v1448_v6 = vmul.f32 1.442695, %v1256_v18  ;;  %v5173_v18 = vld [vmem:[#allocation119_spill] sm:$0xff]  ;;  %v5175_v41 = vld [vmem:[#allocation120_spill] sm:$0xff] }
 0x2ac   : > { %v3959_v33 = vpop.eup %2565  ;;  %2585 = vpow2.f32 %v3860_v14  ;;  %v1440_v58 = vmul.f32 1.442695, %v5167_v11  ;;  %v5169_v14 = vsub.f32 %v5168_v12, %v3504_v8  ;;  %v5170_v11 = vld [vmem:[#allocation115_spill] sm:$0xff] }
 0x2ad   : > { %v1438_v24 = vmul.f32 1.442695, %v5164_v35  ;;  %v3967_v25 = vpop.eup %2567  ;;  %2587 = vpow2.f32 %v1432_v32  ;;  %v1653_v10 = vadd.f32 %v3789_v50, %v1652_v40  ;;  %v5171_v62 = vsub.f32 %v5170_v11, %v3500_v4 }
 0x2ae   : > { %v1442_v26 = vmul.f32 1.442695, %v5169_v14  ;;  %v3977_v27 = vpop.eup %2569  ;;  %2589 = vpow2.f32 %v1434_v28  ;;  %v1736_v32 = vpack.c.bf16 %v3967_v25, %v3949_v60  ;;  %v1446_v40 = vmul.f32 1.442695, %v5172_v63  ;;  %v2471_v14 = vld [vmem:[%s3008_s11 + $0x4] ss:$16 sps:$4 sm:$0xff]   ;;  %1852 = vmatpush1.bf16.msra.mxu1 %v1722_v34 }
 0x2af   : > { %v3983_v35 = vpop.eup %2571  ;;  %2591 = vpow2.f32 %v1436_v36  ;;  %v1444_v12 = vmul.f32 1.442695, %v5171_v62  ;;  %v1737_v28 = vpack.c.bf16 %v3977_v27, %v3959_v33  ;;  %v1585_v36 = vadd.f32 %v3795_v53, %v1584_v19  ;;  %1875 = vmatprep.mubr.bf16.mxu1 %v2471_v14  ;;  %1853 = vmatprep.subr.bf16.mxu1 %v1725_v5  ;;  %v5179_v5 = vld [vmem:[#allocation122_spill] sm:$0xff]  ;;  %v5183_v53 = vld [vmem:[#allocation124_spill] sm:$0xff] }
 0x2b0   : > { %v3993_v39 = vpop.eup %2573  ;;  %2593 = vpow2.f32 %v1438_v24  ;;  %v1654_v42 = vadd.f32 %v3801_v57, %v1653_v10  ;;  %v1450_v50 = vmul.f32 1.442695, %v1257_v23  ;;  %v5176_v34 = vsub.f32 %v5175_v41, %v3504_v8  ;;  %v5181_v41 = vld [vmem:[#allocation123_spill] sm:$0xff] }
 0x2b1   : > { %v4001_v11 = vpop.eup %2575  ;;  %2595 = vpow2.f32 %v1440_v58  ;;  %v1586_v62 = vadd.f32 %v3807_v55, %v1585_v36  ;;  %v5174_v58 = vsub.f32 %v5173_v18, %v3500_v4  ;;  %v5180_v14 = vsub.f32 %v5179_v5, %v3504_v8  ;;  %v5185_v5 = vld [vmem:[#allocation125_spill] sm:$0xff] }
 0x2b2   : > { %v4003_v45 = vpop.eup %2577  ;;  %2597 = vpow2.f32 %v1442_v26  ;;  %v1655_v24 = vadd.f32 %v3813_v20, %v1654_v42  ;;  %v1738_v3 = vpack.c.bf16 %v4001_v11, %v3983_v35  ;;  %v1454_v10 = vmul.f32 1.442695, %v5176_v34  ;;  %v5177_v42 = vld [vmem:[#allocation121_spill] sm:$0xff]  ;;  %1854 = vmatpush1.bf16.msra.mxu1 %v1724_v38 }
 0x2b3   : > { %v4012_v19 = vpop.eup %2579  ;;  %2599 = vpow2.f32 %v1444_v12  ;;  %v1452_v23 = vmul.f32 1.442695, %v5174_v58  ;;  %v1739_v26 = vpack.c.bf16 %v4003_v45, %v3993_v39  ;;  %v1587_v12 = vadd.f32 %v3819_v0, %v1586_v62  ;;  %1855 = vmatprep.subr.bf16.mxu1 %v1727_v56  ;;  %v5187_v56 = vld [vmem:[#allocation126_spill] sm:$0xff]  ;;  %v5191_v0 = vld [vmem:[#allocation128_spill] sm:$0xff] }
 0x2b4   : > { %v4022_v2 = vpop.eup %2581  ;;  %2601 = vpow2.f32 %v1446_v40  ;;  %v1656_v63 = vadd.f32 %v3825_v61, %v1655_v24  ;;  %v5178_v57 = vsub.f32 %v5177_v42, %v3500_v4  ;;  %v1458_v18 = vmul.f32 1.442695, %v5180_v14 }
 0x2b5   : > { %v4029_v36 = vpop.eup %2583  ;;  %2603 = vpow2.f32 %v1448_v6  ;;  %v1588_v58 = vadd.f32 %v3831_v9, %v1587_v12  ;;  %v5182_v34 = vsub.f32 %v5181_v41, %v3500_v4  ;;  %v5184_v55 = vsub.f32 %v5183_v53, %v3504_v8  ;;  %v5189_v53 = vld [vmem:[#allocation127_spill] sm:$0xff] }
 0x2b6   : > { %v1456_v20 = vmul.f32 1.442695, %v5178_v57  ;;  %v4037_v40 = vpop.eup %2585  ;;  %2605 = vpow2.f32 %v1450_v50  ;;  %v1657_v62 = vadd.f32 %v3833_v52, %v1656_v63  ;;  %v1740_v6 = vpack.c.bf16 %v4029_v36, %v4012_v19  ;;  %1856 = vmatpush1.bf16.msra.mxu1 %v1726_v48 }
 0x2b7   : > { %v4046_v24 = vpop.eup %2587  ;;  %2607 = vpow2.f32 %v1452_v23  ;;  %v1460_v42 = vmul.f32 1.442695, %v5182_v34  ;;  %v1741_v50 = vpack.c.bf16 %v4037_v40, %v4022_v2  ;;  %v1462_v38 = vmul.f32 1.442695, %v5184_v55  ;;  %1857 = vmatprep.subr.bf16.mxu1 %v1729_v7  ;;  %v5195_v7 = vld [vmem:[#allocation130_spill] sm:$0xff] }
 0x2b8   : > { %v4056_v12 = vpop.eup %2589  ;;  %2609 = vpow2.f32 %v1454_v10  ;;  %v1589_v23 = vadd.f32 %v3835_v51, %v1588_v58  ;;  %v1658_v63 = vadd.f32 %v3837_v21, %v1657_v62  ;;  %v5186_v52 = vsub.f32 %v5185_v5, %v3500_v4  ;;  %v5200_v51 = vld [vmem:[#allocation132_spill] sm:$0xff] }
 0x2b9   : > { %v4063_v57 = vpop.eup %2591  ;;  %2611 = vpow2.f32 %v1456_v20  ;;  %v5188_v14 = vsub.f32 %v5187_v56, %v3504_v8  ;;  %v5190_v55 = vsub.f32 %v5189_v53, %v3500_v4  ;;  %v5192_v9 = vsub.f32 %v5191_v0, %v3504_v8  ;;  %v5193_v56 = vld [vmem:[#allocation129_spill] sm:$0xff]  ;;  %v5197_v0 = vld [vmem:[#allocation131_spill] sm:$0xff] }
 0x2ba   : > { %v1464_v61 = vmul.f32 1.442695, %v5186_v52  ;;  %v4071_v10 = vpop.eup %2593  ;;  %2613 = vpow2.f32 %v1458_v18  ;;  %v1590_v34 = vadd.f32 %v3839_v30, %v1589_v23  ;;  %v1659_v58 = vadd.f32 %v3847_v16, %v1658_v63  ;;  %1858 = vmatpush1.bf16.msra.mxu1 %v1728_v29 }
 0x2bb   : > { %v1466_v41 = vmul.f32 1.442695, %v5188_v14  ;;  %v1742_v20 = vpack.c.bf16 %v4063_v57, %v4046_v24  ;;  %v4080_v62 = vpop.eup %2595  ;;  %2615 = vpow2.f32 %v1460_v42  ;;  %v1468_v5 = vmul.f32 1.442695, %v5190_v55 }
 0x2bc   : > { %v1743_v18 = vpack.c.bf16 %v4071_v10, %v4056_v12  ;;  %v4090_v23 = vpop.eup %2597  ;;  %2617 = vpow2.f32 %v1462_v38  ;;  %v1470_v48 = vmul.f32 1.442695, %v5192_v9  ;;  %v1591_v42 = vadd.f32 %v3858_v46, %v1590_v34 }
 0x2bd   : > { %v1660_v63 = vadd.f32 %v3869_v47, %v1659_v58  ;;  %v4097_v52 = vpop.eup %2599  ;;  %2619 = vpow2.f32 %v1464_v61  ;;  %v5194_v21 = vsub.f32 %v5193_v56, %v3500_v4  ;;  %v5196_v14 = vsub.f32 %v5195_v7, %v3504_v8 }
 0x2be   : > { %v4105_v38 = vpop.eup %2601  ;;  %2621 = vpow2.f32 %v1466_v41  ;;  %v1592_v55 = vadd.f32 %v3875_v1, %v1591_v42  ;;  %v1744_v61 = vpack.c.bf16 %v4097_v52, %v4080_v62  ;;  %v5198_v9 = vsub.f32 %v5197_v0, %v3500_v4  ;;  %v5204_v0 = vld [vmem:[#allocation134_spill] sm:$0xff] }
 0x2bf   : > { %v1472_v16 = vmul.f32 1.442695, %v5194_v21  ;;  %v1474_v53 = vmul.f32 1.442695, %v5196_v14  ;;  %v1661_v34 = vadd.f32 %v3883_v59, %v1660_v63  ;;  %v4114_v58 = vpop.eup %2603  ;;  %2623 = vpow2.f32 %v1468_v5  ;;  %v5202_v14 = vld [vmem:[#allocation133_spill] sm:$0xff] }
 0x2c0   : > { %v1476_v56 = vmul.f32 1.442695, %v5198_v9  ;;  %v5199_v41 = vpack.c.bf16 %v3883_v59, %v3869_v47  ;;  %v1745_v42 = vpack.c.bf16 %v4105_v38, %v4090_v23  ;;  %v4124_v63 = vpop.eup %2605  ;;  %2625 = vpow2.f32 %v1470_v48 }
 0x2c1   : > { %v5201_v30 = vsub.f32 %v5200_v51, %v3504_v8  ;;  %v1593_v5 = vadd.f32 %v3889_v37, %v1592_v55  ;;  %v1662_v21 = vadd.f32 %v3897_v13, %v1661_v34  ;;  %v4131_v7 = vpop.eup %2607  ;;  %2627 = vpow2.f32 %v1472_v16 }
 0x2c2   : > { %1859 = vmatprep.subr.bf16.mxu1 %v5199_v41  ;;  %v5203_v47 = vsub.f32 %v5202_v14, %v3500_v4  ;;  %v5205_v9 = vsub.f32 %v5204_v0, %v3504_v8  ;;  %v4139_v48 = vpop.eup %2609  ;;  %2629 = vpow2.f32 %v1474_v53  ;;  %v5206_v34 = vpack.c.bf16 %v3875_v1, %v3858_v46  ;;  %v5207_v14 = vld [vmem:[#allocation135_spill] sm:$0xff]  ;;  %v5210_v46 = vld [vmem:[#allocation136_spill] sm:$0xff] }
 0x2c3   : > { %v1478_v29 = vmul.f32 1.442695, %v5201_v30  ;;  %v1594_v51 = vadd.f32 %v3903_v43, %v1593_v5  ;;  %v1663_v55 = vadd.f32 %v3911_v54, %v1662_v21  ;;  %v4148_v30 = vpop.eup %2611  ;;  %2631 = vpow2.f32 %v1476_v56 }
 0x2c4   : > { %v1480_v59 = vmul.f32 1.442695, %v5203_v47  ;;  %v1482_v41 = vmul.f32 1.442695, %v5205_v9  ;;  %1860 = vmatpush1.bf16.msra.mxu1 %v5206_v34  ;;  %v5208_v47 = vsub.f32 %v5207_v14, %v3500_v4  ;;  %v5209_v53 = vpack.c.bf16 %v3911_v54, %v3897_v13  ;;  %v4158_v21 = vpop.eup %2613 }
 0x2c5   : > { %2633 = vpow2.f32 %v1478_v29  ;;  %v5211_v1 = vsub.f32 %v5210_v46, %v3504_v8  ;;  %v1595_v56 = vadd.f32 %v3917_v22, %v1594_v51  ;;  %v1664_v34 = vadd.f32 %v3925_v44, %v1663_v55  ;;  %v4165_v14 = vpop.eup %2615 }
 0x2c6   : > { %v1484_v0 = vmul.f32 1.442695, %v5208_v47  ;;  %1861 = vmatprep.subr.bf16.mxu1 %v5209_v53  ;;  %2635 = vpow2.f32 %v1480_v59  ;;  %v5212_v47 = vld [vmem:[#allocation21_spill] sm:$0xff]  ;;  %v5214_v53 = vld [vmem:[#allocation22_spill] sm:$0xff]  ;;  %v4173_v29 = vpop.eup %2617  ;;  %v5216_v55 = vpack.c.bf16 %v3903_v43, %v3889_v37  ;;  %v5220_v37 = vld [vmem:[#allocation24_spill] sm:$0xff] }
 0x2c7   : > { %v1486_v9 = vmul.f32 1.442695, %v5211_v1  ;;  %v5213_v13 = vsub.f32 %v5212_v47, %v3500_v4  ;;  %v5215_v16 = vsub.f32 %v5214_v53, %v3504_v8  ;;  %2637 = vpow2.f32 %v1482_v41  ;;  %v4182_v1 = vpop.eup %2619  ;;  %v5217_v47 = vld [vmem:[#allocation23_spill] sm:$0xff] }
 0x2c8   : > { %v1596_v46 = vadd.f32 %v3931_v49, %v1595_v56  ;;  %v1665_v51 = vadd.f32 %v3942_v31, %v1664_v34  ;;  %1862 = vmatpush1.bf16.msra.mxu1 %v5216_v55  ;;  %2639 = vpow2.f32 %v1484_v0  ;;  %v5219_v41 = vpack.c.bf16 %v3942_v31, %v3925_v44  ;;  %v4192_v34 = vpop.eup %2621 }
 0x2c9   : > { %v1488_v54 = vmul.f32 1.442695, %v5213_v13  ;;  %v1490_v5 = vmul.f32 1.442695, %v5215_v16  ;;  %v5218_v16 = vsub.f32 %v5217_v47, %v3500_v4  ;;  %2641 = vpow2.f32 %v1486_v9  ;;  %v4199_v47 = vpop.eup %2623 }
 0x2ca   : > { %1863 = vmatprep.subr.bf16.mxu1 %v5219_v41  ;;  %v5221_v43 = vsub.f32 %v5220_v37, %v3504_v8  ;;  %v1597_v0 = vadd.f32 %v3949_v60, %v1596_v46  ;;  %v1666_v55 = vadd.f32 %v3959_v33, %v1665_v51  ;;  %v5224_v41 = vld [vmem:[#allocation30_spill] sm:$0xff]  ;;  %v4207_v9 = vpop.eup %2625  ;;  %v5226_v51 = vpack.c.bf16 %v3931_v49, %v3917_v22  ;;  %v5229_v22 = vld [vmem:[#allocation32_spill] sm:$0xff] }
 0x2cb   : > { %v1492_v13 = vmul.f32 1.442695, %v5218_v16  ;;  %2643 = vpow2.f32 %v1488_v54  ;;  %v5222_v16 = vld [vmem:[#allocation29_spill] sm:$0xff]  ;;  %v5225_v59 = vsub.f32 %v5224_v41, %v3504_v8  ;;  %v5230_v49 = vsub.f32 %v5229_v22, %v3504_v8  ;;  %v5237_v60 = vld [vmem:[#allocation40_spill] sm:$0xff] }
 0x2cc   : > { %v1494_v53 = vmul.f32 1.442695, %v5221_v43  ;;  %v5223_v44 = vsub.f32 %v5222_v16, %v3500_v4  ;;  %2645 = vpow2.f32 %v1490_v5  ;;  %v1598_v37 = vadd.f32 %v3967_v25, %v1597_v0  ;;  %1864 = vmatpush1.bf16.msra.mxu1 %v5226_v51  ;;  %v4216_v43 = vpop.eup %2627  ;;  %v5227_v16 = vld [vmem:[#allocation31_spill] sm:$0xff] }
 0x2cd   : > { %v1498_v56 = vmul.f32 1.442695, %v5225_v59  ;;  %v1667_v46 = vadd.f32 %v3977_v27, %v1666_v55  ;;  %2647 = vpow2.f32 %v1492_v13  ;;  %v5228_v59 = vsub.f32 %v5227_v16, %v3500_v4  ;;  %1865 = vmatprep.subr.bf16.mxu1 %v1737_v28  ;;  %v4226_v0 = vpop.eup %2629  ;;  %v5231_v16 = vld [vmem:[#allocation37_spill] sm:$0xff]  ;;  %v5233_v28 = vld [vmem:[#allocation38_spill] sm:$0xff] }
 0x2ce   : > { %v1496_v31 = vmul.f32 1.442695, %v5223_v44  ;;  %v1751_v5 = vpack.c.bf16 %v4207_v9, %v4192_v34  ;;  %2649 = vpow2.f32 %v1494_v53  ;;  %v1502_v55 = vmul.f32 1.442695, %v5230_v49  ;;  %v4233_v51 = vpop.eup %2631  ;;  %v5235_v49 = vld [vmem:[#allocation39_spill] sm:$0xff] }
 0x2cf   : > { %v1500_v44 = vmul.f32 1.442695, %v5228_v59  ;;  %v1599_v13 = vadd.f32 %v3983_v35, %v1598_v37  ;;  %v1668_v41 = vadd.f32 %v3993_v39, %v1667_v46  ;;  %v5232_v33 = vsub.f32 %v5231_v16, %v3500_v4  ;;  %v4241_v53 = vpop.eup %2633  ;;  %v5245_v35 = vld [vmem:[#allocation48_spill] sm:$0xff] }
 0x2d0   : > { %2651 = vpow2.f32 %v1496_v31  ;;  %v5234_v59 = vsub.f32 %v5233_v28, %v3504_v8  ;;  %1866 = vmatpush1.bf16.msra.mxu1 %v1736_v32  ;;  %v1752_v31 = vpack.c.bf16 %v4233_v51, %v4216_v43  ;;  %v4250_v46 = vpop.eup %2635  ;;  %v5236_v16 = vsub.f32 %v5235_v49, %v3500_v4 }
 0x2d1   : > { %v1504_v27 = vmul.f32 1.442695, %v5232_v33  ;;  %2653 = vpow2.f32 %v1498_v56  ;;  %v1600_v22 = vadd.f32 %v4001_v11, %v1599_v13  ;;  %v1669_v37 = vadd.f32 %v4003_v45, %v1668_v41  ;;  %1867 = vmatprep.subr.bf16.mxu1 %v1739_v26  ;;  %v4260_v13 = vpop.eup %2637  ;;  %v5241_v26 = vld [vmem:[#allocation46_spill] sm:$0xff] }
 0x2d2   : > { %v1506_v54 = vmul.f32 1.442695, %v5234_v59  ;;  %2655 = vpow2.f32 %v1500_v44  ;;  %v1508_v33 = vmul.f32 1.442695, %v5236_v16  ;;  %v1753_v56 = vpack.c.bf16 %v4241_v53, %v4226_v0  ;;  %v4267_v28 = vpop.eup %2639  ;;  %v5239_v59 = vld [vmem:[#allocation45_spill] sm:$0xff] }
 0x2d3   : > { %2657 = vpow2.f32 %v1502_v55  ;;  %v5238_v25 = vsub.f32 %v5237_v60, %v3504_v8  ;;  %v1601_v44 = vadd.f32 %v4012_v19, %v1600_v22  ;;  %v1670_v41 = vadd.f32 %v4022_v2, %v1669_v37  ;;  %v4275_v55 = vpop.eup %2641  ;;  %v5253_v19 = vld [vmem:[#allocation56_spill] sm:$0xff] }
 0x2d4   : > { %2659 = vpow2.f32 %v1504_v27  ;;  %v5240_v39 = vsub.f32 %v5239_v59, %v3500_v4  ;;  %v5242_v49 = vsub.f32 %v5241_v26, %v3504_v8  ;;  %1868 = vmatpush1.bf16.msra.mxu1 %v1738_v3  ;;  %v1754_v27 = vpack.c.bf16 %v4267_v28, %v4250_v46 }
 0x2d5   : > { %v1510_v32 = vmul.f32 1.442695, %v5238_v25  ;;  %2661 = vpow2.f32 %v1506_v54  ;;  %v1602_v60 = vadd.f32 %v4029_v36, %v1601_v44  ;;  %v1671_v22 = vadd.f32 %v4037_v40, %v1670_v41  ;;  %v4284_v37 = vpop.eup %2643  ;;  %v5243_v25 = vld [vmem:[#allocation47_spill] sm:$0xff]  ;;  %1869 = vmatprep.subr.bf16.mxu1 %v1741_v50  ;;  %v5249_v50 = vld [vmem:[#allocation54_spill] sm:$0xff] }
 0x2d6   : > { %v1512_v45 = vmul.f32 1.442695, %v5240_v39  ;;  %v1514_v16 = vmul.f32 1.442695, %v5242_v49  ;;  %2663 = vpow2.f32 %v1508_v33  ;;  %v5244_v59 = vsub.f32 %v5243_v25, %v3500_v4  ;;  %v4294_v44 = vpop.eup %2645  ;;  %v5247_v49 = vld [vmem:[#allocation53_spill] sm:$0xff] }
 0x2d7   : > { %v1755_v54 = vpack.c.bf16 %v4275_v55, %v4260_v13  ;;  %2665 = vpow2.f32 %v1510_v32  ;;  %v5246_v11 = vsub.f32 %v5245_v35, %v3504_v8  ;;  %v1603_v33 = vadd.f32 %v4046_v24, %v1602_v60  ;;  %v4301_v26 = vpop.eup %2647 }
 0x2d8   : > { %v1516_v39 = vmul.f32 1.442695, %v5244_v59  ;;  %v1672_v41 = vadd.f32 %v4056_v12, %v1671_v22  ;;  %2667 = vpow2.f32 %v1512_v45  ;;  %v5248_v2 = vsub.f32 %v5247_v49, %v3500_v4  ;;  %v4309_v32 = vpop.eup %2649  ;;  %1870 = vmatpush1.bf16.msra.mxu1 %v1740_v6 }
 0x2d9   : > { %v1518_v3 = vmul.f32 1.442695, %v5246_v11  ;;  %v5250_v25 = vsub.f32 %v5249_v50, %v3504_v8  ;;  %2669 = vpow2.f32 %v1514_v16  ;;  %v1604_v35 = vadd.f32 %v4063_v57, %v1603_v33  ;;  %v5251_v11 = vld [vmem:[#allocation55_spill] sm:$0xff]  ;;  %1871 = vmatprep.subr.bf16.mxu1 %v1743_v18  ;;  %v5257_v18 = vld [vmem:[#allocation62_spill] sm:$0xff]  ;;  %v5261_v57 = vld [vmem:[#allocation64_spill] sm:$0xff] }
 0x2da   : > { %v1520_v40 = vmul.f32 1.442695, %v5248_v2  ;;  %v1673_v60 = vadd.f32 %v4071_v10, %v1672_v41  ;;  %v1756_v45 = vpack.c.bf16 %v4301_v26, %v4284_v37  ;;  %v4318_v22 = vpop.eup %2651  ;;  %2671 = vpow2.f32 %v1516_v39 }
 0x2db   : > { %v1522_v59 = vmul.f32 1.442695, %v5250_v25  ;;  %v5252_v49 = vsub.f32 %v5251_v11, %v3500_v4  ;;  %v1757_v16 = vpack.c.bf16 %v4309_v32, %v4294_v44  ;;  %v4328_v33 = vpop.eup %2653  ;;  %2673 = vpow2.f32 %v1518_v3  ;;  %v5255_v25 = vld [vmem:[#allocation61_spill] sm:$0xff] }
 0x2dc   : > { %v5254_v36 = vsub.f32 %v5253_v19, %v3504_v8  ;;  %v1605_v39 = vadd.f32 %v4080_v62, %v1604_v35  ;;  %v1674_v41 = vadd.f32 %v4090_v23, %v1673_v60  ;;  %v4335_v50 = vpop.eup %2655  ;;  %2675 = vpow2.f32 %v1520_v40  ;;  %1872 = vmatpush1.bf16.msra.mxu1 %v1742_v20  ;;  %v5263_v23 = vld [vmem:[#allocation69_spill] sm:$0xff] }
 0x2dd   : > { %v1524_v2 = vmul.f32 1.442695, %v5252_v49  ;;  %v5256_v12 = vsub.f32 %v5255_v25, %v3500_v4  ;;  %v5258_v11 = vsub.f32 %v5257_v18, %v3504_v8  ;;  %v4343_v3 = vpop.eup %2657  ;;  %2677 = vpow2.f32 %v1522_v59  ;;  %1873 = vmatprep.subr.bf16.mxu1 %v1745_v42 }
 0x2de   : > { %v1526_v6 = vmul.f32 1.442695, %v5254_v36  ;;  %v1606_v19 = vadd.f32 %v4097_v52, %v1605_v39  ;;  %v1675_v35 = vadd.f32 %v4105_v38, %v1674_v41  ;;  %v4352_v60 = vpop.eup %2659  ;;  %v5259_v36 = vld [vmem:[#allocation63_spill] sm:$0xff]  ;;  %v1759_v59 = vpack.c.bf16 %v4343_v3, %v4328_v33  ;;  %v5270_v52 = vld [vmem:[#allocation72_spill] sm:$0xff] }
 0x2df   : > { %v1528_v10 = vmul.f32 1.442695, %v5256_v12  ;;  %v1530_v49 = vmul.f32 1.442695, %v5258_v11  ;;  %2679 = vpow2.f32 %v1524_v2  ;;  %v5260_v25 = vsub.f32 %v5259_v36, %v3500_v4  ;;  %v4362_v24 = vpop.eup %2661  ;;  %v5265_v11 = vld [vmem:[#allocation70_spill] sm:$0xff] }
 0x2e0   : > { %2681 = vpow2.f32 %v1526_v6  ;;  %v5262_v20 = vsub.f32 %v5261_v57, %v3504_v8  ;;  %v1607_v2 = vadd.f32 %v4114_v58, %v1606_v19  ;;  %v1676_v41 = vadd.f32 %v4124_v63, %v1675_v35  ;;  %v4369_v18 = vpop.eup %2663  ;;  %v2469_v6 = vld [vmem:[%s3008_s11] ss:$16 sps:$4 sm:$0xff]   ;;  %1874 = vmatpush1.bf16.msra.mxu1 %v1744_v61  ;;  %v2474_v35 = vld [vmem:[%s3008_s11 + $0xc] ss:$16 sps:$4 sm:$0xff]  }
 0x2e1   : > { %v1532_v12 = vmul.f32 1.442695, %v5260_v25  ;;  %2683 = vpow2.f32 %v1528_v10  ;;  %v5264_v38 = vsub.f32 %v5263_v23, %v3500_v4  ;;  %v5266_v36 = vsub.f32 %v5265_v11, %v3504_v8  ;;  %v4378_v40 = vpop.eup %2665  ;;  %v5267_v23 = vld [vmem:[#allocation71_spill] sm:$0xff] }
 0x2e2   : > { %v1534_v39 = vmul.f32 1.442695, %v5262_v20  ;;  %2685 = vpow2.f32 %v1530_v49  ;;  %v1608_v57 = vadd.f32 %v4131_v7, %v1607_v2  ;;  %v1677_v19 = vadd.f32 %v4139_v48, %v1676_v41  ;;  %v4388_v20 = vpop.eup %2667 }
 0x2e3   : > { %v1536_v42 = vmul.f32 1.442695, %v5264_v38  ;;  %v1538_v25 = vmul.f32 1.442695, %v5266_v36  ;;  %2687 = vpow2.f32 %v1532_v12  ;;  %v5268_v38 = vsub.f32 %v5267_v23, %v3500_v4  ;;  %v4398_v62 = vpop.eup %2669  ;;  %1876 = vmatmul.mubr.bf16.vlgmr.msra.gmra.mrb[44].mxu1 %v2469_v6 }
 0x2e4   : > { %v5269_v49 = vpack.c.bf16 %v4139_v48, %v4124_v63  ;;  %2689 = vpow2.f32 %v1534_v39  ;;  %v5271_v61 = vsub.f32 %v5270_v52, %v3504_v8  ;;  %v1609_v12 = vadd.f32 %v4148_v30, %v1608_v57  ;;  %v4405_v23 = vpop.eup %2671  ;;  %1918 = vmatprep.mubr.bf16.mxu1 %v2474_v35 }
 0x2e5   : > { %v1540_v11 = vmul.f32 1.442695, %v5268_v38  ;;  %v1678_v36 = vadd.f32 %v4158_v21, %v1677_v19  ;;  %2691 = vpow2.f32 %v1536_v42  ;;  %v5272_v38 = vld [vmem:[#allocation77_spill] sm:$0xff]  ;;  %v4413_v39 = vpop.eup %2673  ;;  %v5276_v19 = vpack.c.bf16 %v4131_v7, %v4114_v58  ;;  %v5280_v7 = vld [vmem:[#allocation80_spill] sm:$0xff] }
 0x2e6   : > { %1886 = vmatprep.subr.bf16.mxu1 %v5269_v49  ;;  %v1542_v41 = vmul.f32 1.442695, %v5271_v61  ;;  %v5273_v63 = vsub.f32 %v5272_v38, %v3500_v4  ;;  %v5274_v49 = vld [vmem:[#allocation78_spill] sm:$0xff]  ;;  %2693 = vpow2.f32 %v1538_v25  ;;  %v1610_v52 = vadd.f32 %v4165_v14, %v1609_v12  ;;  %v4422_v61 = vpop.eup %2675 }
 0x2e7   : > { %v5275_v10 = vsub.f32 %v5274_v49, %v3504_v8  ;;  %v1679_v57 = vadd.f32 %v4173_v29, %v1678_v36  ;;  %1887 = vmatpush1.bf16.msra.mxu1 %v5276_v19  ;;  %v1762_v42 = vpack.c.bf16 %v4405_v23, %v4388_v20  ;;  %2695 = vpow2.f32 %v1540_v11  ;;  %v4432_v58 = vpop.eup %2677  ;;  %v5282_v19 = vld [vmem:[#allocation85_spill] sm:$0xff] }
 0x2e8   : > { %v1544_v48 = vmul.f32 1.442695, %v5273_v63  ;;  %v5279_v25 = vpack.c.bf16 %v4173_v29, %v4158_v21  ;;  %v1763_v12 = vpack.c.bf16 %v4413_v39, %v4398_v62  ;;  %2697 = vpow2.f32 %v1542_v41 }
 0x2e9   : > { %v1546_v2 = vmul.f32 1.442695, %v5275_v10  ;;  %v5277_v10 = vld [vmem:[#allocation79_spill] sm:$0xff]  ;;  %v5281_v35 = vsub.f32 %v5280_v7, %v3504_v8  ;;  %v1611_v11 = vadd.f32 %v4182_v1, %v1610_v52  ;;  %v1680_v63 = vadd.f32 %v4192_v34, %v1679_v57  ;;  %v4439_v49 = vpop.eup %2679 }
 0x2ea   : > { %v5278_v6 = vsub.f32 %v5277_v10, %v3500_v4  ;;  %1888 = vmatprep.subr.bf16.mxu1 %v5279_v25  ;;  %2699 = vpow2.f32 %v1544_v48  ;;  %v5283_v21 = vsub.f32 %v5282_v19, %v3500_v4  ;;  %v5284_v10 = vld [vmem:[#allocation86_spill] sm:$0xff]  ;;  %v4447_v41 = vpop.eup %2681  ;;  %v5286_v57 = vpack.c.bf16 %v4165_v14, %v4148_v30  ;;  %v5287_v19 = vld [vmem:[#allocation87_spill] sm:$0xff]  ;;  %v5289_v30 = vld [vmem:[#allocation88_spill] sm:$0xff] }
 0x2eb   : > { %v1550_v36 = vmul.f32 1.442695, %v5281_v35  ;;  %2701 = vpow2.f32 %v1546_v2  ;;  %v1612_v7 = vadd.f32 %v4199_v47, %v1611_v11  ;;  %v1681_v52 = vadd.f32 %v4207_v9, %v1680_v63  ;;  %v4456_v35 = vpop.eup %2683 }
 0x2ec   : > { %v1548_v38 = vmul.f32 1.442695, %v5278_v6  ;;  %v1552_v29 = vmul.f32 1.442695, %v5283_v21  ;;  %v5285_v6 = vsub.f32 %v5284_v10, %v3504_v8  ;;  %1889 = vmatpush1.bf16.msra.mxu1 %v5286_v57  ;;  %v5288_v21 = vsub.f32 %v5287_v19, %v3500_v4  ;;  %v4466_v11 = vpop.eup %2685  ;;  %v5291_v19 = vld [vmem:[#allocation93_spill] sm:$0xff] }
 0x2ed   : > { %1890 = vmatprep.subr.bf16.mxu1 %v1751_v5  ;;  %v1765_v2 = vpack.c.bf16 %v4447_v41, %v4432_v58  ;;  %v5290_v14 = vsub.f32 %v5289_v30, %v3504_v8  ;;  %v4473_v57 = vpop.eup %2687  ;;  %v5292_v34 = vsub.f32 %v5291_v19, %v3500_v4  ;;  %v5293_v5 = vld [vmem:[#allocation94_spill] sm:$0xff]  ;;  %v5296_v19 = vld [vmem:[#allocation95_spill] sm:$0xff] }
 0x2ee   : > { %v1554_v25 = vmul.f32 1.442695, %v5285_v6  ;;  %2703 = vpow2.f32 %v1548_v38  ;;  %v1556_v10 = vmul.f32 1.442695, %v5288_v21  ;;  %v1613_v38 = vadd.f32 %v4216_v43, %v1612_v7  ;;  %v5306_v43 = vld [vmem:[#allocation104_spill] sm:$0xff] }
 0x2ef   : > { %2705 = vpow2.f32 %v1550_v36  ;;  %v1558_v63 = vmul.f32 1.442695, %v5290_v14  ;;  %v1682_v6 = vadd.f32 %v4226_v0, %v1681_v52  ;;  %v1560_v9 = vmul.f32 1.442695, %v5292_v34  ;;  %v4481_v36 = vpop.eup %2689 }
 0x2f0   : > { %2707 = vpow2.f32 %v1552_v29  ;;  %v5294_v21 = vsub.f32 %v5293_v5, %v3504_v8  ;;  %v1614_v30 = vadd.f32 %v4233_v51, %v1613_v38  ;;  %v5295_v52 = vpack.c.bf16 %v4199_v47, %v4182_v1  ;;  %v4490_v14 = vpop.eup %2691  ;;  %v5298_v1 = vld [vmem:[#allocation96_spill] sm:$0xff] }
 0x2f1   : > { %2709 = vpow2.f32 %v1554_v25  ;;  %v1683_v7 = vadd.f32 %v4241_v53, %v1682_v6  ;;  %v5297_v34 = vsub.f32 %v5296_v19, %v3500_v4  ;;  %v1767_v25 = vpack.c.bf16 %v4481_v36, %v4466_v11  ;;  %v4500_v38 = vpop.eup %2693  ;;  %v5300_v19 = vld [vmem:[#allocation101_spill] sm:$0xff] }
 0x2f2   : > { %v1562_v48 = vmul.f32 1.442695, %v5294_v21  ;;  %1891 = vmatpush1.bf16.msra.mxu1 %v5295_v52  ;;  %2711 = vpow2.f32 %v1556_v10  ;;  %v5299_v47 = vsub.f32 %v5298_v1, %v3504_v8  ;;  %v1615_v10 = vadd.f32 %v4250_v46, %v1614_v30  ;;  %v4507_v52 = vpop.eup %2695 }
 0x2f3   : > { %v1564_v5 = vmul.f32 1.442695, %v5297_v34  ;;  %1892 = vmatprep.subr.bf16.mxu1 %v1753_v56  ;;  %2713 = vpow2.f32 %v1558_v63  ;;  %v1684_v21 = vadd.f32 %v4260_v13, %v1683_v7  ;;  %v5301_v0 = vsub.f32 %v5300_v19, %v3500_v4  ;;  %v5302_v56 = vld [vmem:[#allocation102_spill] sm:$0xff]  ;;  %v4515_v63 = vpop.eup %2697 }
 0x2f4   : > { %v1566_v6 = vmul.f32 1.442695, %v5299_v47  ;;  %2715 = vpow2.f32 %v1560_v9  ;;  %v5303_v34 = vsub.f32 %v5302_v56, %v3504_v8  ;;  %v1616_v1 = vadd.f32 %v4267_v28, %v1615_v10  ;;  %v4524_v7 = vpop.eup %2699  ;;  %v5304_v47 = vld [vmem:[#allocation103_spill] sm:$0xff] }
 0x2f5   : > { %v1568_v53 = vmul.f32 1.442695, %v5301_v0  ;;  %2717 = vpow2.f32 %v1562_v48  ;;  %v1685_v30 = vadd.f32 %v4275_v55, %v1684_v21  ;;  %v1768_v9 = vpack.c.bf16 %v4507_v52, %v4490_v14  ;;  %v4534_v10 = vpop.eup %2701 }
 0x2f6   : > { %v1570_v29 = vmul.f32 1.442695, %v5303_v34  ;;  %1893 = vmatpush1.bf16.msra.mxu1 %v1752_v31  ;;  %2719 = vpow2.f32 %v1564_v5  ;;  %v5305_v19 = vsub.f32 %v5304_v47, %v3500_v4  ;;  %v1769_v48 = vpack.c.bf16 %v4515_v63, %v4500_v38 }
 0x2f7   : > { %1894 = vmatprep.subr.bf16.mxu1 %v1755_v54  ;;  %2721 = vpow2.f32 %v1566_v6  ;;  %v5307_v51 = vsub.f32 %v5306_v43, %v3504_v8  ;;  %v1617_v5 = vadd.f32 %v4284_v37, %v1616_v1  ;;  %v1686_v21 = vadd.f32 %v4294_v44, %v1685_v30 }
 0x2f8   : > { %v1572_v0 = vmul.f32 1.442695, %v5305_v19  ;;  %v4541_v4 = vpop.eup %2703  ;;  %2723 = vpow2.f32 %v1568_v53 }
 0x2f9   : > { %v1574_v31 = vmul.f32 1.442695, %v5307_v51  ;;  %v4543_v56 = vpop.eup %2705  ;;  %2725 = vpow2.f32 %v1570_v29  ;;  %v1618_v13 = vadd.f32 %v4301_v26, %v1617_v5  ;;  %v1687_v55 = vadd.f32 %v4309_v32, %v1686_v21 }
 0x2fa   : > { %1895 = vmatpush1.bf16.msra.mxu1 %v1754_v27  ;;  %v1770_v8 = vpack.c.bf16 %v4541_v4, %v4524_v7  ;;  %v4552_v54 = vpop.eup %2707  ;;  %2727 = vpow2.f32 %v1572_v0  ;;  %v1771_v29 = vpack.c.bf16 %v4543_v56, %v4534_v10 }
 0x2fb   : > { %1896 = vmatprep.subr.bf16.mxu1 %v1757_v16  ;;  %v4559_v6 = vpop.eup %2709  ;;  %2729 = vpow2.f32 %v1574_v31  ;;  %v1619_v53 = vadd.f32 %v4318_v22, %v1618_v13  ;;  %v1688_v46 = vadd.f32 %v4328_v33, %v1687_v55 }
 0x2fc   : > { %v4563_v28 = vpop.eup %2711 }
 0x2fd   : > { %v2714_v27 = vpop.eup %2713  ;;  %v1620_v34 = vadd.f32 %v4335_v50, %v1619_v53  ;;  %v1689_v1 = vadd.f32 %v4343_v3, %v1688_v46  ;;  %v1772_v44 = vpack.c.bf16 %v4563_v28, %v4552_v54 }
 0x2fe   : > { %1897 = vmatpush1.bf16.msra.mxu1 %v1756_v45  ;;  %v4572_v32 = vpop.eup %2715  ;;  %v1773_v16 = vpack.c.bf16 %v2714_v27, %v4559_v6  ;;  %v5308_v45 = vpack.c.bf16 %v4335_v50, %v4318_v22  ;;  %v5310_v50 = vpack.c.bf16 %v4369_v18, %v4352_v60 }
 0x2ff   : > { %1898 = vmatprep.subr.bf16.mxu1 %v1759_v59  ;;  %v2718_v30 = vpop.eup %2717  ;;  %v1621_v47 = vadd.f32 %v4352_v60, %v1620_v34  ;;  %v1690_v19 = vadd.f32 %v4362_v24, %v1689_v1  ;;  %v5309_v59 = vpack.c.bf16 %v4378_v40, %v4362_v24 }
 0x300   : > { %v2720_v0 = vpop.eup %2719 }
 0x301   : > { %v2722_v43 = vpop.eup %2721  ;;  %v1622_v37 = vadd.f32 %v4369_v18, %v1621_v47  ;;  %v1691_v26 = vadd.f32 %v4378_v40, %v1690_v19  ;;  %v1774_v33 = vpack.c.bf16 %v2720_v0, %v4572_v32 }
 0x302   : > { %1899 = vmatpush1.bf16.msra.mxu1 %v5308_v45  ;;  %v4586_v3 = vpop.eup %2723  ;;  %v1775_v51 = vpack.c.bf16 %v2722_v43, %v2718_v30  ;;  %v1778_v45 = vld [vmem:[#allocation3] sm:$0x3] }
 0x303   : > { %1900 = vmatprep.subr.bf16.mxu1 %v5309_v59  ;;  %v2726_v31 = vpop.eup %2725  ;;  %v1623_v5 = vadd.f32 %v4388_v20, %v1622_v37  ;;  %v1692_v21 = vadd.f32 %v4398_v62, %v1691_v26 }
 0x304   : > { %v2728_v13 = vpop.eup %2727 }
 0x305   : > { %v2730_v55 = vpop.eup %2729  ;;  %v1624_v53 = vadd.f32 %v4405_v23, %v1623_v5  ;;  %v1693_v22 = vadd.f32 %v4413_v39, %v1692_v21  ;;  %v1776_v46 = vpack.c.bf16 %v2728_v13, %v4586_v3  ;;  %v5315_v5 = vld [vmem:[#allocation139_spill] sm:$0xff] }
 0x306   : > { %1901 = vmatpush1.bf16.msra.mxu1 %v5310_v50  ;;  %v1777_v40 = vpack.c.bf16 %v2730_v55, %v2726_v31  ;;  %v1806_v50 = vld [vmem:[#allocation4 + $0x10] sm:$0xff] }
 0x307   : > { %1902 = vmatprep.subr.bf16.mxu1 %v1763_v12  ;;  %v1625_v24 = vadd.f32 %v4422_v61, %v1624_v53  ;;  %v1694_v34 = vadd.f32 %v4432_v58, %v1693_v22  ;;  %v5311_v12 = vpack.c.bf16 %v4439_v49, %v4422_v61  ;;  %v1805_v22 = vld [vmem:[#allocation4 + $0x8] sm:$0xff] }
 0x309   : > { %v1626_v1 = vadd.f32 %v4439_v49, %v1625_v24  ;;  %v1695_v47 = vadd.f32 %v4447_v41, %v1694_v34  ;;  %v5312_v41 = vpack.c.bf16 %v4473_v57, %v4456_v35 }
 0x30a   : > { %1903 = vmatpush1.bf16.msra.mxu1 %v1762_v42 }
 0x30b   : > { %1904 = vmatprep.subr.bf16.mxu1 %v1765_v2  ;;  %v1627_v60 = vadd.f32 %v4456_v35, %v1626_v1  ;;  %v1696_v18 = vadd.f32 %v4466_v11, %v1695_v47 }
 0x30d   : > { %v1628_v62 = vadd.f32 %v4473_v57, %v1627_v60  ;;  %v1697_v39 = vadd.f32 %v4481_v36, %v1696_v18 }
 0x30e   : > { %1905 = vmatpush1.bf16.msra.mxu1 %v5311_v12 }
 0x30f   : > { %1906 = vmatprep.subr.bf16.mxu1 %v1767_v25  ;;  %v1629_v20 = vadd.f32 %v4490_v14, %v1628_v62  ;;  %v1698_v23 = vadd.f32 %v4500_v38, %v1697_v39 }
 0x311   : > { %v1630_v42 = vadd.f32 %v4507_v52, %v1629_v20  ;;  %v1699_v58 = vadd.f32 %v4515_v63, %v1698_v23  ;;  %v5313_v52 = vld [vmem:[#allocation138_spill] sm:$0xff] }
 0x312   : > { %1907 = vmatpush1.bf16.msra.mxu1 %v5312_v41  ;;  %v1969_v41 = vld [vmem:[%s4746_s5] sm:$0xff] (!%p2351_p6) }
 0x313   : > { %1908 = vmatprep.subr.bf16.mxu1 %v1769_v48  ;;  %v1631_v61 = vadd.f32 %v4524_v7, %v1630_v42  ;;  %v1700_v49 = vadd.f32 %v4534_v10, %v1699_v58  ;;  %v2831_v42 = vmov (!%p2351_p6), 0   ;;  %v1971_v58 = vld [vmem:[%s4746_s5 + $0x10] sm:$0xff] (!%p2351_p6) }
 0x314   : > { %2042 = vmatprep.mubr.bf16.mxu0 (!%p2351_p6), %v2831_v42  ;;  %2734 = vset.pattern.permute.xlu1 (!%p2351_p6), %v2831_v42 }
 0x315   : > { %v1632_v2 = vadd.f32 %v4541_v4, %v1631_v61  ;;  %v1701_v11 = vadd.f32 %v4543_v56, %v1700_v49  ;;  %2733 = vset.pattern.permute.xlu0 (!%p2351_p6), %v2831_v42  ;;  %1985 = vperm.xlu1 (!%p2351_p6), %2734, %v1971_v58   ;;  %v1972_v61 = vld [vmem:[%s4746_s5 + $0x18] sm:$0xff] (!%p2351_p6)  ;;  %v1970_v49 = vld [vmem:[%s4746_s5 + $0x8] sm:$0xff] (!%p2351_p6) }
 0x316   : > { %1909 = vmatpush1.bf16.msra.mxu1 %v1768_v9  ;;  %v1178_v9 = vsub.f32 %v5313_v52, %v3492_v15  ;;  %1975 = vperm.xlu0 (!%p2351_p6), %2733, %v1969_v41   ;;  %v2074_v58 = vld [vmem:[%s3010_s10 + $0x18] sm:$0xff] (!%p2351_p6) }
 0x317   : > { %1910 = vmatprep.subr.bf16.mxu1 %v1771_v29  ;;  %v1633_v35 = vadd.f32 %v4552_v54, %v1632_v2  ;;  %v1702_v57 = vadd.f32 %v4559_v6, %v1701_v11  ;;  %v2472_v6 = vld [vmem:[%s3008_s11 + $0x8] ss:$16 sps:$4 sm:$0xff]  }
 0x318   : > { %v1179_v7 = vmul.f32 1.442695, %v1178_v9  ;;  %v2078_v41 = vld [vmem:[%s3010_s10 + $0x38] sm:$0xff] (!%p2351_p6) }
 0x319   : > { %v1634_v36 = vadd.f32 %v4563_v28, %v1633_v35  ;;  %v1703_v25 = vadd.f32 %v2714_v27, %v1702_v57  ;;  %1990 = vperm.xlu1 (!%p2351_p6), %2734, %v1972_v61  }
 0x31a   : > { %1911 = vmatpush1.bf16.msra.mxu1 %v1770_v8  ;;  %2731 = vpow2.f32 %v1179_v7  ;;  %1980 = vperm.xlu0 (!%p2351_p6), %2733, %v1970_v49   ;;  %v2736_v7 = vld [vmem:[%s5319_s13 + $0x8] sm:$0xff] (!%p2351_p6)  }
 0x31b   : > { %1912 = vmatprep.subr.bf16.mxu1 %v1773_v16  ;;  %v1635_v38 = vadd.f32 %v4572_v32, %v1634_v36  ;;  %v1704_v63 = vadd.f32 %v2718_v30, %v1703_v25  ;;  %v5317_v25 = vld [vmem:[#allocation140_spill] sm:$0xff] (!%p2351_p6) }
 0x31d   : > { %v1636_v48 = vadd.f32 %v2720_v0, %v1635_v38  ;;  %v1705_v14 = vadd.f32 %v2722_v43, %v1704_v63  ;;  %v5318_v63 = vld [vmem:[#allocation139_spill] sm:$0xff] (!%p2351_p6) }
 0x31e   : > { %1913 = vmatpush1.bf16.msra.mxu1 %v1772_v44 }
 0x31f   : > { %1914 = vmatprep.subr.bf16.mxu1 %v1775_v51  ;;  %v1637_v10 = vadd.f32 %v4586_v3, %v1636_v48  ;;  %v1706_v56 = vadd.f32 %v2726_v31, %v1705_v14 }
 0x321   : > { %v1638_v54 = vadd.f32 %v2728_v13, %v1637_v10  ;;  %v1707_v29 = vadd.f32 %v2730_v55, %v1706_v56  ;;  %v1804_v13 = vld [vmem:[#allocation4] sm:$0xff] }
 0x322   : > { %1915 = vmatpush1.bf16.msra.mxu1 %v1774_v33  ;;  %v5314_v33 = vld [vmem:[#allocation137_spill] sm:$0xff]  ;;  %v5316_v55 = vld [vmem:[#allocation140_spill] sm:$0xff] }
 0x323   : > { %1916 = vmatprep.subr.bf16.mxu1 %v1777_v40  ;;  %v1639_v4 = vrot.slane %v1638_v54, 4  ;;  %v1708_v8 = vrot.slane %v1707_v29, 4  ;;  %v1807_v40 = vld [vmem:[#allocation4 + $0x18] sm:$0xff] }
 0x324   : > { %v2732_v26 = vpop.eup %2731 }
 0x325   : > { %v1640_v28 = vadd.f32 %v1639_v4, %v1638_v54  ;;  %v1709_v27 = vadd.f32 %v1708_v8, %v1707_v29  ;;  %v1779_v59 = vmul.f32 %v2732_v26, %v1778_v45  ;;  %v1812_v21 = vrot.slane %v2732_v26, %v5315_v5  ;;  %v2735_v29 = vld [vmem:[%s5319_s13] sm:$0xff] (!%p2351_p6)  }
 0x326   : > { %1917 = vmatpush1.bf16.msra.mxu1 %v1776_v46  ;;  %v1816_v53 = vrot.slane %v2732_v26, %v5316_v55  ;;  %v2071_v5 = vld [vmem:[%s3010_s10] sm:$0xff] (!%p2351_p6) }
 0x327   : > { %v1641_v44 = vrot.slane %v1640_v28, 2  ;;  %v1710_v32 = vrot.slane %v1709_v27, 2  ;;  %v1819_v46 = vmul.f32 %v1812_v21, %v1804_v13  ;;  %v1821_v60 = vmul.f32 %v1812_v21, %v1806_v50  ;;  %v2075_v21 = vld [vmem:[%s3010_s10 + $0x20] sm:$0xff] (!%p2351_p6) }
 0x328   : > { %v1820_v34 = vmul.f32 %v1816_v53, %v1805_v22  ;;  %v1822_v39 = vmul.f32 %v1816_v53, %v1807_v40  ;;  %v2072_v40 = vld [vmem:[%s3010_s10 + $0x8] sm:$0xff] (!%p2351_p6) }
 0x329   : > { %1919 = vmatmul.mubr.bf16.vlgmr.msra.gmra.mrb[44].mxu1 %v2472_v6  ;;  %v1642_v15 = vadd.f32 %v1641_v44, %v1640_v28  ;;  %v1711_v16 = vadd.f32 %v1710_v32, %v1709_v27 }
 0x32a   : > { %2052 = vmatprep.mubr.bf16.mxu1 (!%p2351_p6), %v2831_v42 }
 0x32b   : > { %v1643_v30 = vrot.slane %v1642_v15, 1  ;;  %v1712_v19 = vrot.slane %v1711_v16, 1 }
 0x32d   : > { %v1644_v0 = vadd.f32 %v1643_v30, %v1642_v15  ;;  %v1713_v43 = vadd.f32 %v1712_v19, %v1711_v16  ;;  %v2080_v19 = vstv (!%p2351_p6), %s2079_s24 }
 0x32f   : > { %v1782_v37 = vcombine.low %v1644_v0, %v1713_v43 }
 0x331   : > { %v1789_v3 = vrot.slane %v1782_v37, %v5314_v33 }
 0x333   : > { %v1796_v51 = vrot.slane %v1789_v3, %v5314_v33 }
 0x335   : > { %v1798_v31 = vadd.f32 %v1796_v51, %v1779_v59 }
 0x337   : > { %1803 = vst.msk [vmem:[#allocation3] sm:$0x3] %vm3854_vm3, %v1798_v31 }
 0x33e   : > { %v1942_v23 = vld [vmem:[#allocation3] sm:$0x3] (!%p2351_p6) }
 0x33f   : > { %2737 = vrcp.f32 (!%p2351_p6), %v1942_v23 }
 0x349   : > { %v2738_v11 = vpop.eup (!%p2351_p6), %2737 }
 0x34a   : > { %v1956_v38 = vrot.slane (!%p2351_p6), %v2738_v11, %v5317_v25  ;;  %v1952_v48 = vrot.slane (!%p2351_p6), %v2738_v11, %v5318_v63 }
 0x394   : > { %v1986_v4 = vpop.permute.xlu1 (!%p2351_p6), %1985 }
 0x395   : > { %v1976_v8 = vpop.permute.xlu0 (!%p2351_p6), %1975 }
 0x398   : > { %v1991_v6 = vpop.permute.xlu1 (!%p2351_p6), %1990 }
 0x399   : > { %v1981_v28 = vpop.permute.xlu0 (!%p2351_p6), %1980 }
 0x3fc   : > { %v1920_v24 = vpop.f32.mrb[44].mxu1  ;;  %1941 = sbr.rel (%p2351_p6) target bundleno = 1266 (0x4f2), region = 102 }
 0x3fd   : > { %v1929_v1 = vadd.f32 %v1920_v24, %v1819_v46  ;;  %v1922_v47 = vpop.f32.mrb[45].mxu1  ;;  %v2076_v24 = vld [vmem:[%s3010_s10 + $0x28] sm:$0xff] (!%p2351_p6) }
 0x3fe   : > { %v1930_v18 = vadd.f32 %v1922_v47, %v1820_v34  ;;  %v1924_v62 = vpop.f32.mrb[46].mxu1 }
 0x3ff   : > { %1933 = vst [vmem:[#allocation4] sm:$0xff] %v1929_v1  ;;  %v1931_v17 = vadd.f32 %v1924_v62, %v1821_v60  ;;  %v1926_v12 = vpop.f32.mrb[47].mxu1  ;;  %v2077_v62 = vld [vmem:[%s3010_s10 + $0x30] sm:$0xff] (!%p2351_p6) }
 0x400   : > { %1934 = vst [vmem:[#allocation4 + $0x8] sm:$0xff] %v1930_v18  ;;  %v1932_v20 = vadd.f32 %v1926_v12, %v1822_v39  ;;  %v2073_v18 = vld [vmem:[%s3010_s10 + $0x10] sm:$0xff] (!%p2351_p6) }
 0x401   : > { %1935 = vst [vmem:[#allocation4 + $0x10] sm:$0xff] %v1931_v17 }
 0x402   : > { %1936 = vst [vmem:[#allocation4 + $0x18] sm:$0xff] %v1932_v20 }
 0x406   : > { %v1944_v57 = vld [vmem:[#allocation4] sm:$0xff] }
 0x407   : > { %v1945_v2 = vld [vmem:[#allocation4 + $0x8] sm:$0xff]  ;;  %v1959_v9 = vmul.f32 %v1952_v48, %v1944_v57 }
 0x408   : > { %v1946_v36 = vld [vmem:[#allocation4 + $0x10] sm:$0xff]  ;;  %v1960_v14 = vmul.f32 %v1956_v38, %v1945_v2 }
 0x409   : > { %v1947_v35 = vld [vmem:[#allocation4 + $0x18] sm:$0xff]  ;;  %v1961_v10 = vmul.f32 %v1952_v48, %v1946_v36 }
 0x40a   : > { %v1962_v52 = vmul.f32 %v1956_v38, %v1947_v35 }
 0x40b   : > { %v1963_v54 = vpack.c.bf16 %v1961_v10, %v1959_v9 }
 0x40c   : > { %v1964_v56 = vpack.c.bf16 %v1962_v52, %v1960_v14 }
 0x40e   : > { %2010 = vmatprep.subr.bf16.mxu0 %v1964_v56  ;;  %2368 = vmatprep.subr.bf16.mxu1 %v1964_v56 }
 0x40f   : > { %2011 = vmatpush1.bf16.msra.mxu0 %v1963_v54  ;;  %2369 = vmatpush1.bf16.msra.mxu1 %v1963_v54 }
 0x412   : > { %2354 = vmatmul.mubr.msk.bf16.vlgmr.msra.gmra.mrb[0].mxu0 %vm2003_vm4, %v2735_v29  ;;  %2355 = vmatmul.mubr.msk.bf16.vlgmr.msra.gmra.mrb[0].mxu1 %vm2003_vm4, %v2736_v7 }
 0x4e5   : > { %v2044_v27 = vpop.f32.mrb[0].mxu0  ;;  %v2054_v44 = vpop.f32.mrb[0].mxu1 }
 0x4e6   : > { %v2045_v32 = vadd.f32 %v2044_v27, %v1976_v8  ;;  %v2055_v15 = vadd.f32 %v2054_v44, %v1986_v4  ;;  %v2046_v16 = vpop.f32.mrb[1].mxu0  ;;  %v2056_v30 = vpop.f32.mrb[1].mxu1 }
 0x4e7   : > { %v2047_v0 = vadd.f32 %v2046_v16, %v1976_v8  ;;  %v2057_v43 = vadd.f32 %v2056_v30, %v1986_v4  ;;  %v2048_v37 = vpop.f32.mrb[2].mxu0  ;;  %v2058_v26 = vpop.f32.mrb[2].mxu1 }
 0x4e8   : > { %v2063_v45 = vmax.f32 %v2045_v32, 0.0  ;;  %v2067_v33 = vmax.f32 %v2055_v15, 0.0  ;;  %v2049_v3 = vadd.f32 %v2048_v37, %v1981_v28  ;;  %v2059_v59 = vadd.f32 %v2058_v26, %v1991_v6  ;;  %v2050_v51 = vpop.f32.mrb[3].mxu0  ;;  %v2060_v31 = vpop.f32.mrb[3].mxu1 }
 0x4e9   : > { %v2064_v13 = vmax.f32 %v2047_v0, 0.0  ;;  %v2068_v55 = vmax.f32 %v2057_v43, 0.0  ;;  %v2051_v53 = vadd.f32 %v2050_v51, %v1981_v28  ;;  %v2061_v22 = vadd.f32 %v2060_v31, %v1991_v6 }
 0x4ea   : > { %v2081_v50 = vmul.f32 %v2080_v19, %v2063_v45  ;;  %v2085_v46 = vmul.f32 %v2080_v19, %v2067_v33  ;;  %v2065_v34 = vmax.f32 %v2049_v3, 0.0  ;;  %v2069_v1 = vmax.f32 %v2059_v59, 0.0 }
 0x4eb   : > { %v2082_v47 = vmul.f32 %v2080_v19, %v2064_v13  ;;  %v2086_v60 = vmul.f32 %v2080_v19, %v2068_v55  ;;  %v2066_v39 = vmax.f32 %v2051_v53, 0.0  ;;  %v2070_v17 = vmax.f32 %v2061_v22, 0.0 }
 0x4ec   : > { %v2089_v12 = vadd.f32 %v2081_v50, %v2071_v5  ;;  %v2093_v20 = vadd.f32 %v2085_v46, %v2075_v21  ;;  %v2083_v23 = vmul.f32 %v2080_v19, %v2065_v34  ;;  %v2087_v42 = vmul.f32 %v2080_v19, %v2069_v1 }
 0x4ed   : > { %v2090_v61 = vadd.f32 %v2082_v47, %v2072_v40  ;;  %v2094_v49 = vadd.f32 %v2086_v60, %v2076_v24  ;;  %v2084_v2 = vmul.f32 %v2080_v19, %v2066_v39  ;;  %v2088_v11 = vmul.f32 %v2080_v19, %v2070_v17 }
 0x4ee   : > { %2097 = vst [vmem:[%s3012_s7] sm:$0xff] %v2089_v12  ;;  %2101 = vst [vmem:[%s3012_s7 + $0x20] sm:$0xff] %v2093_v20  ;;  %v2091_v35 = vadd.f32 %v2083_v23, %v2073_v18  ;;  %v2095_v57 = vadd.f32 %v2087_v42, %v2077_v62 }
 0x4ef   : > { %2098 = vst [vmem:[%s3012_s7 + $0x8] sm:$0xff] %v2090_v61  ;;  %2102 = vst [vmem:[%s3012_s7 + $0x28] sm:$0xff] %v2094_v49  ;;  %v2092_v36 = vadd.f32 %v2084_v2, %v2074_v58  ;;  %v2096_v25 = vadd.f32 %v2088_v11, %v2078_v41 }
 0x4f0   : > { %2099 = vst [vmem:[%s3012_s7 + $0x10] sm:$0xff] %v2091_v35  ;;  %2103 = vst [vmem:[%s3012_s7 + $0x30] sm:$0xff] %v2095_v57 }
 0x4f1   : > { %2100 = vst [vmem:[%s3012_s7 + $0x18] sm:$0xff] %v2092_v36  ;;  %2104 = vst [vmem:[%s3012_s7 + $0x38] sm:$0xff] %v2096_v25 }
 0x4f2 PF: > { %2111 = sbr.rel (!%p2960_p9) target bundleno = 1278 (0x4fe), region = 106  ;;  %s2358_s10 = sshll.u32 (%p2960_p9), %s2809_s9, 8 }
 0x4f3   : > { %s2114_s28 = sadd.s32 (%p2960_p9), %s2358_s10, %s2995_s16  ;;  %s5320_s8 = sld [smem:[#allocation144_spill]] (%p2960_p9) }
 0x4f4   : > { %s2359_s22 = sshll.u32 (%p2960_p9), %s2114_s28, 3 }
 0x4f5   : > { %v2129_v38 = vld [vmem:[%s3012_s7] sm:$0xff] (%p2960_p9) }
 0x4f6   : > { %v2131_v63 = vld [vmem:[%s3012_s7 + $0x8] sm:$0xff] (%p2960_p9)  ;;  %v2137_v52 = vld [vmem:[%s3012_s7 + $0x20] sm:$0xff] (%p2960_p9) }
 0x4f7   : > { %v2133_v48 = vld [vmem:[%s3012_s7 + $0x10] sm:$0xff] (%p2960_p9)  ;;  %v2139_v9 = vld [vmem:[%s3012_s7 + $0x28] sm:$0xff] (%p2960_p9) }
 0x4f8   : > { %v2135_v14 = vld [vmem:[%s3012_s7 + $0x18] sm:$0xff] (%p2960_p9)  ;;  %v2141_v10 = vld [vmem:[%s3012_s7 + $0x30] sm:$0xff] (%p2960_p9) }
 0x4f9   : > { %v2143_v56 = vld [vmem:[%s3012_s7 + $0x38] sm:$0xff]  ;;  %s2116_s25 = scalar_lea.vmem %s5320_s8, %s2359_s22 }
 0x4fa   : > { %2130 = vst [vmem:[%s2116_s25] sm:$0xff] %v2129_v38  ;;  %2132 = vst [vmem:[%s2116_s25 + $0x8] sm:$0xff] %v2131_v63 }
 0x4fb   : > { %2134 = vst [vmem:[%s2116_s25 + $0x200] sm:$0xff] %v2133_v48  ;;  %2136 = vst [vmem:[%s2116_s25 + $0x208] sm:$0xff] %v2135_v14 }
 0x4fc   : > { %2138 = vst [vmem:[%s2116_s25 + $0x400] sm:$0xff] %v2137_v52  ;;  %2140 = vst [vmem:[%s2116_s25 + $0x408] sm:$0xff] %v2139_v9 }
 0x4fd   : > { %2142 = vst [vmem:[%s2116_s25 + $0x600] sm:$0xff] %v2141_v10  ;;  %2144 = vst [vmem:[%s2116_s25 + $0x608] sm:$0xff] %v2143_v56 }
 0x4fe PF: > { %s18_s6 = sadd.s32 1, %s2825_s6   ;;  %s5321_s7 = sld [smem:[#allocation15_spill]] }
 0x4ff   : > { %p15_p7 = scmp.ge.s32.totalorder %s18_s6, 130   ;;  %s5322_s30 = sld [smem:[#allocation9_spill]] }
 0x500   : > { %s5323_s8 = sld [smem:[#allocation10_spill]]  ;;  %s5324_s9 = sld [smem:[#allocation11_spill]] }
 0x501   : > { %s5325_s10 = sld [smem:[#allocation12_spill]]  ;;  %s5326_s11 = sld [smem:[#allocation13_spill]] }
 0x502   : > { %s5327_s12 = sld [smem:[#allocation14_spill]]  ;;  %s5328_s26 = smov %s2789_s27 }
 0x503   : > { %s5329_s27 = smov %s2971_s4  ;;  %s5330_s28 = smov %s2797_s29 }
 0x504   : > { %s5331_s29 = smov %s5321_s7  ;;  %17 = sbr.rel (!%p15_p7) target bundleno = 12 (0xc), region = 174 }

</bundles_post_ra>
